<compile_context>
chip_gen: v6e
topology: v6e:2x2x1
jax: 0.10.0
libtpu: 0.0.40
codegen_flags: <defaults>
</compile_context>

<pallas_src>
import functools
import math

import numpy as np
import jax
import jax.numpy as jnp
from jax import lax
from jax.experimental import pallas as pl
from jax.experimental.pallas import tpu as pltpu


# ---------------------------------------------------------------------------
# helpers
# ---------------------------------------------------------------------------

def _round_up(x, m):
    return ((x + m - 1) // m) * m


def _im2col_valid(x_nhwc, k):
    """'valid' kxk patches, channel-last.  Returns (N*Ho*Wo, k*k*C), (Ho, Wo)."""
    N, H, W, C = x_nhwc.shape
    Ho, Wo = H - k + 1, W - k + 1
    patches = [x_nhwc[:, i:i + Ho, j:j + Wo, :] for i in range(k) for j in range(k)]
    cols = jnp.concatenate(patches, axis=-1)          # (N, Ho, Wo, k*k*C)
    return cols.reshape(N * Ho * Wo, k * k * C), (Ho, Wo)


# ---------------------------------------------------------------------------
# Pallas kernels
# ---------------------------------------------------------------------------

def _matmul_bias_kernel(x_ref, w_ref, b_ref, o_ref, *, relu):
    """One (tm, K) x (K, 128) tile: o = x @ w + b (optional relu), f32 accumulate."""
    y = jnp.dot(x_ref[...], w_ref[...], preferred_element_type=jnp.float32)
    y = y + b_ref[...]
    if relu:
        y = jnp.maximum(y, 0.0)
    o_ref[...] = y.astype(o_ref.dtype)


def _pool_fc_kernel(xs_ref, fc1w_ref, fc1b_ref, fc2w_ref, fc2b_ref, theta_ref):
    """Per-batch: relu(global max-pool) -> Linear -> relu -> Linear -> theta (1,6)."""
    xs = xs_ref[0]                                                # (P, 128)
    feat = jnp.maximum(jnp.max(xs, axis=0, keepdims=True), 0.0)   # (1, 128)
    h = jnp.dot(feat, fc1w_ref[...], preferred_element_type=jnp.float32) + fc1b_ref[...]
    h = jnp.maximum(h, 0.0)
    th = jnp.dot(h, fc2w_ref[...], preferred_element_type=jnp.float32) + fc2b_ref[...]
    theta_ref[0] = th.astype(theta_ref.dtype)                     # (1, 6)


def _grid_sample_kernel(theta_ref, it_ref, xb_ref, yb_ref, *rest, Ht, Wt, fuse_ft):
    """F.affine_grid + F.grid_sample(bilinear, zeros padding, align_corners=True).

    Channel-major: it_ref block (1, C, S) with S = Ht*Wt; output block (1, C, tq).
    For this pixel tile the bilinear map is the one-hot-weighted matrix
    M^T (S, tq); out = it (C,S) @ M^T.  Optionally fuses the 1x1 feature
    transform (channel mix) afterwards.
    theta_ref lives in SMEM; xb/yb are precomputed normalized output coords.
    """
    if fuse_ft:
        ftw_ref, ftb_ref, out_ref = rest
    else:
        (out_ref,) = rest

    n = pl.program_id(0)
    t0 = theta_ref[n, 0]
    t1 = theta_ref[n, 1]
    t2 = theta_ref[n, 2]
    t3 = theta_ref[n, 3]
    t4 = theta_ref[n, 4]
    t5 = theta_ref[n, 5]

    xb = xb_ref[...]                       # (1, tq)
    yb = yb_ref[...]                       # (1, tq)
    tq = xb.shape[1]
    S = Ht * Wt

    gx = xb * t0 + yb * t1 + t2
    gy = xb * t3 + yb * t4 + t5
    ix = (gx + 1.0) * (0.5 * (Wt - 1))     # align_corners=True mapping
    iy = (gy + 1.0) * (0.5 * (Ht - 1))
    x0f = jnp.floor(ix)
    y0f = jnp.floor(iy)
    wx = ix - x0f
    wy = iy - y0f
    x0 = x0f.astype(jnp.int32)
    y0 = y0f.astype(jnp.int32)
    x1 = x0 + 1
    y1 = y0 + 1

    src = lax.broadcasted_iota(jnp.int32, (S, tq), 0)   # source pixel index / sublane

    def corner(xc, yc, w):
        valid = (xc >= 0) & (xc < Wt) & (yc >= 0) & (yc < Ht)   # (1, tq)
        wq = jnp.where(valid, w, 0.0)                           # zero-padding semantics
        return jnp.where(src == (yc * Wt + xc), wq, 0.0)        # (S, tq)

    m = corner(x0, y0, (1.0 - wx) * (1.0 - wy))
    m = m + corner(x1, y0, wx * (1.0 - wy))
    m = m + corner(x0, y1, (1.0 - wx) * wy)
    m = m + corner(x1, y1, wx * wy)

    out = jnp.dot(it_ref[0], m, preferred_element_type=jnp.float32)   # (C, tq)
    if fuse_ft:
        out = jnp.dot(ftw_ref[...], out,
                      preferred_element_type=jnp.float32) + ftb_ref[...]
    out_ref[0] = out.astype(out_ref.dtype)


# ---------------------------------------------------------------------------
# wrappers (pallas_call plumbing)
# ---------------------------------------------------------------------------

_VMEM_LIMIT = 32 * 1024 * 1024


def _tiled_matmul_bias(x, w, b, *, relu, out_dtype, max_tm=512):
    """Row-tiled x(M,K) @ w(K,128) + b, lane-dense (128-wide) output."""
    M, K = x.shape
    Nc = w.shape[1]
    tm = min(max_tm, _round_up(M, 8))
    Mp = _round_up(M, tm)
    if Mp != M:
        x = jnp.pad(x, ((0, Mp - M), (0, 0)))
    out = pl.pallas_call(
        functools.partial(_matmul_bias_kernel, relu=relu),
        out_shape=jax.ShapeDtypeStruct((Mp, Nc), out_dtype),
        grid=(Mp // tm,),
        in_specs=[
            pl.BlockSpec((tm, K), lambda i: (i, 0)),
            pl.BlockSpec((K, Nc), lambda i: (0, 0)),
            pl.BlockSpec((1, Nc), lambda i: (0, 0)),
        ],
        out_specs=pl.BlockSpec((tm, Nc), lambda i: (i, 0)),
        compiler_params=pltpu.CompilerParams(
            dimension_semantics=("parallel",),
            vmem_limit_bytes=_VMEM_LIMIT),
    )(x, w, b)
    return out if Mp == M else out[:M]


def _localize(params, x_nchw):
    """localization convs + relu(max-pool) + fc_loc  ->  theta (N, 6) f32."""
    N = x_nchw.shape[0]
    x = jnp.transpose(x_nchw, (0, 2, 3, 1)).astype(jnp.bfloat16)   # NHWC for im2col

    # Conv2d(fan_in, 64, 5) -> ReLU   (out channels padded to 128 lanes)
    cols1, (H1, W1) = _im2col_valid(x, 5)
    y1 = _tiled_matmul_bias(cols1, params["w1"], params["b1"],
                            relu=True, out_dtype=jnp.bfloat16)
    # Conv2d(64, 32, 3)               (in/out channels padded to 128 lanes)
    cols2, (H2, W2) = _im2col_valid(y1.reshape(N, H1, W1, 128), 3)
    y2 = _tiled_matmul_bias(cols2, params["w2"], params["b2"],
                            relu=False, out_dtype=jnp.float32)
    xs = y2.reshape(N, H2 * W2, 128)

    theta = pl.pallas_call(
        _pool_fc_kernel,
        out_shape=jax.ShapeDtypeStruct((N, 1, 6), jnp.float32),
        grid=(N,),
        in_specs=[
            pl.BlockSpec((1, H2 * W2, 128), lambda n: (n, 0, 0)),
            pl.BlockSpec((128, 32), lambda n: (0, 0)),
            pl.BlockSpec((1, 32), lambda n: (0, 0)),
            pl.BlockSpec((32, 6), lambda n: (0, 0)),
            pl.BlockSpec((1, 6), lambda n: (0, 0)),
        ],
        out_specs=pl.BlockSpec((1, 1, 6), lambda n: (n, 0, 0)),
        compiler_params=pltpu.CompilerParams(
            dimension_semantics=("parallel",),
            vmem_limit_bytes=_VMEM_LIMIT),
    )(xs, params["fc1_w"], params["fc1_b"], params["fc2_w"], params["fc2_b"])
    return theta.reshape(N, 6)


def _pick_tq(Q, max_tq=512):
    if Q <= max_tq:
        return Q
    for t in range(max_tq, 127, -128):   # 512, 384, 256, 128
        if Q % t == 0:
            return t
    # TODO(synk): pad/mask Q for output sizes not divisible by 128.
    return Q


def _affine_grid_sample(theta, it_nchw, ft_w=None, ft_b=None):
    """affine_grid + grid_sample (optionally fused with the 1x1 feature transform)."""
    N, C, Ht, Wt = it_nchw.shape
    S = Ht * Wt
    Ho, Wo = Ht, Wt                    # F.affine_grid(theta, input_trans.size())
    Q = Ho * Wo
    tq = _pick_tq(Q)
    nq = Q // tq

    it = it_nchw.reshape(N, C, S).astype(jnp.float32)

    # normalized output coords, precomputed once (hoisted out of the kernel)
    qs = jnp.arange(Q, dtype=jnp.int32)
    wo = (qs % Wo).astype(jnp.float32)
    ho = (qs // Wo).astype(jnp.float32)
    xb = (2.0 * wo / (Wo - 1) - 1.0) if Wo > 1 else jnp.zeros((Q,), jnp.float32)
    yb = (2.0 * ho / (Ho - 1) - 1.0) if Ho > 1 else jnp.zeros((Q,), jnp.float32)
    xb = xb.reshape(1, Q)
    yb = yb.reshape(1, Q)

    fuse_ft = ft_w is not None
    kernel = functools.partial(_grid_sample_kernel, Ht=Ht, Wt=Wt, fuse_ft=fuse_ft)

    in_specs = [
        pl.BlockSpec(memory_space=pltpu.MemorySpace.SMEM),   # theta (N, 6) scalars
        pl.BlockSpec((1, C, S), lambda n, q: (n, 0, 0)),     # per-batch input, resident
        pl.BlockSpec((1, tq), lambda n, q: (0, q)),          # xb tile
        pl.BlockSpec((1, tq), lambda n, q: (0, q)),          # yb tile
    ]
    args = [theta, it, xb, yb]
    if fuse_ft:
        in_specs += [pl.BlockSpec((C, C), lambda n, q: (0, 0)),
                     pl.BlockSpec((C, 1), lambda n, q: (0, 0))]
        args += [ft_w.astype(jnp.float32), ft_b.reshape(C, 1).astype(jnp.float32)]

    out = pl.pallas_call(
        kernel,
        out_shape=jax.ShapeDtypeStruct((N, C, Q), jnp.float32),
        grid=(N, nq),
        in_specs=in_specs,
        out_specs=pl.BlockSpec((1, C, tq), lambda n, q: (n, 0, q)),
        compiler_params=pltpu.CompilerParams(
            dimension_semantics=("parallel", "parallel"),
            vmem_limit_bytes=_VMEM_LIMIT),
    )(*args)
    return out.reshape(N, C, Ho, Wo)


def spatial_transformer_forward(params, x, input_trans=None):
    """SpatialTransformer.forward(x, input_trans) -- original module API."""
    if input_trans is None:
        input_trans = x
    theta = _localize(params, x)
    return _affine_grid_sample(theta, input_trans)


def cpc_spatial_transform(params, x):
    """GN_R2D_VPN CPC step: spatial_transforms[step](x, feature_transforms[step](x)).

    The 1x1 feature transform is fused into the grid-sample kernel (the channel
    mix and the spatial bilinear sampling commute), avoiding one full (N,C,H,W)
    HBM round trip.
    """
    theta = _localize(params, x)
    return _affine_grid_sample(theta, x, ft_w=params["ft_w"], ft_b=params["ft_b"])


# ---------------------------------------------------------------------------
# deterministic parameter init (mirrors the module __init__ semantics)
# NOTE on importing real PyTorch weights: Conv2d weight (O,I,kH,kW) must be
# permuted to (kH,kW,I,O) before the flatten below; Linear weight (O,I) must be
# transposed (stored here as (in, out)); the 1x1 feature transform is kept in
# PyTorch's (out, in) layout because the fused kernel left-multiplies it.
# ---------------------------------------------------------------------------

def init_params(key, fan_in):
    C = fan_in
    k1, k2, k3, k4 = jax.random.split(key, 4)
    # kaiming_normal_(mode='fan_out', relu) for convs, zero bias
    w1 = jax.random.normal(k1, (5, 5, C, 64), jnp.float32) * math.sqrt(2.0 / (64 * 25))
    w2 = jax.random.normal(k2, (3, 3, 64, 32), jnp.float32) * math.sqrt(2.0 / (32 * 9))
    fc1_w = jax.random.normal(k3, (32, 32), jnp.float32) * (1.0 / math.sqrt(32))
    ft_w = jax.random.normal(k4, (C, C), jnp.float32) * math.sqrt(2.0 / C)

    # pad conv out-channels (and conv2 in-channels) to 128 -> lane-dense stores
    w1_p = jnp.zeros((5, 5, C, 128), jnp.float32).at[:, :, :, :64].set(w1)
    w2_p = jnp.zeros((3, 3, 128, 128), jnp.float32).at[:, :, :64, :32].set(w2)
    fc1_w_p = jnp.zeros((128, 32), jnp.float32).at[:32, :].set(fc1_w)

    return {
        "w1": w1_p.reshape(5 * 5 * C, 128).astype(jnp.bfloat16),
        "b1": jnp.zeros((1, 128), jnp.float32),
        "w2": w2_p.reshape(3 * 3 * 128, 128).astype(jnp.bfloat16),
        "b2": jnp.zeros((1, 128), jnp.float32),
        "fc1_w": fc1_w_p,                                  # (in(padded), out)
        "fc1_b": jnp.zeros((1, 32), jnp.float32),
        "fc2_w": jnp.zeros((32, 6), jnp.float32),          # fc_loc[2].weight.zero_()
        "fc2_b": jnp.array([[1.0, 0.0, 0.0, 0.0, 1.0, 0.0]], jnp.float32),
        "ft_w": ft_w,                                      # (out, in), 1x1 conv
        "ft_b": jnp.zeros((C, 1), jnp.float32),
    }


# ---------------------------------------------------------------------------

if __name__ == "__main__":
    key = jax.random.PRNGKey(0)
    k_param, k_x = jax.random.split(key)

    N, C, H, W = 2, 4, 16, 16          # small synthetic shapes (NCHW like PyTorch)
    x = jax.random.normal(k_x, (N, C, H, W), jnp.float32)
    params = init_params(k_param, fan_in=C)

    st_fwd = jax.jit(spatial_transformer_forward)
    cpc_fwd = jax.jit(cpc_spatial_transform)

    # pure-JAX reference for the 1x1 feature transform (f32)
    ft_ref = (jnp.einsum("oc,nchw->nohw", params["ft_w"], x)
              + params["ft_b"].reshape(1, C, 1, 1))

    # fused CPC step: spatial_transforms[step](x, feature_transforms[step](x))
    out_fused = jax.block_until_ready(cpc_fwd(params, x))
    # un-fused path with explicit input_trans (original module API)
    out_plain = jax.block_until_ready(st_fwd(params, x, input_trans=ft_ref))

    assert out_fused.shape == (N, C, H, W)
    assert out_plain.shape == (N, C, H, W)
    # fc_loc[2] weight is zeroed with identity-affine bias -> theta is identity, so
    # grid_sample(align_corners=True) must reproduce feature_transform(x).
    assert np.allclose(np.asarray(out_fused), np.asarray(ft_ref), atol=1e-4), \
        "fused grid_sample+feature_transform mismatch"
    assert np.allclose(np.asarray(out_plain), np.asarray(ft_ref), atol=1e-4), \
        "grid_sample mismatch"

    print("KERNEL_OK")
</pallas_src>

<mosaic_0001>
module attributes {stable_mosaic.version = 11 : i64} {
  func.func @_matmul_bias_kernel(%arg0: i32, %arg1: memref<288x100xbf16, #tpu.memory_space<vmem>>, %arg2: memref<100x128xbf16, #tpu.memory_space<vmem>>, %arg3: memref<1x128xf32, #tpu.memory_space<vmem>>, %arg4: memref<288x128xbf16, #tpu.memory_space<vmem>>) attributes {dimension_semantics = [#tpu.dimension_semantics<parallel>], iteration_bounds = array<i64: 1>, scalar_prefetch = 0 : i64, scratch_operands = 0 : i64, tpu.core_type = #tpu.core_type<tc>, window_params = [{transform_indices = @transform_0, window_bounds = array<i64: 288, 100>}, {pipeline_mode = #tpu.pipeline_mode<synchronous>, transform_indices = @transform_1, window_bounds = array<i64: 100, 128>}, {pipeline_mode = #tpu.pipeline_mode<synchronous>, transform_indices = @transform_2, window_bounds = array<i64: 1, 128>}, {transform_indices = @transform_3, window_bounds = array<i64: 288, 128>}]} {
    %c0 = arith.constant 0 : index
    %c0_0 = arith.constant 0 : index
    %0 = vector.load %arg1[%c0, %c0_0] : memref<288x100xbf16, #tpu.memory_space<vmem>>, vector<288x100xbf16>
    %c0_1 = arith.constant 0 : index
    %c0_2 = arith.constant 0 : index
    %1 = vector.load %arg2[%c0_1, %c0_2] : memref<100x128xbf16, #tpu.memory_space<vmem>>, vector<100x128xbf16>
    %cst = arith.constant dense<0.000000e+00> : vector<288x128xf32>
    %2 = tpu.matmul %0, %1, %cst {dimension_numbers = #tpu.dot_dimension_numbers<[1], [0], [0], [1], [0, 0, 1, 1], [], []>} : vector<288x100xbf16>, vector<100x128xbf16>, vector<288x128xf32> -> vector<288x128xf32>
    %c0_3 = arith.constant 0 : index
    %c0_4 = arith.constant 0 : index
    %3 = vector.load %arg3[%c0_3, %c0_4] : memref<1x128xf32, #tpu.memory_space<vmem>>, vector<1x128xf32>
    %4 = vector.broadcast %3 : vector<1x128xf32> to vector<288x128xf32>
    %5 = arith.addf %2, %4 : vector<288x128xf32>
    %cst_5 = arith.constant 0.000000e+00 : f32
    %6 = vector.broadcast %cst_5 : f32 to vector<288x128xf32>
    %7 = arith.maximumf %5, %6 : vector<288x128xf32>
    %8 = arith.truncf %7 : vector<288x128xf32> to vector<288x128xbf16>
    %c0_6 = arith.constant 0 : index
    %c0_7 = arith.constant 0 : index
    %9 = vector.load %arg4[%c0_6, %c0_7] : memref<288x128xbf16, #tpu.memory_space<vmem>>, vector<288x128xbf16>
    tpu.vector_store %arg4[%c0_6, %c0_7], %8 {strides = array<i32>} : memref<288x128xbf16, #tpu.memory_space<vmem>>, vector<288x128xbf16>,
    return
  }
  func.func @transform_0(%arg0: i32) -> (i32, i32) {
    %c0_i32 = arith.constant 0 : i32
    %c0_i32_0 = arith.constant 0 : i32
    return %arg0, %c0_i32 : i32, i32
  }
  func.func @transform_1(%arg0: i32) -> (i32, i32) {
    %c0_i32 = arith.constant 0 : i32
    %c0_i32_0 = arith.constant 0 : i32
    %c0_i32_1 = arith.constant 0 : i32
    return %c0_i32, %c0_i32_0 : i32, i32
  }
  func.func @transform_2(%arg0: i32) -> (i32, i32) {
    %c0_i32 = arith.constant 0 : i32
    %c0_i32_0 = arith.constant 0 : i32
    %c0_i32_1 = arith.constant 0 : i32
    return %c0_i32, %c0_i32_0 : i32, i32
  }
  func.func @transform_3(%arg0: i32) -> (i32, i32) {
    %c0_i32 = arith.constant 0 : i32
    %c0_i32_0 = arith.constant 0 : i32
    return %arg0, %c0_i32 : i32, i32
  }
}

module attributes {stable_mosaic.version = 11 : i64} {
  func.func @_matmul_bias_kernel(%arg0: i32, %arg1: memref<200x1152xbf16, #tpu.memory_space<vmem>>, %arg2: memref<1152x128xbf16, #tpu.memory_space<vmem>>, %arg3: memref<1x128xf32, #tpu.memory_space<vmem>>, %arg4: memref<200x128xf32, #tpu.memory_space<vmem>>) attributes {dimension_semantics = [#tpu.dimension_semantics<parallel>], iteration_bounds = array<i64: 1>, scalar_prefetch = 0 : i64, scratch_operands = 0 : i64, tpu.core_type = #tpu.core_type<tc>, window_params = [{transform_indices = @transform_0, window_bounds = array<i64: 200, 1152>}, {pipeline_mode = #tpu.pipeline_mode<synchronous>, transform_indices = @transform_1, window_bounds = array<i64: 1152, 128>}, {pipeline_mode = #tpu.pipeline_mode<synchronous>, transform_indices = @transform_2, window_bounds = array<i64: 1, 128>}, {transform_indices = @transform_3, window_bounds = array<i64: 200, 128>}]} {
    %c0 = arith.constant 0 : index
    %c0_0 = arith.constant 0 : index
    %0 = vector.load %arg1[%c0, %c0_0] : memref<200x1152xbf16, #tpu.memory_space<vmem>>, vector<200x1152xbf16>
    %c0_1 = arith.constant 0 : index
    %c0_2 = arith.constant 0 : index
    %1 = vector.load %arg2[%c0_1, %c0_2] : memref<1152x128xbf16, #tpu.memory_space<vmem>>, vector<1152x128xbf16>
    %cst = arith.constant dense<0.000000e+00> : vector<200x128xf32>
    %2 = tpu.matmul %0, %1, %cst {dimension_numbers = #tpu.dot_dimension_numbers<[1], [0], [0], [1], [0, 0, 1, 1], [], []>} : vector<200x1152xbf16>, vector<1152x128xbf16>, vector<200x128xf32> -> vector<200x128xf32>
    %c0_3 = arith.constant 0 : index
    %c0_4 = arith.constant 0 : index
    %3 = vector.load %arg3[%c0_3, %c0_4] : memref<1x128xf32, #tpu.memory_space<vmem>>, vector<1x128xf32>
    %4 = vector.broadcast %3 : vector<1x128xf32> to vector<200x128xf32>
    %5 = arith.addf %2, %4 : vector<200x128xf32>
    %c0_5 = arith.constant 0 : index
    %c0_6 = arith.constant 0 : index
    %6 = vector.load %arg4[%c0_5, %c0_6] : memref<200x128xf32, #tpu.memory_space<vmem>>, vector<200x128xf32>
    tpu.vector_store %arg4[%c0_5, %c0_6], %5 {strides = array<i32>} : memref<200x128xf32, #tpu.memory_space<vmem>>, vector<200x128xf32>,
    return
  }
  func.func @transform_0(%arg0: i32) -> (i32, i32) {
    %c0_i32 = arith.constant 0 : i32
    %c0_i32_0 = arith.constant 0 : i32
    return %arg0, %c0_i32 : i32, i32
  }
  func.func @transform_1(%arg0: i32) -> (i32, i32) {
    %c0_i32 = arith.constant 0 : i32
    %c0_i32_0 = arith.constant 0 : i32
    %c0_i32_1 = arith.constant 0 : i32
    return %c0_i32, %c0_i32_0 : i32, i32
  }
  func.func @transform_2(%arg0: i32) -> (i32, i32) {
    %c0_i32 = arith.constant 0 : i32
    %c0_i32_0 = arith.constant 0 : i32
    %c0_i32_1 = arith.constant 0 : i32
    return %c0_i32, %c0_i32_0 : i32, i32
  }
  func.func @transform_3(%arg0: i32) -> (i32, i32) {
    %c0_i32 = arith.constant 0 : i32
    %c0_i32_0 = arith.constant 0 : i32
    return %arg0, %c0_i32 : i32, i32
  }
}

module attributes {stable_mosaic.version = 11 : i64} {
  func.func @_pool_fc_kernel(%arg0: i32, %arg1: memref<1x100x128xf32, #tpu.memory_space<vmem>>, %arg2: memref<128x32xf32, #tpu.memory_space<vmem>>, %arg3: memref<1x32xf32, #tpu.memory_space<vmem>>, %arg4: memref<32x6xf32, #tpu.memory_space<vmem>>, %arg5: memref<1x6xf32, #tpu.memory_space<vmem>>, %arg6: memref<1x1x6xf32, #tpu.memory_space<vmem>>) attributes {dimension_semantics = [#tpu.dimension_semantics<parallel>], iteration_bounds = array<i64: 2>, scalar_prefetch = 0 : i64, scratch_operands = 0 : i64, tpu.core_type = #tpu.core_type<tc>, window_params = [{transform_indices = @transform_0, window_bounds = array<i64: 1, 100, 128>}, {pipeline_mode = #tpu.pipeline_mode<synchronous>, transform_indices = @transform_1, window_bounds = array<i64: 128, 32>}, {pipeline_mode = #tpu.pipeline_mode<synchronous>, transform_indices = @transform_2, window_bounds = array<i64: 1, 32>}, {pipeline_mode = #tpu.pipeline_mode<synchronous>, transform_indices = @transform_3, window_bounds = array<i64: 32, 6>}, {pipeline_mode = #tpu.pipeline_mode<synchronous>, transform_indices = @transform_4, window_bounds = array<i64: 1, 6>}, {transform_indices = @transform_5, window_bounds = array<i64: 1, 1, 6>}]} {
    %c0 = arith.constant 0 : index
    %c0_0 = arith.constant 0 : index
    %c0_1 = arith.constant 0 : index
    %0 = vector.load %arg1[%c0, %c0_0, %c0_1] : memref<1x100x128xf32, #tpu.memory_space<vmem>>, vector<1x100x128xf32>
    %1 = vector.shape_cast %0 : vector<1x100x128xf32> to vector<100x128xf32>
    %cst = arith.constant dense<0xFF800000> : vector<128xf32>
    %2 = vector.multi_reduction <maximumf>, %1, %cst [0] : vector<100x128xf32> to vector<128xf32>
    %3 = vector.shape_cast %2 : vector<128xf32> to vector<1x128xf32>
    %cst_2 = arith.constant 0.000000e+00 : f32
    %4 = vector.broadcast %cst_2 : f32 to vector<1x128xf32>
    %5 = arith.maximumf %3, %4 : vector<1x128xf32>
    %c0_3 = arith.constant 0 : index
    %c0_4 = arith.constant 0 : index
    %6 = vector.load %arg2[%c0_3, %c0_4] : memref<128x32xf32, #tpu.memory_space<vmem>>, vector<128x32xf32>
    %cst_5 = arith.constant dense<0.000000e+00> : vector<1x32xf32>
    %7 = tpu.matmul %5, %6, %cst_5 {dimension_numbers = #tpu.dot_dimension_numbers<[1], [0], [0], [1], [0, 0, 1, 1], [], []>} : vector<1x128xf32>, vector<128x32xf32>, vector<1x32xf32> -> vector<1x32xf32>
    %c0_6 = arith.constant 0 : index
    %c0_7 = arith.constant 0 : index
    %8 = vector.load %arg3[%c0_6, %c0_7] : memref<1x32xf32, #tpu.memory_space<vmem>>, vector<1x32xf32>
    %9 = arith.addf %7, %8 : vector<1x32xf32>
    %cst_8 = arith.constant 0.000000e+00 : f32
    %10 = vector.broadcast %cst_8 : f32 to vector<1x32xf32>
    %11 = arith.maximumf %9, %10 : vector<1x32xf32>
    %c0_9 = arith.constant 0 : index
    %c0_10 = arith.constant 0 : index
    %12 = vector.load %arg4[%c0_9, %c0_10] : memref<32x6xf32, #tpu.memory_space<vmem>>, vector<32x6xf32>
    %cst_11 = arith.constant dense<0.000000e+00> : vector<1x6xf32>
    %13 = tpu.matmul %11, %12, %cst_11 {dimension_numbers = #tpu.dot_dimension_numbers<[1], [0], [0], [1], [0, 0, 1, 1], [], []>} : vector<1x32xf32>, vector<32x6xf32>, vector<1x6xf32> -> vector<1x6xf32>
    %c0_12 = arith.constant 0 : index
    %c0_13 = arith.constant 0 : index
    %14 = vector.load %arg5[%c0_12, %c0_13] : memref<1x6xf32, #tpu.memory_space<vmem>>, vector<1x6xf32>
    %15 = arith.addf %13, %14 : vector<1x6xf32>
    %c0_14 = arith.constant 0 : index
    %c0_15 = arith.constant 0 : index
    %c0_16 = arith.constant 0 : index
    %16 = vector.load %arg6[%c0_14, %c0_15, %c0_16] : memref<1x1x6xf32, #tpu.memory_space<vmem>>, vector<1x1x6xf32>
    %17 = vector.shape_cast %16 : vector<1x1x6xf32> to vector<1x6xf32>
    %18 = vector.shape_cast %15 : vector<1x6xf32> to vector<1x1x6xf32>
    tpu.vector_store %arg6[%c0_14, %c0_15, %c0_16], %18 {strides = array<i32>} : memref<1x1x6xf32, #tpu.memory_space<vmem>>, vector<1x1x6xf32>,
    return
  }
  func.func @transform_0(%arg0: i32) -> (i32, i32, i32) {
    %c0_i32 = arith.constant 0 : i32
    %c0_i32_0 = arith.constant 0 : i32
    %c0_i32_1 = arith.constant 0 : i32
    return %arg0, %c0_i32, %c0_i32_0 : i32, i32, i32
  }
  func.func @transform_1(%arg0: i32) -> (i32, i32) {
    %c0_i32 = arith.constant 0 : i32
    %c0_i32_0 = arith.constant 0 : i32
    %c0_i32_1 = arith.constant 0 : i32
    return %c0_i32, %c0_i32_0 : i32, i32
  }
  func.func @transform_2(%arg0: i32) -> (i32, i32) {
    %c0_i32 = arith.constant 0 : i32
    %c0_i32_0 = arith.constant 0 : i32
    %c0_i32_1 = arith.constant 0 : i32
    return %c0_i32, %c0_i32_0 : i32, i32
  }
  func.func @transform_3(%arg0: i32) -> (i32, i32) {
    %c0_i32 = arith.constant 0 : i32
    %c0_i32_0 = arith.constant 0 : i32
    %c0_i32_1 = arith.constant 0 : i32
    return %c0_i32, %c0_i32_0 : i32, i32
  }
  func.func @transform_4(%arg0: i32) -> (i32, i32) {
    %c0_i32 = arith.constant 0 : i32
    %c0_i32_0 = arith.constant 0 : i32
    %c0_i32_1 = arith.constant 0 : i32
    return %c0_i32, %c0_i32_0 : i32, i32
  }
  func.func @transform_5(%arg0: i32) -> (i32, i32, i32) {
    %c0_i32 = arith.constant 0 : i32
    %c0_i32_0 = arith.constant 0 : i32
    %c0_i32_1 = arith.constant 0 : i32
    return %arg0, %c0_i32, %c0_i32_0 : i32, i32, i32
  }
}

module attributes {stable_mosaic.version = 11 : i64} {
  func.func @_grid_sample_kernel(%arg0: i32, %arg1: i32, %arg2: memref<2x6xf32, #tpu.memory_space<smem>>, %arg3: memref<1x4x256xf32, #tpu.memory_space<vmem>>, %arg4: memref<1x256xf32, #tpu.memory_space<vmem>>, %arg5: memref<1x256xf32, #tpu.memory_space<vmem>>, %arg6: memref<4x4xf32, #tpu.memory_space<vmem>>, %arg7: memref<4x1xf32, #tpu.memory_space<vmem>>, %arg8: memref<1x4x256xf32, #tpu.memory_space<vmem>>) attributes {dimension_semantics = [#tpu.dimension_semantics<parallel>, #tpu.dimension_semantics<parallel>], iteration_bounds = array<i64: 2, 1>, scalar_prefetch = 0 : i64, scratch_operands = 0 : i64, tpu.core_type = #tpu.core_type<tc>, window_params = [{transform_indices = @transform_0, window_bounds = array<i64: 2, 6>}, {transform_indices = @transform_1, window_bounds = array<i64: 1, 4, 256>}, {transform_indices = @transform_2, window_bounds = array<i64: 1, 256>}, {transform_indices = @transform_3, window_bounds = array<i64: 1, 256>}, {pipeline_mode = #tpu.pipeline_mode<synchronous>, transform_indices = @transform_4, window_bounds = array<i64: 4, 4>}, {pipeline_mode = #tpu.pipeline_mode<synchronous>, transform_indices = @transform_5, window_bounds = array<i64: 4, 1>}, {transform_indices = @transform_6, window_bounds = array<i64: 1, 4, 256>}]} {
    %0 = arith.index_cast %arg0 : i32 to index
    %c0 = arith.constant 0 : index
    %1 = memref.load %arg2[%0, %c0] : memref<2x6xf32, #tpu.memory_space<smem>>
    %2 = arith.index_cast %arg0 : i32 to index
    %c1 = arith.constant 1 : index
    %3 = memref.load %arg2[%2, %c1] : memref<2x6xf32, #tpu.memory_space<smem>>
    %4 = arith.index_cast %arg0 : i32 to index
    %c2 = arith.constant 2 : index
    %5 = memref.load %arg2[%4, %c2] : memref<2x6xf32, #tpu.memory_space<smem>>
    %6 = arith.index_cast %arg0 : i32 to index
    %c3 = arith.constant 3 : index
    %7 = memref.load %arg2[%6, %c3] : memref<2x6xf32, #tpu.memory_space<smem>>
    %8 = arith.index_cast %arg0 : i32 to index
    %c4 = arith.constant 4 : index
    %9 = memref.load %arg2[%8, %c4] : memref<2x6xf32, #tpu.memory_space<smem>>
    %10 = arith.index_cast %arg0 : i32 to index
    %c5 = arith.constant 5 : index
    %11 = memref.load %arg2[%10, %c5] : memref<2x6xf32, #tpu.memory_space<smem>>
    %c0_0 = arith.constant 0 : index
    %c0_1 = arith.constant 0 : index
    %12 = vector.load %arg4[%c0_0, %c0_1] : memref<1x256xf32, #tpu.memory_space<vmem>>, vector<1x256xf32>
    %c0_2 = arith.constant 0 : index
    %c0_3 = arith.constant 0 : index
    %13 = vector.load %arg5[%c0_2, %c0_3] : memref<1x256xf32, #tpu.memory_space<vmem>>, vector<1x256xf32>
    %14 = vector.broadcast %1 : f32 to vector<1x256xf32>
    %15 = arith.mulf %12, %14 : vector<1x256xf32>
    %16 = vector.broadcast %3 : f32 to vector<1x256xf32>
    %17 = arith.mulf %13, %16 : vector<1x256xf32>
    %18 = arith.addf %15, %17 : vector<1x256xf32>
    %19 = vector.broadcast %5 : f32 to vector<1x256xf32>
    %20 = arith.addf %18, %19 : vector<1x256xf32>
    %21 = vector.broadcast %7 : f32 to vector<1x256xf32>
    %22 = arith.mulf %12, %21 : vector<1x256xf32>
    %23 = vector.broadcast %9 : f32 to vector<1x256xf32>
    %24 = arith.mulf %13, %23 : vector<1x256xf32>
    %25 = arith.addf %22, %24 : vector<1x256xf32>
    %26 = vector.broadcast %11 : f32 to vector<1x256xf32>
    %27 = arith.addf %25, %26 : vector<1x256xf32>
    %cst = arith.constant 1.000000e+00 : f32
    %28 = vector.broadcast %cst : f32 to vector<1x256xf32>
    %29 = arith.addf %20, %28 : vector<1x256xf32>
    %cst_4 = arith.constant 7.500000e+00 : f32
    %30 = vector.broadcast %cst_4 : f32 to vector<1x256xf32>
    %31 = arith.mulf %29, %30 : vector<1x256xf32>
    %cst_5 = arith.constant 1.000000e+00 : f32
    %32 = vector.broadcast %cst_5 : f32 to vector<1x256xf32>
    %33 = arith.addf %27, %32 : vector<1x256xf32>
    %cst_6 = arith.constant 7.500000e+00 : f32
    %34 = vector.broadcast %cst_6 : f32 to vector<1x256xf32>
    %35 = arith.mulf %33, %34 : vector<1x256xf32>
    %36 = math.floor %31 : vector<1x256xf32>
    %37 = math.floor %35 : vector<1x256xf32>
    %38 = arith.subf %31, %36 : vector<1x256xf32>
    %39 = arith.subf %35, %37 : vector<1x256xf32>
    %40 = arith.fptosi %36 : vector<1x256xf32> to vector<1x256xi32>
    %41 = arith.fptosi %37 : vector<1x256xf32> to vector<1x256xi32>
    %c1_i32 = arith.constant 1 : i32
    %42 = vector.broadcast %c1_i32 : i32 to vector<1x256xi32>
    %43 = arith.addi %40, %42 : vector<1x256xi32>
    %c1_i32_7 = arith.constant 1 : i32
    %44 = vector.broadcast %c1_i32_7 : i32 to vector<1x256xi32>
    %45 = arith.addi %41, %44 : vector<1x256xi32>
    %46 = tpu.iota {dimensions = array<i32: 0>} : vector<256x256xi32>
    %cst_8 = arith.constant 1.000000e+00 : f32
    %47 = vector.broadcast %cst_8 : f32 to vector<1x256xf32>
    %48 = arith.subf %47, %38 : vector<1x256xf32>
    %cst_9 = arith.constant 1.000000e+00 : f32
    %49 = vector.broadcast %cst_9 : f32 to vector<1x256xf32>
    %50 = arith.subf %49, %39 : vector<1x256xf32>
    %51 = arith.mulf %48, %50 : vector<1x256xf32>
    %c0_i32 = arith.constant 0 : i32
    %52 = vector.broadcast %c0_i32 : i32 to vector<1x256xi32>
    %53 = arith.cmpi sge, %40, %52 : vector<1x256xi32>
    %c16_i32 = arith.constant 16 : i32
    %54 = vector.broadcast %c16_i32 : i32 to vector<1x256xi32>
    %55 = arith.cmpi slt, %40, %54 : vector<1x256xi32>
    %56 = arith.andi %53, %55 : vector<1x256xi1>
    %c0_i32_10 = arith.constant 0 : i32
    %57 = vector.broadcast %c0_i32_10 : i32 to vector<1x256xi32>
    %58 = arith.cmpi sge, %41, %57 : vector<1x256xi32>
    %59 = arith.andi %56, %58 : vector<1x256xi1>
    %c16_i32_11 = arith.constant 16 : i32
    %60 = vector.broadcast %c16_i32_11 : i32 to vector<1x256xi32>
    %61 = arith.cmpi slt, %41, %60 : vector<1x256xi32>
    %62 = arith.andi %59, %61 : vector<1x256xi1>
    %cst_12 = arith.constant 0.000000e+00 : f32
    %63 = vector.broadcast %cst_12 : f32 to vector<1x256xf32>
    %64 = arith.select %62, %51, %63 : vector<1x256xi1>, vector<1x256xf32>
    %c16_i32_13 = arith.constant 16 : i32
    %65 = vector.broadcast %c16_i32_13 : i32 to vector<1x256xi32>
    %66 = arith.muli %41, %65 : vector<1x256xi32>
    %67 = arith.addi %66, %40 : vector<1x256xi32>
    %68 = vector.broadcast %67 : vector<1x256xi32> to vector<256x256xi32>
    %69 = arith.cmpi eq, %46, %68 : vector<256x256xi32>
    %cst_14 = arith.constant 0.000000e+00 : f32
    %70 = vector.shape_cast %64 : vector<1x256xf32> to vector<1x256xf32>
    %71 = vector.broadcast %70 : vector<1x256xf32> to vector<256x256xf32>
    %72 = vector.broadcast %cst_14 : f32 to vector<256x256xf32>
    %73 = arith.select %69, %71, %72 : vector<256x256xi1>, vector<256x256xf32>
    %cst_15 = arith.constant 1.000000e+00 : f32
    %74 = vector.broadcast %cst_15 : f32 to vector<1x256xf32>
    %75 = arith.subf %74, %39 : vector<1x256xf32>
    %76 = arith.mulf %38, %75 : vector<1x256xf32>
    %c0_i32_16 = arith.constant 0 : i32
    %77 = vector.broadcast %c0_i32_16 : i32 to vector<1x256xi32>
    %78 = arith.cmpi sge, %43, %77 : vector<1x256xi32>
    %c16_i32_17 = arith.constant 16 : i32
    %79 = vector.broadcast %c16_i32_17 : i32 to vector<1x256xi32>
    %80 = arith.cmpi slt, %43, %79 : vector<1x256xi32>
    %81 = arith.andi %78, %80 : vector<1x256xi1>
    %c0_i32_18 = arith.constant 0 : i32
    %82 = vector.broadcast %c0_i32_18 : i32 to vector<1x256xi32>
    %83 = arith.cmpi sge, %41, %82 : vector<1x256xi32>
    %84 = arith.andi %81, %83 : vector<1x256xi1>
    %c16_i32_19 = arith.constant 16 : i32
    %85 = vector.broadcast %c16_i32_19 : i32 to vector<1x256xi32>
    %86 = arith.cmpi slt, %41, %85 : vector<1x256xi32>
    %87 = arith.andi %84, %86 : vector<1x256xi1>
    %cst_20 = arith.constant 0.000000e+00 : f32
    %88 = vector.broadcast %cst_20 : f32 to vector<1x256xf32>
    %89 = arith.select %87, %76, %88 : vector<1x256xi1>, vector<1x256xf32>
    %c16_i32_21 = arith.constant 16 : i32
    %90 = vector.broadcast %c16_i32_21 : i32 to vector<1x256xi32>
    %91 = arith.muli %41, %90 : vector<1x256xi32>
    %92 = arith.addi %91, %43 : vector<1x256xi32>
    %93 = vector.broadcast %92 : vector<1x256xi32> to vector<256x256xi32>
    %94 = arith.cmpi eq, %46, %93 : vector<256x256xi32>
    %cst_22 = arith.constant 0.000000e+00 : f32
    %95 = vector.shape_cast %89 : vector<1x256xf32> to vector<1x256xf32>
    %96 = vector.broadcast %95 : vector<1x256xf32> to vector<256x256xf32>
    %97 = vector.broadcast %cst_22 : f32 to vector<256x256xf32>
    %98 = arith.select %94, %96, %97 : vector<256x256xi1>, vector<256x256xf32>
    %99 = arith.addf %73, %98 : vector<256x256xf32>
    %cst_23 = arith.constant 1.000000e+00 : f32
    %100 = vector.broadcast %cst_23 : f32 to vector<1x256xf32>
    %101 = arith.subf %100, %38 : vector<1x256xf32>
    %102 = arith.mulf %101, %39 : vector<1x256xf32>
    %c0_i32_24 = arith.constant 0 : i32
    %103 = vector.broadcast %c0_i32_24 : i32 to vector<1x256xi32>
    %104 = arith.cmpi sge, %40, %103 : vector<1x256xi32>
    %c16_i32_25 = arith.constant 16 : i32
    %105 = vector.broadcast %c16_i32_25 : i32 to vector<1x256xi32>
    %106 = arith.cmpi slt, %40, %105 : vector<1x256xi32>
    %107 = arith.andi %104, %106 : vector<1x256xi1>
    %c0_i32_26 = arith.constant 0 : i32
    %108 = vector.broadcast %c0_i32_26 : i32 to vector<1x256xi32>
    %109 = arith.cmpi sge, %45, %108 : vector<1x256xi32>
    %110 = arith.andi %107, %109 : vector<1x256xi1>
    %c16_i32_27 = arith.constant 16 : i32
    %111 = vector.broadcast %c16_i32_27 : i32 to vector<1x256xi32>
    %112 = arith.cmpi slt, %45, %111 : vector<1x256xi32>
    %113 = arith.andi %110, %112 : vector<1x256xi1>
    %cst_28 = arith.constant 0.000000e+00 : f32
    %114 = vector.broadcast %cst_28 : f32 to vector<1x256xf32>
    %115 = arith.select %113, %102, %114 : vector<1x256xi1>, vector<1x256xf32>
    %c16_i32_29 = arith.constant 16 : i32
    %116 = vector.broadcast %c16_i32_29 : i32 to vector<1x256xi32>
    %117 = arith.muli %45, %116 : vector<1x256xi32>
    %118 = arith.addi %117, %40 : vector<1x256xi32>
    %119 = vector.broadcast %118 : vector<1x256xi32> to vector<256x256xi32>
    %120 = arith.cmpi eq, %46, %119 : vector<256x256xi32>
    %cst_30 = arith.constant 0.000000e+00 : f32
    %121 = vector.shape_cast %115 : vector<1x256xf32> to vector<1x256xf32>
    %122 = vector.broadcast %121 : vector<1x256xf32> to vector<256x256xf32>
    %123 = vector.broadcast %cst_30 : f32 to vector<256x256xf32>
    %124 = arith.select %120, %122, %123 : vector<256x256xi1>, vector<256x256xf32>
    %125 = arith.addf %99, %124 : vector<256x256xf32>
    %126 = arith.mulf %38, %39 : vector<1x256xf32>
    %c0_i32_31 = arith.constant 0 : i32
    %127 = vector.broadcast %c0_i32_31 : i32 to vector<1x256xi32>
    %128 = arith.cmpi sge, %43, %127 : vector<1x256xi32>
    %c16_i32_32 = arith.constant 16 : i32
    %129 = vector.broadcast %c16_i32_32 : i32 to vector<1x256xi32>
    %130 = arith.cmpi slt, %43, %129 : vector<1x256xi32>
    %131 = arith.andi %128, %130 : vector<1x256xi1>
    %c0_i32_33 = arith.constant 0 : i32
    %132 = vector.broadcast %c0_i32_33 : i32 to vector<1x256xi32>
    %133 = arith.cmpi sge, %45, %132 : vector<1x256xi32>
    %134 = arith.andi %131, %133 : vector<1x256xi1>
    %c16_i32_34 = arith.constant 16 : i32
    %135 = vector.broadcast %c16_i32_34 : i32 to vector<1x256xi32>
    %136 = arith.cmpi slt, %45, %135 : vector<1x256xi32>
    %137 = arith.andi %134, %136 : vector<1x256xi1>
    %cst_35 = arith.constant 0.000000e+00 : f32
    %138 = vector.broadcast %cst_35 : f32 to vector<1x256xf32>
    %139 = arith.select %137, %126, %138 : vector<1x256xi1>, vector<1x256xf32>
    %c16_i32_36 = arith.constant 16 : i32
    %140 = vector.broadcast %c16_i32_36 : i32 to vector<1x256xi32>
    %141 = arith.muli %45, %140 : vector<1x256xi32>
    %142 = arith.addi %141, %43 : vector<1x256xi32>
    %143 = vector.broadcast %142 : vector<1x256xi32> to vector<256x256xi32>
    %144 = arith.cmpi eq, %46, %143 : vector<256x256xi32>
    %cst_37 = arith.constant 0.000000e+00 : f32
    %145 = vector.shape_cast %139 : vector<1x256xf32> to vector<1x256xf32>
    %146 = vector.broadcast %145 : vector<1x256xf32> to vector<256x256xf32>
    %147 = vector.broadcast %cst_37 : f32 to vector<256x256xf32>
    %148 = arith.select %144, %146, %147 : vector<256x256xi1>, vector<256x256xf32>
    %149 = arith.addf %125, %148 : vector<256x256xf32>
    %c0_38 = arith.constant 0 : index
    %c0_39 = arith.constant 0 : index
    %c0_40 = arith.constant 0 : index
    %150 = vector.load %arg3[%c0_38, %c0_39, %c0_40] : memref<1x4x256xf32, #tpu.memory_space<vmem>>, vector<1x4x256xf32>
    %151 = vector.shape_cast %150 : vector<1x4x256xf32> to vector<4x256xf32>
    %cst_41 = arith.constant dense<0.000000e+00> : vector<4x256xf32>
    %152 = tpu.matmul %151, %149, %cst_41 {dimension_numbers = #tpu.dot_dimension_numbers<[1], [0], [0], [1], [0, 0, 1, 1], [], []>} : vector<4x256xf32>, vector<256x256xf32>, vector<4x256xf32> -> vector<4x256xf32>
    %c0_42 = arith.constant 0 : index
    %c0_43 = arith.constant 0 : index
    %153 = vector.load %arg6[%c0_42, %c0_43] : memref<4x4xf32, #tpu.memory_space<vmem>>, vector<4x4xf32>
    %cst_44 = arith.constant dense<0.000000e+00> : vector<4x256xf32>
    %154 = tpu.matmul %153, %152, %cst_44 {dimension_numbers = #tpu.dot_dimension_numbers<[1], [0], [0], [1], [0, 0, 1, 1], [], []>} : vector<4x4xf32>, vector<4x256xf32>, vector<4x256xf32> -> vector<4x256xf32>
    %c0_45 = arith.constant 0 : index
    %c0_46 = arith.constant 0 : index
    %155 = vector.load %arg7[%c0_45, %c0_46] : memref<4x1xf32, #tpu.memory_space<vmem>>, vector<4x1xf32>
    %156 = vector.broadcast %155 : vector<4x1xf32> to vector<4x256xf32>
    %157 = arith.addf %154, %156 : vector<4x256xf32>
    %c0_47 = arith.constant 0 : index
    %c0_48 = arith.constant 0 : index
    %c0_49 = arith.constant 0 : index
    %158 = vector.load %arg8[%c0_47, %c0_48, %c0_49] : memref<1x4x256xf32, #tpu.memory_space<vmem>>, vector<1x4x256xf32>
    %159 = vector.shape_cast %158 : vector<1x4x256xf32> to vector<4x256xf32>
    %160 = vector.shape_cast %157 : vector<4x256xf32> to vector<1x4x256xf32>
    tpu.vector_store %arg8[%c0_47, %c0_48, %c0_49], %160 {strides = array<i32>} : memref<1x4x256xf32, #tpu.memory_space<vmem>>, vector<1x4x256xf32>,
    return
  }
  func.func @transform_0(%arg0: i32, %arg1: i32) -> (i32, i32) {
    %c0_i32 = arith.constant 0 : i32
    %c0_i32_0 = arith.constant 0 : i32
    %c0_i32_1 = arith.constant 0 : i32
    return %c0_i32, %c0_i32_0 : i32, i32
  }
  func.func @transform_1(%arg0: i32, %arg1: i32) -> (i32, i32, i32) {
    %c0_i32 = arith.constant 0 : i32
    %c0_i32_0 = arith.constant 0 : i32
    %c0_i32_1 = arith.constant 0 : i32
    return %arg0, %c0_i32, %c0_i32_0 : i32, i32, i32
  }
  func.func @transform_2(%arg0: i32, %arg1: i32) -> (i32, i32) {
    %c0_i32 = arith.constant 0 : i32
    %c0_i32_0 = arith.constant 0 : i32
    return %c0_i32, %arg1 : i32, i32
  }
  func.func @transform_3(%arg0: i32, %arg1: i32) -> (i32, i32) {
    %c0_i32 = arith.constant 0 : i32
    %c0_i32_0 = arith.constant 0 : i32
    return %c0_i32, %arg1 : i32, i32
  }
  func.func @transform_4(%arg0: i32, %arg1: i32) -> (i32, i32) {
    %c0_i32 = arith.constant 0 : i32
    %c0_i32_0 = arith.constant 0 : i32
    %c0_i32_1 = arith.constant 0 : i32
    return %c0_i32, %c0_i32_0 : i32, i32
  }
  func.func @transform_5(%arg0: i32, %arg1: i32) -> (i32, i32) {
    %c0_i32 = arith.constant 0 : i32
    %c0_i32_0 = arith.constant 0 : i32
    %c0_i32_1 = arith.constant 0 : i32
    return %c0_i32, %c0_i32_0 : i32, i32
  }
  func.func @transform_6(%arg0: i32, %arg1: i32) -> (i32, i32, i32) {
    %c0_i32 = arith.constant 0 : i32
    %c0_i32_0 = arith.constant 0 : i32
    return %arg0, %c0_i32, %arg1 : i32, i32, i32
  }
}

</mosaic_0001>

<bundles_post_ra>
// kernel: cpc_spatial_transform.4
= control target key start
LH: loop header
LB: loop body
LE: loop exit
PB: predicated region body
PF: predicated region fallthrough
CT: control target
= control target key end

     0   :  { %vm255_vm0 = vcmask 1041408   ;;  %vm200_vm1 = vcmask 818176   ;;  %s1203_s1 = inlined_call_operand.vmem [shape: bf16[100,128], index: 1, kind: input, shape index: {}]   ;;  %s1204_s0 = inlined_call_operand.vmem [shape: bf16[288,100], index: 0, kind: input, shape index: {}]   ;;  %s1205_s2 = inlined_call_operand.vmem [shape: f32[1,128], index: 2, kind: input, shape index: {}]   ;;  %s1206_s3 = inlined_call_operand.vmem [shape: bf16[288,128], index: 3, kind: output, shape index: {}]  }
   0x1   :  { %v970_v0 = vld [vmem:[%s1203_s1 + $0x30] ss:$0 sps:$4 sm:$0x33]   ;;  %v971_v1 = vld [vmem:[%s1203_s1 + $0x28] sm:$0xff]   ;;  %v972_v3 = vld [vmem:[%s1203_s1 + $0x20] sm:$0xff]  }
   0x2   :  { %968 = vmatprep.subr.msk.bf16.mxu0 %vm255_vm0, %v970_v0  ;;  %v257_v2 = vsel %vm255_vm0, %v970_v0, 0  ;;  %969 = vmatprep.subr.msk.bf16.mxu1 %vm255_vm0, %v970_v0  ;;  %v977_v4 = vld [vmem:[%s1204_s0] sm:$0xff]   ;;  %v973_v5 = vld [vmem:[%s1203_s1 + $0x18] sm:$0xff]   ;;  %v979_v6 = vld [vmem:[%s1204_s0 + $0x50] sm:$0xff]  }
   0x3   :  { %905 = vmatpush3.bf16.msra.mxu0 %v257_v2  ;;  %961 = vmatpush3.bf16.msra.mxu1 %v257_v2  ;;  %v974_v7 = vld [vmem:[%s1203_s1 + $0x10] sm:$0xff]   ;;  %v975_v8 = vld [vmem:[%s1203_s1 + $0x8] sm:$0xff]   ;;  %v976_v9 = vld [vmem:[%s1203_s1] sm:$0xff]  }
   0x4   :  { %906 = vmatprep.subr.bf16.mxu0 %v971_v1  ;;  %955 = vmatprep.subr.bf16.mxu1 %v971_v1  ;;  %v978_v10 = vld [vmem:[%s1204_s0 + $0x8] sm:$0xff]   ;;  %v980_v11 = vld [vmem:[%s1204_s0 + $0x58] sm:$0xff]   ;;  %v981_v12 = vld [vmem:[%s1204_s0 + $0x10] sm:$0xff]  }
   0x5   :  { %918 = vmatprep.mubr.msk.bf16.mxu0 %vm200_vm1, %v977_v4  ;;  %938 = vmatprep.mubr.msk.bf16.mxu1 %vm200_vm1, %v979_v6  ;;  %v983_v13 = vld [vmem:[%s1204_s0 + $0x60] sm:$0xff]   ;;  %v982_v14 = vld [vmem:[%s1204_s0 + $0x18] sm:$0xff]   ;;  %v984_v15 = vld [vmem:[%s1204_s0 + $0x68] sm:$0xff]  }
   0x6   :  { %v985_v16 = vld [vmem:[%s1204_s0 + $0x20] sm:$0xff]   ;;  %v987_v17 = vld [vmem:[%s1204_s0 + $0x70] sm:$0xff]   ;;  %v986_v18 = vld [vmem:[%s1204_s0 + $0x28] sm:$0xff]  }
   0x7   :  { %907 = vmatpush3.bf16.msra.mxu0 %v971_v1  ;;  %962 = vmatpush3.bf16.msra.mxu1 %v971_v1  ;;  %v988_v19 = vld [vmem:[%s1204_s0 + $0x78] sm:$0xff]   ;;  %v989_v20 = vld [vmem:[%s1204_s0 + $0x30] sm:$0xff]   ;;  %v991_v21 = vld [vmem:[%s1204_s0 + $0x80] sm:$0xff]  }
   0x8   :  { %908 = vmatprep.subr.bf16.mxu0 %v972_v3  ;;  %956 = vmatprep.subr.bf16.mxu1 %v972_v3  ;;  %v990_v22 = vld [vmem:[%s1204_s0 + $0x38] sm:$0xff]   ;;  %v992_v23 = vld [vmem:[%s1204_s0 + $0x88] sm:$0xff]   ;;  %v993_v24 = vld [vmem:[%s1204_s0 + $0x40] sm:$0xff]  }
   0x9   :  { %v994_v25 = vld [vmem:[%s1204_s0 + $0x48] sm:$0xff]   ;;  %v1111_v26 = vld [vmem:[%s1205_s2] ss:$0 sm:$0xff] }
   0xb   :  { %909 = vmatpush3.bf16.msra.mxu0 %v972_v3  ;;  %963 = vmatpush3.bf16.msra.mxu1 %v972_v3 }
   0xc   :  { %910 = vmatprep.subr.bf16.mxu0 %v973_v5  ;;  %957 = vmatprep.subr.bf16.mxu1 %v973_v5 }
   0xf   :  { %911 = vmatpush3.bf16.msra.mxu0 %v973_v5  ;;  %964 = vmatpush3.bf16.msra.mxu1 %v973_v5 }
  0x10   :  { %912 = vmatprep.subr.bf16.mxu0 %v974_v7  ;;  %958 = vmatprep.subr.bf16.mxu1 %v974_v7 }
  0x13   :  { %913 = vmatpush3.bf16.msra.mxu0 %v974_v7  ;;  %965 = vmatpush3.bf16.msra.mxu1 %v974_v7 }
  0x14   :  { %914 = vmatprep.subr.bf16.mxu0 %v975_v8  ;;  %959 = vmatprep.subr.bf16.mxu1 %v975_v8 }
  0x17   :  { %915 = vmatpush3.bf16.msra.mxu0 %v975_v8  ;;  %966 = vmatpush3.bf16.msra.mxu1 %v975_v8 }
  0x18   :  { %916 = vmatprep.subr.bf16.mxu0 %v976_v9  ;;  %960 = vmatprep.subr.bf16.mxu1 %v976_v9 }
  0x1b   :  { %917 = vmatpush3.bf16.msra.mxu0 %v976_v9  ;;  %967 = vmatpush3.bf16.msra.mxu1 %v976_v9 }
  0x1e   :  { %919 = vmatmul.mubr.msk.bf16.vlgmr.msra.gmra.mxu0 %vm200_vm1, %v978_v10  ;;  %939 = vmatmul.mubr.msk.bf16.vlgmr.msra.gmra.mxu1 %vm200_vm1, %v980_v11 }
  0x1f   :  { %922 = vmatprep.mubr.msk.bf16.mxu0 %vm200_vm1, %v981_v12  ;;  %942 = vmatprep.mubr.msk.bf16.mxu1 %vm200_vm1, %v983_v13 }
  0x26   :  { %923 = vmatmul.mubr.msk.bf16.gmra.mxu0 %vm200_vm1, %v982_v14  ;;  %943 = vmatmul.mubr.msk.bf16.gmra.mxu1 %vm200_vm1, %v984_v15 }
  0x27   :  { %926 = vmatprep.mubr.msk.bf16.mxu0 %vm200_vm1, %v985_v16  ;;  %946 = vmatprep.mubr.msk.bf16.mxu1 %vm200_vm1, %v987_v17 }
  0x2e   :  { %927 = vmatmul.mubr.msk.bf16.gmra.mxu0 %vm200_vm1, %v986_v18  ;;  %947 = vmatmul.mubr.msk.bf16.gmra.mxu1 %vm200_vm1, %v988_v19 }
  0x2f   :  { %930 = vmatprep.mubr.msk.bf16.mxu0 %vm200_vm1, %v989_v20  ;;  %950 = vmatprep.mubr.msk.bf16.mxu1 %vm200_vm1, %v991_v21 }
  0x36   :  { %931 = vmatmul.mubr.msk.bf16.gmra.mxu0 %vm200_vm1, %v990_v22  ;;  %951 = vmatmul.mubr.msk.bf16.gmra.mxu1 %vm200_vm1, %v992_v23 }
  0x37   :  { %934 = vmatprep.mubr.msk.bf16.mxu0 %vm200_vm1, %v993_v24 }
  0x3e   :  { %935 = vmatmul.mubr.msk.bf16.gmra.mxu0 %vm200_vm1, %v994_v25 }
  0xde   :  { %v920_v27 = vpop.f32.mrf.mxu0  ;;  %v940_v28 = vpop.f32.mrf.mxu1 }
  0xdf   :  { %v382_v29 = vadd.f32 %v940_v28, %v1111_v26  ;;  %v302_v30 = vadd.f32 %v920_v27, %v1111_v26 }
  0xe0   :  { %v293_v31 = vpop.f32.mrf.mxu0  ;;  %v373_v32 = vpop.f32.mrf.mxu1 }
  0xe1   :  { %v374_v34 = vadd.f32 %v1111_v26, %v373_v32  ;;  %v294_v36 = vadd.f32 %v1111_v26, %v293_v31  ;;  %v458_v37 = vmax.f32 %v382_v29, 0.0  ;;  %v438_v40 = vmax.f32 %v302_v30, 0.0 }
  0xe2   :  { %v921_v33 = vpop.f32.mrf.mxu0  ;;  %v941_v35 = vpop.f32.mrf.mxu1 }
  0xe3   :  { %v305_v38 = vadd.f32 %v921_v33, %v1111_v26  ;;  %v385_v39 = vadd.f32 %v941_v35, %v1111_v26  ;;  %v456_v47 = vmax.f32 %v374_v34, 0.0  ;;  %v436_v50 = vmax.f32 %v294_v36, 0.0 }
  0xe4   :  { %v296_v41 = vpop.f32.mrf.mxu0  ;;  %v376_v42 = vpop.f32.mrf.mxu1 }
  0xe5   :  { %v439_v43 = vmax.f32 %v305_v38, 0.0  ;;  %v297_v44 = vadd.f32 %v1111_v26, %v296_v41  ;;  %v459_v45 = vmax.f32 %v385_v39, 0.0  ;;  %v377_v46 = vadd.f32 %v1111_v26, %v376_v42 }
  0xe6   :  { %v924_v48 = vpop.f32.mrf.mxu0  ;;  %v944_v49 = vpop.f32.mrf.mxu1 }
  0xe7   :  { %v780_v51 = vpack.c.bf16 %v439_v43, %v438_v40  ;;  %v437_v52 = vmax.f32 %v297_v44, 0.0  ;;  %v830_v53 = vpack.c.bf16 %v459_v45, %v458_v37  ;;  %v318_v54 = vadd.f32 %v924_v48, %v1111_v26 }
  0xe8   :  { %v457_v55 = vmax.f32 %v377_v46, 0.0  ;;  %v309_v56 = vpop.f32.mrf.mxu0  ;;  %v398_v57 = vadd.f32 %v944_v49, %v1111_v26  ;;  %v389_v58 = vpop.f32.mrf.mxu1 }
  0xe9   :  { %862 = vst [vmem:[%s1206_s3 + $0x8] sm:$0xff] %v780_v51   ;;  %v775_v59 = vpack.c.bf16 %v437_v52, %v436_v50  ;;  %872 = vst [vmem:[%s1206_s3 + $0x58] sm:$0xff] %v830_v53   ;;  %v390_v62 = vadd.f32 %v1111_v26, %v389_v58  ;;  %v310_v0 = vadd.f32 %v1111_v26, %v309_v56  ;;  %v442_v4 = vmax.f32 %v318_v54, 0.0 }
  0xea   :  { %v825_v60 = vpack.c.bf16 %v457_v55, %v456_v47  ;;  %v925_v61 = vpop.f32.mrf.mxu0  ;;  %v945_v63 = vpop.f32.mrf.mxu1  ;;  %v462_v1 = vmax.f32 %v398_v57, 0.0 }
  0xeb   :  { %776 = vst [vmem:[%s1206_s3] sm:$0xff] %v775_v59   ;;  %v321_v2 = vadd.f32 %v925_v61, %v1111_v26  ;;  %v401_v3 = vadd.f32 %v945_v63, %v1111_v26  ;;  %v460_v11 = vmax.f32 %v390_v62, 0.0  ;;  %v440_v14 = vmax.f32 %v310_v0, 0.0 }
  0xec   :  { %871 = vst [vmem:[%s1206_s3 + $0x50] sm:$0xff] %v825_v60   ;;  %v312_v5 = vpop.f32.mrf.mxu0  ;;  %v392_v6 = vpop.f32.mrf.mxu1 }
  0xed   :  { %v443_v7 = vmax.f32 %v321_v2, 0.0  ;;  %v313_v8 = vadd.f32 %v1111_v26, %v312_v5  ;;  %v463_v9 = vmax.f32 %v401_v3, 0.0  ;;  %v393_v10 = vadd.f32 %v1111_v26, %v392_v6 }
  0xee   :  { %v928_v12 = vpop.f32.mrf.mxu0  ;;  %v948_v13 = vpop.f32.mrf.mxu1 }
  0xef   :  { %v790_v15 = vpack.c.bf16 %v443_v7, %v442_v4  ;;  %v441_v16 = vmax.f32 %v313_v8, 0.0  ;;  %v840_v17 = vpack.c.bf16 %v463_v9, %v462_v1  ;;  %v334_v18 = vadd.f32 %v928_v12, %v1111_v26 }
  0xf0   :  { %v461_v19 = vmax.f32 %v393_v10, 0.0  ;;  %v325_v20 = vpop.f32.mrf.mxu0  ;;  %v414_v21 = vadd.f32 %v948_v13, %v1111_v26  ;;  %v405_v22 = vpop.f32.mrf.mxu1 }
  0xf1   :  { %864 = vst [vmem:[%s1206_s3 + $0x18] sm:$0xff] %v790_v15   ;;  %v785_v23 = vpack.c.bf16 %v441_v16, %v440_v14  ;;  %874 = vst [vmem:[%s1206_s3 + $0x68] sm:$0xff] %v840_v17   ;;  %v406_v27 = vadd.f32 %v1111_v26, %v405_v22  ;;  %v326_v29 = vadd.f32 %v1111_v26, %v325_v20  ;;  %v446_v33 = vmax.f32 %v334_v18, 0.0 }
  0xf2   :  { %v835_v24 = vpack.c.bf16 %v461_v19, %v460_v11  ;;  %v929_v25 = vpop.f32.mrf.mxu0  ;;  %v949_v28 = vpop.f32.mrf.mxu1  ;;  %v466_v30 = vmax.f32 %v414_v21, 0.0 }
  0xf3   :  { %863 = vst [vmem:[%s1206_s3 + $0x10] sm:$0xff] %v785_v23   ;;  %v337_v31 = vadd.f32 %v929_v25, %v1111_v26  ;;  %v417_v32 = vadd.f32 %v949_v28, %v1111_v26  ;;  %v464_v40 = vmax.f32 %v406_v27, 0.0  ;;  %v444_v43 = vmax.f32 %v326_v29, 0.0 }
  0xf4   :  { %873 = vst [vmem:[%s1206_s3 + $0x60] sm:$0xff] %v835_v24   ;;  %v328_v34 = vpop.f32.mrf.mxu0  ;;  %v408_v35 = vpop.f32.mrf.mxu1 }
  0xf5   :  { %v447_v36 = vmax.f32 %v337_v31, 0.0  ;;  %v329_v37 = vadd.f32 %v1111_v26, %v328_v34  ;;  %v467_v38 = vmax.f32 %v417_v32, 0.0  ;;  %v409_v39 = vadd.f32 %v1111_v26, %v408_v35 }
  0xf6   :  { %v932_v41 = vpop.f32.mrf.mxu0  ;;  %v952_v42 = vpop.f32.mrf.mxu1 }
  0xf7   :  { %v800_v44 = vpack.c.bf16 %v447_v36, %v446_v33  ;;  %v445_v45 = vmax.f32 %v329_v37, 0.0  ;;  %v850_v46 = vpack.c.bf16 %v467_v38, %v466_v30  ;;  %v350_v47 = vadd.f32 %v932_v41, %v1111_v26 }
  0xf8   :  { %v465_v48 = vmax.f32 %v409_v39, 0.0  ;;  %v341_v49 = vpop.f32.mrf.mxu0  ;;  %v430_v50 = vadd.f32 %v952_v42, %v1111_v26  ;;  %v421_v51 = vpop.f32.mrf.mxu1 }
  0xf9   :  { %866 = vst [vmem:[%s1206_s3 + $0x28] sm:$0xff] %v800_v44   ;;  %v795_v52 = vpack.c.bf16 %v445_v45, %v444_v43  ;;  %876 = vst [vmem:[%s1206_s3 + $0x78] sm:$0xff] %v850_v46   ;;  %v422_v55 = vadd.f32 %v1111_v26, %v421_v51  ;;  %v342_v57 = vadd.f32 %v1111_v26, %v341_v49  ;;  %v450_v61 = vmax.f32 %v350_v47, 0.0 }
  0xfa   :  { %v845_v53 = vpack.c.bf16 %v465_v48, %v464_v40  ;;  %v933_v54 = vpop.f32.mrf.mxu0  ;;  %v953_v56 = vpop.f32.mrf.mxu1  ;;  %v470_v58 = vmax.f32 %v430_v50, 0.0 }
  0xfb   :  { %865 = vst [vmem:[%s1206_s3 + $0x20] sm:$0xff] %v795_v52   ;;  %v353_v59 = vadd.f32 %v933_v54, %v1111_v26  ;;  %v433_v60 = vadd.f32 %v953_v56, %v1111_v26  ;;  %v468_v4 = vmax.f32 %v422_v55, 0.0  ;;  %v448_v6 = vmax.f32 %v342_v57, 0.0 }
  0xfc   :  { %875 = vst [vmem:[%s1206_s3 + $0x70] sm:$0xff] %v845_v53   ;;  %v344_v62 = vpop.f32.mrf.mxu0  ;;  %v424_v63 = vpop.f32.mrf.mxu1 }
  0xfd   :  { %v451_v0 = vmax.f32 %v353_v59, 0.0  ;;  %v345_v1 = vadd.f32 %v1111_v26, %v344_v62  ;;  %v471_v2 = vmax.f32 %v433_v60, 0.0  ;;  %v425_v3 = vadd.f32 %v1111_v26, %v424_v63 }
  0xfe   :  { %v936_v5 = vpop.f32.mrf.mxu0 }
  0xff   :  { %v810_v7 = vpack.c.bf16 %v451_v0, %v450_v61  ;;  %v449_v8 = vmax.f32 %v345_v1, 0.0  ;;  %v860_v9 = vpack.c.bf16 %v471_v2, %v470_v58  ;;  %v469_v10 = vmax.f32 %v425_v3, 0.0 }
 0x100   :  { %v357_v11 = vpop.f32.mrf.mxu0  ;;  %v366_v13 = vadd.f32 %v936_v5, %v1111_v26 }
 0x101   :  { %868 = vst [vmem:[%s1206_s3 + $0x38] sm:$0xff] %v810_v7   ;;  %v805_v12 = vpack.c.bf16 %v449_v8, %v448_v6  ;;  %878 = vst [vmem:[%s1206_s3 + $0x88] sm:$0xff] %v860_v9   ;;  %v855_v14 = vpack.c.bf16 %v469_v10, %v468_v4  ;;  %v358_v16 = vadd.f32 %v1111_v26, %v357_v11 }
 0x102   :  { %v937_v15 = vpop.f32.mrf.mxu0  ;;  %v454_v19 = vmax.f32 %v366_v13, 0.0 }
 0x103   :  { %867 = vst [vmem:[%s1206_s3 + $0x30] sm:$0xff] %v805_v12   ;;  %v369_v17 = vadd.f32 %v937_v15, %v1111_v26  ;;  %877 = vst [vmem:[%s1206_s3 + $0x80] sm:$0xff] %v855_v14   ;;  %v452_v22 = vmax.f32 %v358_v16, 0.0 }
 0x104   :  { %v360_v18 = vpop.f32.mrf.mxu0 }
 0x105   :  { %v455_v20 = vmax.f32 %v369_v17, 0.0  ;;  %v361_v21 = vadd.f32 %v1111_v26, %v360_v18 }
 0x107   :  { %v820_v23 = vpack.c.bf16 %v455_v20, %v454_v19  ;;  %v453_v24 = vmax.f32 %v361_v21, 0.0 }
 0x109   :  { %870 = vst [vmem:[%s1206_s3 + $0x48] sm:$0xff] %v820_v23   ;;  %v815_v25 = vpack.c.bf16 %v453_v24, %v452_v22 }
 0x10b   :  { %869 = vst [vmem:[%s1206_s3 + $0x40] sm:$0xff] %v815_v25  }

// kernel: cpc_spatial_transform.6
= control target key start
LH: loop header
LB: loop body
LE: loop exit
PB: predicated region body
PF: predicated region fallthrough
CT: control target
= control target key end

     0   :  { %s599_s18 = smov 0   ;;  %s708_s0 = inlined_call_operand.vmem [shape: f32[2,100,128], index: 0, kind: input, shape index: {}]   ;;  %s709_s1 = inlined_call_operand.vmem [shape: f32[128,32], index: 1, kind: input, shape index: {}]   ;;  %s710_s2 = inlined_call_operand.vmem [shape: f32[1,32], index: 2, kind: input, shape index: {}]   ;;  %s711_s3 = inlined_call_operand.vmem [shape: f32[32,6], index: 3, kind: input, shape index: {}]   ;;  %s712_s4 = inlined_call_operand.vmem [shape: f32[1,6], index: 4, kind: input, shape index: {}]   ;;  %s713_s5 = inlined_call_operand.vmem [shape: f32[2,1,6], index: 5, kind: output, shape index: {}]  }
   0x1 LB: > { %s471_s19 = sadd.s32 4294967295, %s565_s18   ;;  %p475_p0 = scmp.ge.s32.totalorder %s565_s18, 1  ;;  %s565_s18 = sphi %s599_s18, %s15_s18  }
   0x2   : > { %p187_p1 = scmp.lt.s32.totalorder %s565_s18, 3 }
   0x4   : > { %p188_p2 = pnand %p475_p0, %p187_p1 }
   0x5   : > { %p213_p3 = scmp.lt.s32.totalorder (!%p188_p2), %s471_s19, 1 }
   0x6   : > { %191 = sbr.rel (%p188_p2) target bundleno = 437 (0x1b5), region = 40 }
   0xb   : > { %v270_v0 = vld [vmem:[%s709_s1 + $0x78] sm:$0xff]  ;;  %v567_v1 = vmov 0.0   ;;  %v269_v2 = vld [vmem:[%s709_s1 + $0x70] sm:$0xff]  ;;  %vm568_vm0 = vmmov 0   ;;  %s715_s19 = smov (!%p213_p3, %s471_s19), 1  ;;  %v268_v3 = vld [vmem:[%s709_s1 + $0x68] sm:$0xff] }
   0xc   : > { %502 = vmatprep.subr.mxu0 %v567_v1  ;;  %534 = vmatprep.mubr.msk.f32.mxu0 %vm568_vm0, %v567_v1  ;;  %s548_s26 = smul.u32 104, %s715_s19  ;;  %v267_v4 = vld [vmem:[%s709_s1 + $0x60] sm:$0xff]  ;;  %v346_v5 = vld [vmem:[%s711_s3 + $0x18] sm:$0xff]  ;;  %v265_v7 = vld [vmem:[%s709_s1 + $0x50] sm:$0xff]  ;;  %vm242_vm1 = vcmask 1043456   ;;  %vm348_vm2 = vcmask 261120   ;;  %s220_s24 = scalar_lea.vmem %s713_s5, %s715_s19 }
   0xd   : > { %503 = vmatpush3.msra.mxu0 %v270_v0  ;;  %537 = vmatprep.subr.mxu1 %v567_v1  ;;  %v266_v6 = vld [vmem:[%s709_s1 + $0x58] sm:$0xff]  ;;  %v264_v24 = vld [vmem:[%s709_s1 + $0x48] sm:$0xff]  ;;  %v263_v31 = vld [vmem:[%s709_s1 + $0x40] sm:$0xff]  ;;  %vm422_vm3 = vcmask 40960  }
   0xe   : > { %504 = vmatprep.subr.mxu0 %v567_v1  ;;  %545 = vmatprep.mubr.msk.f32.mxu1 %vm568_vm0, %v567_v1  ;;  %s217_s10 = scalar_lea.vmem %s708_s0, %s548_s26  ;;  %v262_v34 = vld [vmem:[%s709_s1 + $0x38] sm:$0xff]  ;;  %v261_v36 = vld [vmem:[%s709_s1 + $0x30] sm:$0xff]  ;;  %v260_v38 = vld [vmem:[%s709_s1 + $0x28] sm:$0xff] }
   0xf   : > { %505 = vmatpush3.msra.mxu0 %v269_v2  ;;  %538 = vmatpush3.msra.mxu1 %v346_v5  ;;  %v221_v8 = vld [vmem:[%s217_s10] sm:$0xff]  ;;  %v222_v9 = vld [vmem:[%s217_s10 + $0x8] sm:$0xff]  ;;  %v223_v10 = vld [vmem:[%s217_s10 + $0x10] sm:$0xff] }
  0x10   : > { %506 = vmatprep.subr.mxu0 %v567_v1  ;;  %539 = vmatprep.subr.mxu1 %v567_v1  ;;  %v224_v11 = vld [vmem:[%s217_s10 + $0x18] sm:$0xff]  ;;  %v225_v12 = vld [vmem:[%s217_s10 + $0x20] sm:$0xff]  ;;  %v226_v13 = vld [vmem:[%s217_s10 + $0x28] sm:$0xff] }
  0x11   : > { %507 = vmatpush3.msra.mxu0 %v268_v3  ;;  %v227_v14 = vld [vmem:[%s217_s10 + $0x30] sm:$0xff]  ;;  %v228_v15 = vld [vmem:[%s217_s10 + $0x38] sm:$0xff]  ;;  %v229_v16 = vld [vmem:[%s217_s10 + $0x40] sm:$0xff]  ;;  %v234_v17 = vmax.f32 %v221_v8, %v225_v12  ;;  %v235_v18 = vmax.f32 %v222_v9, %v226_v13 }
  0x12   : > { %508 = vmatprep.subr.mxu0 %v567_v1  ;;  %v230_v19 = vld [vmem:[%s217_s10 + $0x48] sm:$0xff]  ;;  %v231_v20 = vld [vmem:[%s217_s10 + $0x50] sm:$0xff]  ;;  %v232_v21 = vld [vmem:[%s217_s10 + $0x58] sm:$0xff]  ;;  %v236_v22 = vmax.f32 %v223_v10, %v227_v14  ;;  %v237_v23 = vmax.f32 %v224_v11, %v228_v15 }
  0x13   : > { %509 = vmatpush3.msra.mxu0 %v267_v4  ;;  %v233_v25 = vld [vmem:[%s217_s10 + $0x60] sm:$0xf]  ;;  %v238_v26 = vmax.f32 %v234_v17, %v229_v16  ;;  %v239_v27 = vmax.f32 %v235_v18, %v230_v19  ;;  %v258_v42 = vld [vmem:[%s709_s1 + $0x18] sm:$0xff]  ;;  %v257_v44 = vld [vmem:[%s709_s1 + $0x10] sm:$0xff] }
  0x14   : > { %510 = vmatprep.subr.mxu0 %v567_v1  ;;  %v240_v28 = vmax.f32 %v236_v22, %v231_v20  ;;  %v241_v29 = vmax.f32 %v237_v23, %v232_v21  ;;  %v243_v30 = vsel %vm242_vm1, %v233_v25, -inf  ;;  %v259_v40 = vld [vmem:[%s709_s1 + $0x20] sm:$0xff]  ;;  %v256_v46 = vld [vmem:[%s709_s1 + $0x8] sm:$0xff]  ;;  %v345_v51 = vld [vmem:[%s711_s3 + $0x10] sm:$0xff] }
  0x15   : > { %511 = vmatpush3.msra.mxu0 %v266_v6  ;;  %v244_v32 = vmax.f32 %v238_v26, %v243_v30  ;;  %v255_v48 = vld [vmem:[%s709_s1] sm:$0xff]  ;;  %540 = vmatpush3.msra.mxu1 %v345_v51  ;;  %v344_v52 = vld [vmem:[%s711_s3 + $0x8] sm:$0xff] }
  0x16   : > { %512 = vmatprep.subr.mxu0 %v567_v1  ;;  %v246_v33 = vmax.f32 %v240_v28, %v241_v29  ;;  %541 = vmatprep.subr.mxu1 %v567_v1  ;;  %v343_v53 = vld [vmem:[%s711_s3] sm:$0xff] }
  0x17   : > { %513 = vmatpush3.msra.mxu0 %v265_v7  ;;  %v245_v35 = vmax.f32 %v244_v32, %v239_v27  ;;  %542 = vmatpush3.msra.mxu1 %v344_v52  ;;  %v271_v54 = vld [vmem:[%s710_s2] sm:$0x1] }
  0x18   : > { %514 = vmatprep.subr.mxu0 %v567_v1  ;;  %543 = vmatprep.subr.mxu1 %v567_v1  ;;  %v347_v59 = vld [vmem:[%s712_s4] sm:$0x1] }
  0x19   : > { %515 = vmatpush3.msra.mxu0 %v264_v24  ;;  %v247_v37 = vmax.f32 %v245_v35, %v246_v33  ;;  %544 = vmatpush3.msra.mxu1 %v343_v53 }
  0x1a   : > { %516 = vmatprep.subr.mxu0 %v567_v1 }
  0x1b   : > { %517 = vmatpush3.msra.mxu0 %v263_v31  ;;  %v248_v39 = vrot.slane %v247_v37, 4 }
  0x1c   : > { %518 = vmatprep.subr.mxu0 %v567_v1 }
  0x1d   : > { %519 = vmatpush3.msra.mxu0 %v262_v34  ;;  %v249_v41 = vmax.f32 %v247_v37, %v248_v39 }
  0x1e   : > { %520 = vmatprep.subr.mxu0 %v567_v1 }
  0x1f   : > { %521 = vmatpush3.msra.mxu0 %v261_v36  ;;  %v250_v43 = vrot.slane %v249_v41, 2 }
  0x20   : > { %522 = vmatprep.subr.mxu0 %v567_v1 }
  0x21   : > { %523 = vmatpush3.msra.mxu0 %v260_v38  ;;  %v251_v45 = vmax.f32 %v249_v41, %v250_v43 }
  0x22   : > { %524 = vmatprep.subr.mxu0 %v567_v1 }
  0x23   : > { %525 = vmatpush3.msra.mxu0 %v259_v40  ;;  %v252_v47 = vrot.slane %v251_v45, 1 }
  0x24   : > { %526 = vmatprep.subr.mxu0 %v567_v1 }
  0x25   : > { %527 = vmatpush3.msra.mxu0 %v258_v42  ;;  %v253_v49 = vmax.f32 %v251_v45, %v252_v47 }
  0x26   : > { %528 = vmatprep.subr.mxu0 %v567_v1 }
  0x27   : > { %529 = vmatpush3.msra.mxu0 %v257_v44  ;;  %v254_v50 = vmax.f32 %v253_v49, 0.0 }
  0x28   : > { %530 = vmatprep.subr.mxu0 %v567_v1 }
  0x29   : > { %531 = vmatpush3.msra.mxu0 %v256_v46 }
  0x2a   : > { %532 = vmatprep.subr.mxu0 %v567_v1 }
  0x2b   : > { %533 = vmatpush3.msra.mxu0 %v255_v48 }
  0x2c   : > { %535 = vmatmul.mubr.f32.vlgmr.msra.gmra.mxu0 %v254_v50 }
  0xec   : > { %v338_v55 = vpop.f32.mrf.mxu0 }
  0xed   : > { %v339_v56 = vadd.f32 %v338_v55, %v271_v54 }
  0xee   : > { %v536_v57 = vpop.f32.mrf.mxu0 }
  0xef   : > { %v342_v58 = vmax.f32 %v339_v56, 0.0 }
  0xf1   : > { %546 = vmatmul.mubr.msk.f32.vlgmr.msra.gmra.mxu1 %vm348_vm2, %v342_v58 }
 0x1b1   : > { %v418_v60 = vpop.f32.mrf.mxu1 }
 0x1b2   : > { %v419_v61 = vadd.f32 %v418_v60, %v347_v59 }
 0x1b3   : > { %v547_v62 = vpop.f32.mrf.mxu1 }
 0x1b4   : > { %423 = vst.msk [vmem:[%s220_s24] sm:$0x1] %vm422_vm3, %v419_v61 }
 0x1b5 PF: > { %s15_s18 = sadd.s32 1, %s565_s18  }
 0x1b6   : > { %p12_p4 = scmp.ge.s32.totalorder %s15_s18, 4  }
 0x1b8   :  { %14 = sbr.rel (!%p12_p4) target bundleno = 1 (0x1), region = 70 }

// kernel: cpc_spatial_transform.5
= control target key start
LH: loop header
LB: loop body
LE: loop exit
PB: predicated region body
PF: predicated region fallthrough
CT: control target
= control target key end

     0   :  { %vm2927_vm0 = vmmov 0   ;;  %s3792_s1 = inlined_call_operand.vmem [shape: bf16[1152,128], index: 1, kind: input, shape index: {}]   ;;  %s3793_s0 = inlined_call_operand.vmem [shape: bf16[200,1152], index: 0, kind: input, shape index: {}]   ;;  %s3794_s2 = inlined_call_operand.vmem [shape: f32[1,128], index: 2, kind: input, shape index: {}]   ;;  %s3795_s3 = inlined_call_operand.vmem [shape: f32[200,128], index: 3, kind: output, shape index: {}]  }
   0x1   :  { %v2689_v0 = vld [vmem:[%s3792_s1 + $0x78] sm:$0xff]   ;;  %v2691_v2 = vld [vmem:[%s3792_s1 + $0x70] sm:$0xff]   ;;  %v2693_v4 = vld [vmem:[%s3792_s1 + $0x68] sm:$0xff]  }
   0x2   :  { %v2690_v1 = vld [vmem:[%s3792_s1 + $0x38] sm:$0xff]   ;;  %2206 = vmatprep.subr.bf16.mxu0 %v2689_v0  ;;  %2671 = vmatprep.subr.bf16.mxu1 %v2689_v0  ;;  %v2692_v3 = vld [vmem:[%s3792_s1 + $0x30] sm:$0xff]   ;;  %v2694_v5 = vld [vmem:[%s3792_s1 + $0x28] sm:$0xff]  }
   0x3   :  { %2207 = vmatpush3.bf16.msra.mxu0 %v2690_v1  ;;  %2679 = vmatpush3.bf16.msra.mxu1 %v2690_v1  ;;  %v2695_v6 = vld [vmem:[%s3792_s1 + $0x60] sm:$0xff]   ;;  %v2697_v8 = vld [vmem:[%s3792_s1 + $0x58] sm:$0xff]   ;;  %v2699_v10 = vld [vmem:[%s3792_s1 + $0x50] sm:$0xff]  }
   0x4   :  { %2208 = vmatprep.subr.bf16.mxu0 %v2691_v2  ;;  %2672 = vmatprep.subr.bf16.mxu1 %v2691_v2  ;;  %v2696_v7 = vld [vmem:[%s3792_s1 + $0x20] sm:$0xff]   ;;  %v2698_v9 = vld [vmem:[%s3792_s1 + $0x18] sm:$0xff]   ;;  %v2700_v13 = vld [vmem:[%s3792_s1 + $0x10] sm:$0xff]  }
   0x5   :  { %v2707_v11 = vld [vmem:[%s3793_s0 + $0x4] ss:$36 sps:$4 sm:$0xff]   ;;  %v2710_v12 = vld [vmem:[%s3793_s0 + $0x1fc] ss:$36 sps:$4 sm:$0xff]   ;;  %v2715_v24 = vld [vmem:[%s3793_s0 + $0x4c] ss:$36 sps:$4 sm:$0xff]  }
   0x6   :  { %v2701_v14 = vld [vmem:[%s3792_s1 + $0x48] sm:$0xff]   ;;  %1339 = vmatprep.mubr.bf16.mxu0 %v2707_v11  ;;  %1395 = vmatprep.mubr.bf16.mxu1 %v2710_v12  ;;  %v2703_v16 = vld [vmem:[%s3792_s1 + $0x40] sm:$0xff]   ;;  %v2711_v18 = vld [vmem:[%s3792_s1 + $0x178] sm:$0xff]   ;;  %v2926_v11 = vmov 0.0  }
   0x7   :  { %2209 = vmatpush3.bf16.msra.mxu0 %v2692_v3  ;;  %2680 = vmatpush3.bf16.msra.mxu1 %v2692_v3  ;;  %v2702_v15 = vld [vmem:[%s3792_s1 + $0x8] sm:$0xff]   ;;  %v2704_v17 = vld [vmem:[%s3792_s1] sm:$0xff]   ;;  %v2708_v20 = vld [vmem:[%s3793_s0 + $0x1f8] ss:$36 sps:$4 sm:$0xff]  }
   0x8   :  { %2210 = vmatprep.subr.bf16.mxu0 %v2693_v4  ;;  %2673 = vmatprep.subr.bf16.mxu1 %v2693_v4  ;;  %v2705_v19 = vld [vmem:[%s3793_s0] ss:$36 sps:$4 sm:$0xff]   ;;  %v2713_v21 = vld [vmem:[%s3792_s1 + $0xf8] sm:$0xff]   ;;  %v2719_v26 = vld [vmem:[%s3792_s1 + $0x170] sm:$0xff]  }
   0x9   :  { %v2712_v22 = vld [vmem:[%s3792_s1 + $0x138] sm:$0xff]   ;;  %v2717_v25 = vld [vmem:[%s3793_s0 + $0x244] ss:$36 sps:$4 sm:$0xff]   ;;  %v2722_v27 = vld [vmem:[%s3792_s1 + $0x130] sm:$0xff]  }
   0xa   :  { %v2714_v23 = vld [vmem:[%s3792_s1 + $0xb8] sm:$0xff]   ;;  %v2723_v28 = vld [vmem:[%s3792_s1 + $0xf0] sm:$0xff]   ;;  %v2725_v30 = vld [vmem:[%s3792_s1 + $0x168] sm:$0xff]  }
   0xb   :  { %2211 = vmatpush3.bf16.msra.mxu0 %v2694_v5  ;;  %2681 = vmatpush3.bf16.msra.mxu1 %v2694_v5  ;;  %v2724_v29 = vld [vmem:[%s3792_s1 + $0xb0] sm:$0xff]   ;;  %v2720_v31 = vld [vmem:[%s3793_s0 + $0x48] ss:$36 sps:$4 sm:$0xff]   ;;  %v2721_v32 = vld [vmem:[%s3793_s0 + $0x240] ss:$36 sps:$4 sm:$0xff]  }
   0xc   :  { %2212 = vmatprep.subr.bf16.mxu0 %v2695_v6  ;;  %2674 = vmatprep.subr.bf16.mxu1 %v2695_v6  ;;  %v2733_v33 = vld [vmem:[%s3792_s1 + $0xe8] sm:$0xff]   ;;  %v2726_v34 = vld [vmem:[%s3793_s0 + $0x94] ss:$36 sps:$4 sm:$0xff]   ;;  %v2735_v38 = vld [vmem:[%s3792_s1 + $0x160] sm:$0xff]  }
   0xd   :  { %v2728_v35 = vld [vmem:[%s3793_s0 + $0x28c] ss:$36 sps:$4 sm:$0xff]   ;;  %v2741_v39 = vld [vmem:[%s3792_s1 + $0xe0] sm:$0xff]   ;;  %v2745_v44 = vld [vmem:[%s3792_s1 + $0x158] sm:$0xff]  }
   0xe   :  { %v2730_v36 = vld [vmem:[%s3792_s1 + $0x128] sm:$0xff]   ;;  %v2736_v40 = vld [vmem:[%s3792_s1 + $0x120] sm:$0xff]   ;;  %v2731_v42 = vld [vmem:[%s3793_s0 + $0x90] ss:$36 sps:$4 sm:$0xff]  }
   0xf   :  { %2213 = vmatpush3.bf16.msra.mxu0 %v2696_v7  ;;  %2682 = vmatpush3.bf16.msra.mxu1 %v2696_v7  ;;  %v2734_v37 = vld [vmem:[%s3792_s1 + $0xa8] sm:$0xff]   ;;  %v2744_v41 = vld [vmem:[%s3792_s1 + $0xa0] sm:$0xff]   ;;  %v2746_v45 = vld [vmem:[%s3792_s1 + $0xd8] sm:$0xff]  }
  0x10   :  { %2214 = vmatprep.subr.bf16.mxu0 %v2697_v8  ;;  %2675 = vmatprep.subr.bf16.mxu1 %v2697_v8  ;;  %v2732_v43 = vld [vmem:[%s3793_s0 + $0x288] ss:$36 sps:$4 sm:$0xff]   ;;  %v2737_v46 = vld [vmem:[%s3793_s0 + $0xdc] ss:$36 sps:$4 sm:$0xff]   ;;  %v2739_v47 = vld [vmem:[%s3793_s0 + $0x2d4] ss:$36 sps:$4 sm:$0xff]  }
  0x11   :  { %v2747_v48 = vld [vmem:[%s3792_s1 + $0x118] sm:$0xff]   ;;  %v2755_v50 = vld [vmem:[%s3792_s1 + $0xd0] sm:$0xff]   ;;  %v2749_v56 = vld [vmem:[%s3793_s0 + $0x124] ss:$36 sps:$4 sm:$0xff]  }
  0x12   :  { %v2748_v49 = vld [vmem:[%s3792_s1 + $0x98] sm:$0xff]   ;;  %v2756_v51 = vld [vmem:[%s3792_s1 + $0x150] sm:$0xff]   ;;  %v2764_v58 = vld [vmem:[%s3792_s1 + $0xc8] sm:$0xff]  }
  0x13   :  { %2215 = vmatpush3.bf16.msra.mxu0 %v2698_v9  ;;  %2683 = vmatpush3.bf16.msra.mxu1 %v2698_v9  ;;  %v2742_v52 = vld [vmem:[%s3793_s0 + $0xd8] ss:$36 sps:$4 sm:$0xff]   ;;  %v2757_v53 = vld [vmem:[%s3792_s1 + $0x90] sm:$0xff]   ;;  %v2765_v59 = vld [vmem:[%s3792_s1 + $0x88] sm:$0xff]  }
  0x14   :  { %2216 = vmatprep.subr.bf16.mxu0 %v2699_v10  ;;  %2676 = vmatprep.subr.bf16.mxu1 %v2699_v10  ;;  %v2758_v54 = vld [vmem:[%s3792_s1 + $0x110] sm:$0xff]   ;;  %v2751_v57 = vld [vmem:[%s3793_s0 + $0x31c] ss:$36 sps:$4 sm:$0xff]   ;;  %v2766_v60 = vld [vmem:[%s3792_s1 + $0x148] sm:$0xff]  }
  0x15   :  { %v2743_v55 = vld [vmem:[%s3793_s0 + $0x2d0] ss:$36 sps:$4 sm:$0xff]   ;;  %v135_v61 = vld [vmem:[%s3793_s0 + $0x360] sm:$0xff]  ;;  %v2767_v62 = vld [vmem:[%s3792_s1 + $0x108] sm:$0xff]  }
  0x16   :  { %v2768_v63 = vld [vmem:[%s3792_s1 + $0xc0] sm:$0xff]   ;;  %v2754_v2 = vld [vmem:[%s3793_s0 + $0x318] ss:$36 sps:$4 sm:$0xff]   ;;  %v2759_v3 = vld [vmem:[%s3793_s0 + $0x16c] ss:$36 sps:$4 sm:$0xff]   ;;  %v2126_v4 = vcombine.high %v135_v61, %v135_v61  ;;  %v2125_v9 = vcombine.low %v135_v61, %v135_v61 }
  0x17   :  { %2217 = vmatpush3.bf16.msra.mxu0 %v2700_v13  ;;  %2684 = vmatpush3.bf16.msra.mxu1 %v2700_v13  ;;  %v2769_v0 = vld [vmem:[%s3792_s1 + $0x80] sm:$0xff]   ;;  %v2778_v7 = vld [vmem:[%s3792_s1 + $0x1f8] sm:$0xff]   ;;  %v2762_v8 = vld [vmem:[%s3793_s0 + $0x168] ss:$36 sps:$4 sm:$0xff]  }
  0x18   :  { %2218 = vmatprep.subr.bf16.mxu0 %v2701_v14  ;;  %2677 = vmatprep.subr.bf16.mxu1 %v2701_v14  ;;  %v2753_v1 = vld [vmem:[%s3793_s0 + $0x120] ss:$36 sps:$4 sm:$0xff]   ;;  %v2770_v10 = vld [vmem:[%s3793_s0 + $0x1b4] ss:$36 sps:$4 sm:$0xff]   ;;  %v2774_v12 = vld [vmem:[%s3793_s0 + $0xc] ss:$36 sps:$4 sm:$0xff]  }
  0x19   :  { %v2776_v5 = vld [vmem:[%s3792_s1 + $0x140] sm:$0xff]   ;;  %v2772_v13 = vld [vmem:[%s3793_s0 + $0x8] ss:$36 sps:$4 sm:$0xff]   ;;  %v2775_v14 = vld [vmem:[%s3793_s0 + $0x1b0] ss:$36 sps:$4 sm:$0xff]  }
  0x1a   :  { %v2777_v6 = vld [vmem:[%s3792_s1 + $0x100] sm:$0xff]   ;;  %v2824_v61 = vld [vmem:[%s3793_s0 + $0x178] ss:$36 sps:$4 sm:$0xff]  }
  0x1b   :  { %2219 = vmatpush3.bf16.msra.mxu0 %v2702_v15  ;;  %2685 = vmatpush3.bf16.msra.mxu1 %v2702_v15  ;;  %v2779_v15 = vld [vmem:[%s3792_s1 + $0x1b8] sm:$0xff]  }
  0x1c   :  { %2220 = vmatprep.subr.bf16.mxu0 %v2703_v16  ;;  %2678 = vmatprep.subr.bf16.mxu1 %v2703_v16  ;;  %v2780_v16 = vld [vmem:[%s3793_s0 + $0x54] ss:$36 sps:$4 sm:$0xff]  }
  0x1f   :  { %2221 = vmatpush3.bf16.msra.mxu0 %v2704_v17  ;;  %2686 = vmatpush3.bf16.msra.mxu1 %v2704_v17  ;;  %v2784_v17 = vld [vmem:[%s3793_s0 + $0x14] ss:$36 sps:$4 sm:$0xff]  }
  0x20   :  { %2394 = vmatprep.subr.bf16.mxu0 %v2711_v18  ;;  %2300 = vmatprep.subr.bf16.mxu1 %v2713_v21  ;;  %v2793_v18 = vld [vmem:[%s3792_s1 + $0x1f0] sm:$0xff]  }
  0x21   :  { %v2782_v21 = vld [vmem:[%s3793_s0 + $0x10] ss:$36 sps:$4 sm:$0xff]  }
  0x22   :  { %1340 = vmatmul.mubr.bf16.vlgmr.msra.gmra.mxu0 %v2705_v19  ;;  %1396 = vmatmul.mubr.bf16.vlgmr.msra.gmra.mxu1 %v2708_v20  ;;  %v2794_v19 = vld [vmem:[%s3792_s1 + $0x1b0] sm:$0xff]   ;;  %v2806_v20 = vld [vmem:[%s3792_s1 + $0x1e8] sm:$0xff]  }
  0x23   :  { %2395 = vmatpush3.bf16.msra.mxu0 %v2712_v22  ;;  %2301 = vmatpush3.bf16.msra.mxu1 %v2714_v23  ;;  %v2785_v22 = vld [vmem:[%s3793_s0 + $0x50] ss:$36 sps:$4 sm:$0xff]   ;;  %v2786_v23 = vld [vmem:[%s3792_s1 + $0x238] sm:$0xff]  }
  0x24   :  { %1347 = vmatprep.mubr.bf16.mxu0 %v2715_v24  ;;  %1403 = vmatprep.mubr.bf16.mxu1 %v2717_v25  ;;  %v2787_v24 = vld [vmem:[%s3793_s0 + $0x9c] ss:$36 sps:$4 sm:$0xff]  }
  0x25   :  { %2396 = vmatprep.subr.bf16.mxu0 %v2719_v26  ;;  %2302 = vmatprep.subr.bf16.mxu1 %v2723_v28  ;;  %v2789_v25 = vld [vmem:[%s3793_s0 + $0x5c] ss:$36 sps:$4 sm:$0xff]   ;;  %v2809_v26 = vld [vmem:[%s3792_s1 + $0x1a8] sm:$0xff]   ;;  %v2795_v28 = vld [vmem:[%s3792_s1 + $0x230] sm:$0xff]  }
  0x27   :  { %2397 = vmatpush3.bf16.msra.mxu0 %v2722_v27  ;;  %2303 = vmatpush3.bf16.msra.mxu1 %v2724_v29  ;;  %v2817_v27 = vld [vmem:[%s3792_s1 + $0x1e0] sm:$0xff]   ;;  %v2791_v29 = vld [vmem:[%s3793_s0 + $0x98] ss:$36 sps:$4 sm:$0xff]  }
  0x28   :  { %2398 = vmatprep.subr.bf16.mxu0 %v2725_v30  ;;  %2304 = vmatprep.subr.bf16.mxu1 %v2733_v33  ;;  %v2818_v30 = vld [vmem:[%s3792_s1 + $0x1a0] sm:$0xff]  }
  0x29   :  { %v2798_v33 = vld [vmem:[%s3793_s0 + $0xa4] ss:$36 sps:$4 sm:$0xff]  }
  0x2a   :  { %1348 = vmatmul.mubr.bf16.gmra.mxu0 %v2720_v31  ;;  %1404 = vmatmul.mubr.bf16.gmra.mxu1 %v2721_v32  ;;  %v2792_v31 = vld [vmem:[%s3793_s0 + $0x58] ss:$36 sps:$4 sm:$0xff]   ;;  %v2796_v32 = vld [vmem:[%s3793_s0 + $0xe4] ss:$36 sps:$4 sm:$0xff]  }
  0x2b   :  { %1355 = vmatprep.mubr.bf16.mxu0 %v2726_v34  ;;  %1411 = vmatprep.mubr.bf16.mxu1 %v2728_v35  ;;  %v2810_v34 = vld [vmem:[%s3792_s1 + $0x228] sm:$0xff]   ;;  %v2832_v35 = vld [vmem:[%s3792_s1 + $0x1d8] sm:$0xff]  }
  0x2c   :  { %2399 = vmatpush3.bf16.msra.mxu0 %v2730_v36  ;;  %2305 = vmatpush3.bf16.msra.mxu1 %v2734_v37  ;;  %v2833_v36 = vld [vmem:[%s3792_s1 + $0x198] sm:$0xff]   ;;  %v2825_v37 = vld [vmem:[%s3792_s1 + $0x220] sm:$0xff]  }
  0x2d   :  { %2400 = vmatprep.subr.bf16.mxu0 %v2735_v38  ;;  %2306 = vmatprep.subr.bf16.mxu1 %v2741_v39  ;;  %v2800_v38 = vld [vmem:[%s3793_s0 + $0xe0] ss:$36 sps:$4 sm:$0xff]  }
  0x2e   :  { %v2801_v39 = vld [vmem:[%s3793_s0 + $0xa0] ss:$36 sps:$4 sm:$0xff]  }
  0x30   :  { %2401 = vmatpush3.bf16.msra.mxu0 %v2736_v40  ;;  %2307 = vmatpush3.bf16.msra.mxu1 %v2744_v41  ;;  %v2802_v40 = vld [vmem:[%s3793_s0 + $0x12c] ss:$36 sps:$4 sm:$0xff]  }
  0x31   :  { %2402 = vmatprep.subr.bf16.mxu0 %v2745_v44  ;;  %2308 = vmatprep.subr.bf16.mxu1 %v2746_v45  ;;  %v2841_v41 = vld [vmem:[%s3792_s1 + $0x1d0] sm:$0xff]   ;;  %v2807_v45 = vld [vmem:[%s3793_s0 + $0x128] ss:$36 sps:$4 sm:$0xff]  }
  0x32   :  { %1356 = vmatmul.mubr.bf16.gmra.mxu0 %v2731_v42  ;;  %1412 = vmatmul.mubr.bf16.gmra.mxu1 %v2732_v43  ;;  %v2804_v42 = vld [vmem:[%s3793_s0 + $0xec] ss:$36 sps:$4 sm:$0xff]   ;;  %v2834_v43 = vld [vmem:[%s3792_s1 + $0x218] sm:$0xff]  }
  0x33   :  { %1363 = vmatprep.mubr.bf16.mxu0 %v2737_v46  ;;  %1419 = vmatprep.mubr.bf16.mxu1 %v2739_v47  ;;  %v2846_v44 = vld [vmem:[%s3792_s1 + $0x190] sm:$0xff]   ;;  %v2808_v47 = vld [vmem:[%s3793_s0 + $0xe8] ss:$36 sps:$4 sm:$0xff]  }
  0x34   :  { %2403 = vmatpush3.bf16.msra.mxu0 %v2747_v48  ;;  %2309 = vmatpush3.bf16.msra.mxu1 %v2748_v49  ;;  %v2849_v46 = vld [vmem:[%s3792_s1 + $0x210] sm:$0xff]  }
  0x35   :  { %2310 = vmatprep.subr.bf16.mxu1 %v2755_v50  ;;  %2404 = vmatprep.subr.bf16.mxu0 %v2756_v51  ;;  %v2811_v48 = vld [vmem:[%s3793_s0 + $0x174] ss:$36 sps:$4 sm:$0xff]   ;;  %v2856_v50 = vld [vmem:[%s3792_s1 + $0x1c8] sm:$0xff]  }
  0x36   :  { %v2813_v49 = vld [vmem:[%s3793_s0 + $0x134] ss:$36 sps:$4 sm:$0xff]   ;;  %v2857_v51 = vld [vmem:[%s3792_s1 + $0x188] sm:$0xff]  }
  0x38   :  { %2311 = vmatpush3.bf16.msra.mxu1 %v2757_v53  ;;  %2405 = vmatpush3.bf16.msra.mxu0 %v2758_v54  ;;  %v2815_v53 = vld [vmem:[%s3793_s0 + $0x170] ss:$36 sps:$4 sm:$0xff]  }
  0x39   :  { %2312 = vmatprep.subr.bf16.mxu1 %v2764_v58  ;;  %2406 = vmatprep.subr.bf16.mxu0 %v2766_v60  ;;  %v2816_v54 = vld [vmem:[%s3793_s0 + $0x130] ss:$36 sps:$4 sm:$0xff]   ;;  %v2871_v58 = vld [vmem:[%s3792_s1 + $0x180] sm:$0xff]   ;;  %v2823_v60 = vld [vmem:[%s3793_s0 + $0x1b8] ss:$36 sps:$4 sm:$0xff]  }
  0x3a   :  { %1364 = vmatmul.mubr.bf16.gmra.mxu0 %v2742_v52  ;;  %1420 = vmatmul.mubr.bf16.gmra.mxu1 %v2743_v55  ;;  %v2862_v52 = vld [vmem:[%s3792_s1 + $0x208] sm:$0xff]   ;;  %v2819_v55 = vld [vmem:[%s3793_s0 + $0x1bc] ss:$36 sps:$4 sm:$0xff]  }
  0x3b   :  { %1371 = vmatprep.mubr.bf16.mxu0 %v2749_v56  ;;  %1427 = vmatprep.mubr.bf16.mxu1 %v2751_v57  ;;  %v2821_v56 = vld [vmem:[%s3793_s0 + $0x17c] ss:$36 sps:$4 sm:$0xff]  }
  0x3c   :  { %2313 = vmatpush3.bf16.msra.mxu1 %v2765_v59  ;;  %2407 = vmatpush3.bf16.msra.mxu0 %v2767_v62  ;;  %v2870_v57 = vld [vmem:[%s3792_s1 + $0x1c0] sm:$0xff]  }
  0x3d   :  { %2314 = vmatprep.subr.bf16.mxu1 %v2768_v63  ;;  %2408 = vmatprep.subr.bf16.mxu0 %v2776_v5  ;;  %v2872_v59 = vld [vmem:[%s3792_s1 + $0x200] sm:$0xff]   ;;  %v2840_v5 = vld [vmem:[%s3793_s0 + $0x208] ss:$36 sps:$4 sm:$0xff]  }
  0x3e   :  { %v2826_v62 = vld [vmem:[%s3793_s0 + $0x204] ss:$36 sps:$4 sm:$0xff]  }
  0x3f   :  { %v2828_v63 = vld [vmem:[%s3793_s0 + $0x1c4] ss:$36 sps:$4 sm:$0xff]  }
  0x40   :  { %2315 = vmatpush3.bf16.msra.mxu1 %v2769_v0  ;;  %2409 = vmatpush3.bf16.msra.mxu0 %v2777_v6  ;;  %v2830_v0 = vld [vmem:[%s3793_s0 + $0x200] ss:$36 sps:$4 sm:$0xff]   ;;  %v2842_v6 = vld [vmem:[%s3793_s0 + $0x294] ss:$36 sps:$4 sm:$0xff]  }
  0x41   :  { %2488 = vmatprep.subr.bf16.mxu1 %v2778_v7  ;;  %2603 = vmatprep.subr.bf16.mxu0 %v2926_v11  ;;  %v2844_v7 = vld [vmem:[%s3793_s0 + $0x254] ss:$36 sps:$4 sm:$0xff]  }
  0x42   :  { %1372 = vmatmul.mubr.bf16.gmra.mxu0 %v2753_v1  ;;  %1428 = vmatmul.mubr.bf16.gmra.mxu1 %v2754_v2  ;;  %v2831_v1 = vld [vmem:[%s3793_s0 + $0x1c0] ss:$36 sps:$4 sm:$0xff]   ;;  %v2835_v2 = vld [vmem:[%s3793_s0 + $0x24c] ss:$36 sps:$4 sm:$0xff]  }
  0x43   :  { %1379 = vmatprep.mubr.bf16.mxu0 %v2759_v3  ;;  %1435 = vmatprep.mubr.bf16.mxu1 %v2126_v4  ;;  %v2837_v3 = vld [vmem:[%s3793_s0 + $0x20c] ss:$36 sps:$4 sm:$0xff]  }
  0x44   :  { %v2839_v4 = vld [vmem:[%s3793_s0 + $0x248] ss:$36 sps:$4 sm:$0xff]  }
  0x4a   :  { %1380 = vmatmul.mubr.bf16.gmra.mxu0 %v2762_v8  ;;  %1436 = vmatmul.mubr.bf16.gmra.mxu1 %v2125_v9  ;;  %v2847_v8 = vld [vmem:[%s3793_s0 + $0x290] ss:$36 sps:$4 sm:$0xff]  }
  0x4b   :  { %1387 = vmatprep.mubr.bf16.mxu0 %v2770_v10  ;;  %1475 = vmatprep.mubr.bf16.mxu1 %v2774_v12  ;;  %v2848_v9 = vld [vmem:[%s3793_s0 + $0x250] ss:$36 sps:$4 sm:$0xff]   ;;  %v2850_v10 = vld [vmem:[%s3793_s0 + $0x2dc] ss:$36 sps:$4 sm:$0xff]  }
  0x4c   :  { %v2852_v12 = vld [vmem:[%s3793_s0 + $0x29c] ss:$36 sps:$4 sm:$0xff]  }
  0x52   :  { %1388 = vmatmul.mubr.bf16.gmra.mxu0 %v2775_v14  ;;  %1476 = vmatmul.mubr.bf16.vlgmr.msra.gmra.mxu1 %v2772_v13  ;;  %v2854_v13 = vld [vmem:[%s3793_s0 + $0x2d8] ss:$36 sps:$4 sm:$0xff]  }
  0x53   :  { %2489 = vmatpush3.bf16.msra.mxu1 %v2779_v15  ;;  %1483 = vmatprep.mubr.bf16.mxu1 %v2780_v16  ;;  %v2855_v14 = vld [vmem:[%s3793_s0 + $0x298] ss:$36 sps:$4 sm:$0xff]   ;;  %v2858_v15 = vld [vmem:[%s3793_s0 + $0x324] ss:$36 sps:$4 sm:$0xff]  }
  0x54   :  { %1611 = vmatprep.mubr.bf16.mxu0 %v2784_v17  ;;  %2490 = vmatprep.subr.bf16.mxu1 %v2793_v18  ;;  %v2860_v16 = vld [vmem:[%s3793_s0 + $0x2e4] ss:$36 sps:$4 sm:$0xff]  }
  0x55   :  { %v136_v17 = vld [vmem:[%s3793_s0 + $0x368] sm:$0xff]  ;;  %v2863_v18 = vld [vmem:[%s3793_s0 + $0x320] ss:$36 sps:$4 sm:$0xff]  }
  0x57   :  { %2491 = vmatpush3.bf16.msra.mxu1 %v2794_v19  ;;  %v2864_v19 = vld [vmem:[%s3793_s0 + $0x2e0] ss:$36 sps:$4 sm:$0xff]  }
  0x58   :  { %2492 = vmatprep.subr.bf16.mxu1 %v2806_v20  ;;  %v2128_v20 = vcombine.high %v136_v17, %v136_v17 }
  0x5a   :  { %1484 = vmatmul.mubr.bf16.gmra.mxu1 %v2785_v22  ;;  %1612 = vmatmul.mubr.bf16.vlgmr.msra.gmra.mxu0 %v2782_v21  ;;  %v2866_v21 = vld [vmem:[%s3793_s0 + $0x32c] ss:$36 sps:$4 sm:$0xff]  }
  0x5b   :  { %2604 = vmatpush3.bf16.msra.mxu0 %v2786_v23  ;;  %1491 = vmatprep.mubr.bf16.mxu1 %v2787_v24  ;;  %v137_v22 = vld [vmem:[%s3793_s0 + $0x370] sm:$0xff]  ;;  %v2127_v23 = vcombine.low %v136_v17, %v136_v17  ;;  %v2869_v24 = vld [vmem:[%s3793_s0 + $0x328] ss:$36 sps:$4 sm:$0xff]  }
  0x5c   :  { %1619 = vmatprep.mubr.bf16.mxu0 %v2789_v25  ;;  %2605 = vmatprep.subr.bf16.mxu0 %v2926_v11  ;;  %v2130_v25 = vcombine.high %v137_v22, %v137_v22 }
  0x5d   :  { %2493 = vmatpush3.bf16.msra.mxu1 %v2809_v26  ;;  %v2876_v26 = vld [vmem:[%s3793_s0 + $0x1c] ss:$36 sps:$4 sm:$0xff]  }
  0x5e   :  { %2494 = vmatprep.subr.bf16.mxu1 %v2817_v27  ;;  %v2874_v27 = vld [vmem:[%s3793_s0 + $0x18] ss:$36 sps:$4 sm:$0xff]  }
  0x5f   :  { %2606 = vmatpush3.bf16.msra.mxu0 %v2795_v28  ;;  %v2129_v28 = vcombine.low %v137_v22, %v137_v22 }
  0x60   :  { %2607 = vmatprep.subr.bf16.mxu0 %v2926_v11 }
  0x61   :  { %2495 = vmatpush3.bf16.msra.mxu1 %v2818_v30  ;;  %v2880_v30 = vld [vmem:[%s3793_s0 + $0x60] ss:$36 sps:$4 sm:$0xff]  }
  0x62   :  { %1492 = vmatmul.mubr.bf16.gmra.mxu1 %v2791_v29  ;;  %1620 = vmatmul.mubr.bf16.gmra.mxu0 %v2792_v31  ;;  %v2878_v29 = vld [vmem:[%s3793_s0 + $0x64] ss:$36 sps:$4 sm:$0xff]  }
  0x63   :  { %1499 = vmatprep.mubr.bf16.mxu1 %v2796_v32  ;;  %1627 = vmatprep.mubr.bf16.mxu0 %v2798_v33  ;;  %v2881_v31 = vld [vmem:[%s3793_s0 + $0x20] ss:$36 sps:$4 sm:$0xff]   ;;  %v2882_v32 = vld [vmem:[%s3793_s0 + $0xac] ss:$36 sps:$4 sm:$0xff]  }
  0x64   :  { %2608 = vmatpush3.bf16.msra.mxu0 %v2810_v34  ;;  %2496 = vmatprep.subr.bf16.mxu1 %v2832_v35  ;;  %v2884_v33 = vld [vmem:[%s3793_s0 + $0xa8] ss:$36 sps:$4 sm:$0xff]   ;;  %v2886_v35 = vld [vmem:[%s3793_s0 + $0xf4] ss:$36 sps:$4 sm:$0xff]  }
  0x65   :  { %2609 = vmatprep.subr.bf16.mxu0 %v2926_v11  ;;  %2497 = vmatpush3.bf16.msra.mxu1 %v2833_v36  ;;  %v2885_v34 = vld [vmem:[%s3793_s0 + $0x68] ss:$36 sps:$4 sm:$0xff]   ;;  %v2888_v36 = vld [vmem:[%s3793_s0 + $0xf0] ss:$36 sps:$4 sm:$0xff]  }
  0x66   :  { %2498 = vmatprep.subr.bf16.mxu1 %v2841_v41  ;;  %v2894_v41 = vld [vmem:[%s3793_s0 + $0x184] ss:$36 sps:$4 sm:$0xff]  }
  0x68   :  { %2610 = vmatpush3.bf16.msra.mxu0 %v2825_v37  ;;  %v2889_v37 = vld [vmem:[%s3793_s0 + $0xb0] ss:$36 sps:$4 sm:$0xff]  }
  0x69   :  { %2611 = vmatprep.subr.bf16.mxu0 %v2926_v11  ;;  %2499 = vmatpush3.bf16.msra.mxu1 %v2846_v44  ;;  %v2898_v44 = vld [vmem:[%s3793_s0 + $0x1cc] ss:$36 sps:$4 sm:$0xff]  }
  0x6a   :  { %1500 = vmatmul.mubr.bf16.gmra.mxu1 %v2800_v38  ;;  %1628 = vmatmul.mubr.bf16.gmra.mxu0 %v2801_v39  ;;  %v2890_v38 = vld [vmem:[%s3793_s0 + $0x13c] ss:$36 sps:$4 sm:$0xff]  }
  0x6b   :  { %1507 = vmatprep.mubr.bf16.mxu1 %v2802_v40  ;;  %1635 = vmatprep.mubr.bf16.mxu0 %v2804_v42  ;;  %v2892_v39 = vld [vmem:[%s3793_s0 + $0x138] ss:$36 sps:$4 sm:$0xff]   ;;  %v2896_v42 = vld [vmem:[%s3793_s0 + $0x180] ss:$36 sps:$4 sm:$0xff]  }
  0x6c   :  { %2612 = vmatpush3.bf16.msra.mxu0 %v2834_v43  ;;  %2500 = vmatprep.subr.bf16.mxu1 %v2856_v50  ;;  %v2893_v40 = vld [vmem:[%s3793_s0 + $0xf8] ss:$36 sps:$4 sm:$0xff]   ;;  %v2897_v43 = vld [vmem:[%s3793_s0 + $0x140] ss:$36 sps:$4 sm:$0xff]  }
  0x6d   :  { %2613 = vmatprep.subr.bf16.mxu0 %v2926_v11  ;;  %2501 = vmatpush3.bf16.msra.mxu1 %v2857_v51 }
  0x6e   :  { %2502 = vmatprep.subr.bf16.mxu1 %v2870_v57 }
  0x70   :  { %2614 = vmatpush3.bf16.msra.mxu0 %v2849_v46 }
  0x71   :  { %2615 = vmatprep.subr.bf16.mxu0 %v2926_v11  ;;  %2503 = vmatpush3.bf16.msra.mxu1 %v2871_v58 }
  0x72   :  { %1508 = vmatmul.mubr.bf16.gmra.mxu1 %v2807_v45  ;;  %1636 = vmatmul.mubr.bf16.gmra.mxu0 %v2808_v47 }
  0x73   :  { %1515 = vmatprep.mubr.bf16.mxu1 %v2811_v48  ;;  %1643 = vmatprep.mubr.bf16.mxu0 %v2813_v49 }
  0x74   :  { %2616 = vmatpush3.bf16.msra.mxu0 %v2862_v52 }
  0x75   :  { %2617 = vmatprep.subr.bf16.mxu0 %v2926_v11 }
  0x78   :  { %2618 = vmatpush3.bf16.msra.mxu0 %v2872_v59 }
  0x7a   :  { %1516 = vmatmul.mubr.bf16.gmra.mxu1 %v2815_v53  ;;  %1644 = vmatmul.mubr.bf16.gmra.mxu0 %v2816_v54  ;;  %v2900_v53 = vld [vmem:[%s3793_s0 + $0x1c8] ss:$36 sps:$4 sm:$0xff]  }
  0x7b   :  { %1523 = vmatprep.mubr.bf16.mxu1 %v2819_v55  ;;  %1651 = vmatprep.mubr.bf16.mxu0 %v2821_v56  ;;  %v2901_v54 = vld [vmem:[%s3793_s0 + $0x188] ss:$36 sps:$4 sm:$0xff]   ;;  %v2902_v55 = vld [vmem:[%s3793_s0 + $0x214] ss:$36 sps:$4 sm:$0xff]  }
  0x82   :  { %1524 = vmatmul.mubr.bf16.gmra.mxu1 %v2823_v60  ;;  %1652 = vmatmul.mubr.bf16.gmra.mxu0 %v2824_v61 }
  0x83   :  { %1531 = vmatprep.mubr.bf16.mxu1 %v2826_v62  ;;  %1659 = vmatprep.mubr.bf16.mxu0 %v2828_v63 }
  0x8a   :  { %1532 = vmatmul.mubr.bf16.gmra.mxu1 %v2830_v0  ;;  %1660 = vmatmul.mubr.bf16.gmra.mxu0 %v2831_v1 }
  0x8b   :  { %1539 = vmatprep.mubr.bf16.mxu1 %v2835_v2  ;;  %1667 = vmatprep.mubr.bf16.mxu0 %v2837_v3  ;;  %v3487_v2 = vld [vmem:[%s3794_s2] ss:$0 sm:$0xff] }
  0x92   :  { %1540 = vmatmul.mubr.bf16.gmra.mxu1 %v2839_v4  ;;  %1668 = vmatmul.mubr.bf16.gmra.mxu0 %v2840_v5  ;;  %v2904_v5 = vld [vmem:[%s3793_s0 + $0x210] ss:$36 sps:$4 sm:$0xff]  }
  0x93   :  { %1547 = vmatprep.mubr.bf16.mxu1 %v2842_v6  ;;  %1675 = vmatprep.mubr.bf16.mxu0 %v2844_v7  ;;  %v2905_v6 = vld [vmem:[%s3793_s0 + $0x1d0] ss:$36 sps:$4 sm:$0xff]  }
  0x9a   :  { %1548 = vmatmul.mubr.bf16.gmra.mxu1 %v2847_v8  ;;  %1676 = vmatmul.mubr.bf16.gmra.mxu0 %v2848_v9  ;;  %v2906_v8 = vld [vmem:[%s3793_s0 + $0x25c] ss:$36 sps:$4 sm:$0xff]  }
  0x9b   :  { %1555 = vmatprep.mubr.bf16.mxu1 %v2850_v10  ;;  %1683 = vmatprep.mubr.bf16.mxu0 %v2852_v12 }
  0xa2   :  { %1556 = vmatmul.mubr.bf16.gmra.mxu1 %v2854_v13  ;;  %1684 = vmatmul.mubr.bf16.gmra.mxu0 %v2855_v14 }
  0xa3   :  { %1563 = vmatprep.mubr.bf16.mxu1 %v2858_v15  ;;  %1691 = vmatprep.mubr.bf16.mxu0 %v2860_v16 }
  0xaa   :  { %1564 = vmatmul.mubr.bf16.gmra.mxu1 %v2863_v18  ;;  %1692 = vmatmul.mubr.bf16.gmra.mxu0 %v2864_v19 }
  0xab   :  { %1571 = vmatprep.mubr.bf16.mxu1 %v2128_v20  ;;  %1699 = vmatprep.mubr.bf16.mxu0 %v2866_v21 }
  0xb2   :  { %1572 = vmatmul.mubr.bf16.gmra.mxu1 %v2127_v23  ;;  %1700 = vmatmul.mubr.bf16.gmra.mxu0 %v2869_v24  ;;  %v2908_v23 = vld [vmem:[%s3793_s0 + $0x258] ss:$36 sps:$4 sm:$0xff]  }
  0xb3   :  { %1707 = vmatprep.mubr.bf16.mxu0 %v2130_v25  ;;  %1747 = vmatprep.mubr.bf16.mxu1 %v2876_v26  ;;  %v2909_v24 = vld [vmem:[%s3793_s0 + $0x218] ss:$36 sps:$4 sm:$0xff]   ;;  %v2912_v26 = vld [vmem:[%s3793_s0 + $0x2a4] ss:$36 sps:$4 sm:$0xff]  }
  0xba   :  { %1708 = vmatmul.mubr.bf16.gmra.mxu0 %v2129_v28  ;;  %1748 = vmatmul.mubr.bf16.vlgmr.msra.gmra.mxu1 %v2874_v27 }
  0xbb   :  { %1755 = vmatprep.mubr.bf16.mxu1 %v2878_v29  ;;  %2619 = vmatprep.mubr.msk.bf16.mxu0 %vm2927_vm0, %v2926_v11 }
  0xc2   :  { %1756 = vmatmul.mubr.bf16.gmra.mxu1 %v2880_v30  ;;  %2620 = vmatmul.mubr.bf16.vlgmr.msra.gmra.mxu0 %v2881_v31 }
  0xc3   :  { %1763 = vmatprep.mubr.bf16.mxu1 %v2882_v32  ;;  %2623 = vmatprep.mubr.msk.bf16.mxu0 %vm2927_vm0, %v2926_v11 }
  0xca   :  { %1764 = vmatmul.mubr.bf16.gmra.mxu1 %v2884_v33  ;;  %2624 = vmatmul.mubr.bf16.gmra.mxu0 %v2885_v34 }
  0xcb   :  { %1771 = vmatprep.mubr.bf16.mxu1 %v2886_v35  ;;  %2627 = vmatprep.mubr.msk.bf16.mxu0 %vm2927_vm0, %v2926_v11 }
  0xd2   :  { %1772 = vmatmul.mubr.bf16.gmra.mxu1 %v2888_v36  ;;  %2628 = vmatmul.mubr.bf16.gmra.mxu0 %v2889_v37 }
  0xd3   :  { %1779 = vmatprep.mubr.bf16.mxu1 %v2890_v38  ;;  %2631 = vmatprep.mubr.msk.bf16.mxu0 %vm2927_vm0, %v2926_v11 }
  0xda   :  { %1780 = vmatmul.mubr.bf16.gmra.mxu1 %v2892_v39  ;;  %2632 = vmatmul.mubr.bf16.gmra.mxu0 %v2893_v40  ;;  %v2910_v40 = vld [vmem:[%s3793_s0 + $0x2a0] ss:$36 sps:$4 sm:$0xff]  }
  0xdb   :  { %1787 = vmatprep.mubr.bf16.mxu1 %v2894_v41  ;;  %2635 = vmatprep.mubr.msk.bf16.mxu0 %vm2927_vm0, %v2926_v11  ;;  %v2913_v41 = vld [vmem:[%s3793_s0 + $0x260] ss:$36 sps:$4 sm:$0xff]  }
  0xe2   :  { %v2222_v45 = vpop.f32.mrf.mxu0  ;;  %v2264_v46 = vpop.f32.mrf.mxu1  ;;  %1788 = vmatmul.mubr.bf16.gmra.mxu1 %v2896_v42  ;;  %2636 = vmatmul.mubr.bf16.gmra.mxu0 %v2897_v43  ;;  %v2916_v43 = vld [vmem:[%s3793_s0 + $0x2ec] ss:$36 sps:$4 sm:$0xff]  }
  0xe3   :  { %1795 = vmatprep.mubr.bf16.mxu1 %v2898_v44  ;;  %2639 = vmatprep.mubr.msk.bf16.mxu0 %vm2927_vm0, %v2926_v11 }
  0xe4   :  { %v2223_v47 = vpop.f32.mrf.mxu0  ;;  %v2265_v48 = vpop.f32.mrf.mxu1 }
  0xe5   :  { %v3463_v49 = vadd.f32 %v2223_v47, %v2222_v45  ;;  %v3465_v50 = vadd.f32 %v2265_v48, %v2264_v46 }
  0xe6   :  { %v2225_v51 = vpop.f32.mrf.mxu0  ;;  %v2267_v52 = vpop.f32.mrf.mxu1 }
  0xe8   :  { %v2226_v56 = vpop.f32.mrf.mxu0  ;;  %v2268_v57 = vpop.f32.mrf.mxu1 }
  0xe9   :  { %v3476_v58 = vadd.f32 %v2226_v56, %v2225_v51  ;;  %v3478_v59 = vadd.f32 %v2268_v57, %v2267_v52 }
  0xea   :  { %v2228_v60 = vpop.f32.mrf.mxu0  ;;  %v2270_v61 = vpop.f32.mrf.mxu1  ;;  %1796 = vmatmul.mubr.bf16.gmra.mxu1 %v2900_v53  ;;  %2640 = vmatmul.mubr.bf16.gmra.mxu0 %v2901_v54 }
  0xeb   :  { %1803 = vmatprep.mubr.bf16.mxu1 %v2902_v55  ;;  %2643 = vmatprep.mubr.msk.bf16.mxu0 %vm2927_vm0, %v2926_v11 }
  0xec   :  { %v2229_v62 = vpop.f32.mrf.mxu0  ;;  %v2271_v63 = vpop.f32.mrf.mxu1 }
  0xed   :  { %v3482_v0 = vadd.f32 %v2229_v62, %v2228_v60  ;;  %v2272_v1 = vadd.f32 %v2271_v63, %v2270_v61  ;;  %v2914_v61 = vld [vmem:[%s3793_s0 + $0x2e8] ss:$36 sps:$4 sm:$0xff]  }
  0xee   :  { %v2231_v3 = vpop.f32.mrf.mxu0  ;;  %v2273_v4 = vpop.f32.mrf.mxu1  ;;  %v2917_v62 = vld [vmem:[%s3793_s0 + $0x2a8] ss:$36 sps:$4 sm:$0xff]  }
  0xef   :  { %v3496_v7 = vadd.f32 %v2272_v1, %v3487_v2  ;;  %v2920_v1 = vld [vmem:[%s3793_s0 + $0x334] ss:$36 sps:$4 sm:$0xff]  }
  0xf0   :  { %v2232_v9 = vpop.f32.mrf.mxu0  ;;  %v2274_v10 = vpop.f32.mrf.mxu1 }
  0xf1   :  { %v3501_v12 = vadd.f32 %v2232_v9, %v2231_v3  ;;  %v2275_v13 = vadd.f32 %v2274_v10, %v2273_v4 }
  0xf2   :  { %v2234_v14 = vpop.f32.mrf.mxu0  ;;  %v2276_v15 = vpop.f32.mrf.mxu1  ;;  %1804 = vmatmul.mubr.bf16.gmra.mxu1 %v2904_v5  ;;  %2644 = vmatmul.mubr.bf16.gmra.mxu0 %v2905_v6 }
  0xf3   :  { %v3504_v16 = vadd.f32 %v2275_v13, %v3487_v2  ;;  %1811 = vmatprep.mubr.bf16.mxu1 %v2906_v8  ;;  %2647 = vmatprep.mubr.msk.bf16.mxu0 %vm2927_vm0, %v2926_v11 }
  0xf4   :  { %v2235_v17 = vpop.f32.mrf.mxu0  ;;  %v2277_v18 = vpop.f32.mrf.mxu1 }
  0xf5   :  { %v3508_v19 = vadd.f32 %v2235_v17, %v2234_v14  ;;  %v2278_v20 = vadd.f32 %v2277_v18, %v2276_v15  ;;  %v138_v15 = vld [vmem:[%s3793_s0 + $0x378] sm:$0xff] }
  0xf6   :  { %v2237_v21 = vpop.f32.mrf.mxu0  ;;  %v2279_v22 = vpop.f32.mrf.mxu1 }
  0xf7   :  { %v3517_v25 = vadd.f32 %v2278_v20, %v3487_v2 }
  0xf8   :  { %v2238_v27 = vpop.f32.mrf.mxu0  ;;  %v2280_v28 = vpop.f32.mrf.mxu1 }
  0xf9   :  { %v3522_v29 = vadd.f32 %v2238_v27, %v2237_v21  ;;  %v2281_v30 = vadd.f32 %v2280_v28, %v2279_v22  ;;  %v2918_v22 = vld [vmem:[%s3793_s0 + $0x330] ss:$36 sps:$4 sm:$0xff]  }
  0xfa   :  { %v2240_v31 = vpop.f32.mrf.mxu0  ;;  %v2282_v32 = vpop.f32.mrf.mxu1  ;;  %1812 = vmatmul.mubr.bf16.gmra.mxu1 %v2908_v23  ;;  %2648 = vmatmul.mubr.bf16.gmra.mxu0 %v2909_v24  ;;  %v2921_v23 = vld [vmem:[%s3793_s0 + $0x2f0] ss:$36 sps:$4 sm:$0xff]  }
  0xfb   :  { %v3525_v33 = vadd.f32 %v2281_v30, %v3487_v2  ;;  %1819 = vmatprep.mubr.bf16.mxu1 %v2912_v26  ;;  %2651 = vmatprep.mubr.msk.bf16.mxu0 %vm2927_vm0, %v2926_v11  ;;  %v2132_v26 = vcombine.high %v138_v15, %v138_v15 }
  0xfc   :  { %v2241_v34 = vpop.f32.mrf.mxu0  ;;  %v2283_v35 = vpop.f32.mrf.mxu1 }
  0xfd   :  { %v3529_v36 = vadd.f32 %v2241_v34, %v2240_v31  ;;  %v2284_v37 = vadd.f32 %v2283_v35, %v2282_v32 }
  0xfe   :  { %v2243_v38 = vpop.f32.mrf.mxu0  ;;  %v2285_v39 = vpop.f32.mrf.mxu1 }
  0xff   :  { %v3538_v42 = vadd.f32 %v2284_v37, %v3487_v2  ;;  %v1342_v37 = vadd.f32 %v3463_v49, %v3487_v2 }
 0x100   :  { %v2244_v44 = vpop.f32.mrf.mxu0  ;;  %v2286_v45 = vpop.f32.mrf.mxu1 }
 0x101   :  { %v3543_v46 = vadd.f32 %v2244_v44, %v2243_v38  ;;  %v2287_v47 = vadd.f32 %v2286_v45, %v2285_v39  ;;  %v2924_v44 = vld [vmem:[%s3793_s0 + $0x338] ss:$36 sps:$4 sm:$0xff]  }
 0x102   :  { %v2246_v48 = vpop.f32.mrf.mxu0  ;;  %v2288_v51 = vpop.f32.mrf.mxu1  ;;  %1820 = vmatmul.mubr.bf16.gmra.mxu1 %v2910_v40  ;;  %2652 = vmatmul.mubr.bf16.gmra.mxu0 %v2913_v41 }
 0x103   :  { %v3546_v52 = vadd.f32 %v2287_v47, %v3487_v2  ;;  %1827 = vmatprep.mubr.bf16.mxu1 %v2916_v43  ;;  %2655 = vmatprep.mubr.msk.bf16.mxu0 %vm2927_vm0, %v2926_v11  ;;  %v2131_v43 = vcombine.low %v138_v15, %v138_v15 }
 0x104   :  { %v2247_v53 = vpop.f32.mrf.mxu0  ;;  %v2289_v54 = vpop.f32.mrf.mxu1 }
 0x105   :  { %v3550_v55 = vadd.f32 %v2247_v53, %v2246_v48  ;;  %v2290_v56 = vadd.f32 %v2289_v54, %v2288_v51  ;;  %v1345_v51 = vadd.f32 %v3476_v58, %v3487_v2 }
 0x106   :  { %v2249_v57 = vpop.f32.mrf.mxu0  ;;  %v2291_v60 = vpop.f32.mrf.mxu1 }
 0x107   :  { %v3559_v63 = vadd.f32 %v2290_v56, %v3487_v2 }
 0x108   :  { %v2250_v3 = vpop.f32.mrf.mxu0  ;;  %v2292_v4 = vpop.f32.mrf.mxu1 }
 0x109   :  { %v3564_v5 = vadd.f32 %v2250_v3, %v2249_v57  ;;  %v2293_v6 = vadd.f32 %v2292_v4, %v2291_v60 }
 0x10a   :  { %v2252_v8 = vpop.f32.mrf.mxu0  ;;  %v2294_v9 = vpop.f32.mrf.mxu1  ;;  %1828 = vmatmul.mubr.bf16.gmra.mxu1 %v2914_v61  ;;  %2656 = vmatmul.mubr.bf16.gmra.mxu0 %v2917_v62  ;;  %v1350_v62 = vadd.f32 %v3482_v0, %v3487_v2 }
 0x10b   :  { %v3567_v10 = vadd.f32 %v2293_v6, %v3487_v2  ;;  %1835 = vmatprep.mubr.bf16.mxu1 %v2920_v1  ;;  %2659 = vmatprep.mubr.msk.bf16.mxu0 %vm2927_vm0, %v2926_v11  ;;  %v2925_v6 = vld [vmem:[%s3793_s0 + $0x380] ss:$0 sps:$4 sm:$0xff]  }
 0x10c   :  { %v2253_v13 = vpop.f32.mrf.mxu0  ;;  %v2295_v14 = vpop.f32.mrf.mxu1 }
 0x10d   :  { %v3574_v17 = vadd.f32 %v2253_v13, %v2252_v8  ;;  %v2296_v18 = vadd.f32 %v2295_v14, %v2294_v9 }
 0x10e   :  { %v2255_v20 = vpop.f32.mrf.mxu0  ;;  %v2297_v21 = vpop.f32.mrf.mxu1 }
 0x10f   :  { %v3583_v24 = vadd.f32 %v2296_v18, %v3487_v2 }
 0x110   :  { %v2256_v27 = vpop.f32.mrf.mxu0  ;;  %v2298_v28 = vpop.f32.mrf.mxu1 }
 0x111   :  { %v3585_v30 = vadd.f32 %v2256_v27, %v2255_v20  ;;  %v1358_v27 = vadd.f32 %v3508_v19, %v3487_v2 }
 0x112   :  { %v2258_v31 = vpop.f32.mrf.mxu0  ;;  %v2316_v32 = vpop.f32.mrf.mxu1  ;;  %1836 = vmatmul.mubr.bf16.gmra.mxu1 %v2918_v22  ;;  %2660 = vmatmul.mubr.bf16.gmra.mxu0 %v2921_v23 }
 0x113   :  { %1843 = vmatprep.mubr.bf16.mxu1 %v2132_v26  ;;  %2663 = vmatprep.mubr.msk.bf16.mxu0 %vm2927_vm0, %v2926_v11 }
 0x114   :  { %v2259_v34 = vpop.f32.mrf.mxu0  ;;  %v2317_v35 = vpop.f32.mrf.mxu1 }
 0x115   :  { %v3591_v38 = vadd.f32 %v2259_v34, %v2258_v31  ;;  %v2318_v39 = vadd.f32 %v2317_v35, %v2316_v32 }
 0x116   :  { %v2261_v40 = vpop.f32.mrf.mxu0  ;;  %v2319_v41 = vpop.f32.mrf.mxu1 }
 0x117   :  { %v1478_v45 = vadd.f32 %v2318_v39, %v1342_v37 }
 0x118   :  { %v2262_v47 = vpop.f32.mrf.mxu0  ;;  %v2320_v48 = vpop.f32.mrf.mxu1 }
 0x119   :  { %v3598_v53 = vadd.f32 %v2262_v47, %v2261_v40  ;;  %v2321_v54 = vadd.f32 %v2320_v48, %v2319_v41  ;;  %v1361_v40 = vadd.f32 %v3522_v29, %v3487_v2 }
 0x11a   :  { %v2322_v49 = vpop.f32.mrf.mxu1  ;;  %v2410_v56 = vpop.f32.mrf.mxu0  ;;  %1844 = vmatmul.mubr.bf16.gmra.mxu1 %v2131_v43  ;;  %2664 = vmatmul.mubr.bf16.gmra.mxu0 %v2924_v44 }
 0x11b   :  { %v1481_v57 = vadd.f32 %v2321_v54, %v1345_v51  ;;  %2667 = vmatprep.mubr.msk.bf16.mxu0 %vm2927_vm0, %v2926_v11  ;;  %v1353_v11 = vadd.f32 %v3501_v12, %v3487_v2  ;;  %v1366_v54 = vadd.f32 %v3529_v36, %v3487_v2 }
 0x11c   :  { %v2323_v60 = vpop.f32.mrf.mxu1  ;;  %v2411_v61 = vpop.f32.mrf.mxu0 }
 0x11d   :  { %v2324_v1 = vadd.f32 %v2323_v60, %v2322_v49  ;;  %v2412_v3 = vadd.f32 %v2411_v61, %v2410_v56 }
 0x11e   :  { %v2325_v4 = vpop.f32.mrf.mxu1  ;;  %v2413_v58 = vpop.f32.mrf.mxu0 }
 0x11f   :  { %v1486_v8 = vadd.f32 %v2324_v1, %v1350_v62  ;;  %v3607_v9 = vadd.f32 %v2412_v3, %v1478_v45  ;;  %v1369_v3 = vadd.f32 %v3543_v46, %v3487_v2 }
 0x120   :  { %v2326_v13 = vpop.f32.mrf.mxu1  ;;  %v2414_v14 = vpop.f32.mrf.mxu0 }
 0x121   :  { %v2327_v15 = vadd.f32 %v2326_v13, %v2325_v4  ;;  %v2415_v18 = vadd.f32 %v2414_v14, %v2413_v58 }
 0x122   :  { %v2328_v20 = vpop.f32.mrf.mxu1  ;;  %v2416_v0 = vpop.f32.mrf.mxu0  ;;  %2668 = vmatmul.mubr.bf16.gmra.mxu0 %v2925_v6 }
 0x123   :  { %v1489_v21 = vadd.f32 %v2327_v15, %v1353_v11  ;;  %v3611_v22 = vadd.f32 %v2415_v18, %v1481_v57  ;;  %v1374_v15 = vadd.f32 %v3550_v55, %v3487_v2 }
 0x124   :  { %v2329_v23 = vpop.f32.mrf.mxu1  ;;  %v2417_v26 = vpop.f32.mrf.mxu0 }
 0x125   :  { %v2330_v28 = vadd.f32 %v2329_v23, %v2328_v20  ;;  %v2418_v31 = vadd.f32 %v2417_v26, %v2416_v0 }
 0x126   :  { %v2331_v32 = vpop.f32.mrf.mxu1  ;;  %v2419_v34 = vpop.f32.mrf.mxu0 }
 0x127   :  { %v1494_v35 = vadd.f32 %v2330_v28, %v1358_v27  ;;  %v3615_v37 = vadd.f32 %v2418_v31, %v1486_v8  ;;  %v1377_v28 = vadd.f32 %v3564_v5, %v3487_v2 }
 0x128   :  { %v2332_v12 = vpop.f32.mrf.mxu1  ;;  %v2420_v39 = vpop.f32.mrf.mxu0 }
 0x129   :  { %v2333_v41 = vadd.f32 %v2332_v12, %v2331_v32  ;;  %v2421_v43 = vadd.f32 %v2420_v39, %v2419_v34 }
 0x12a   :  { %v2334_v44 = vpop.f32.mrf.mxu1  ;;  %v2422_v45 = vpop.f32.mrf.mxu0 }
 0x12b   :  { %v1497_v47 = vadd.f32 %v2333_v41, %v1361_v40  ;;  %v3619_v48 = vadd.f32 %v2421_v43, %v1489_v21  ;;  %v1382_v41 = vadd.f32 %v3574_v17, %v3487_v2 }
 0x12c   :  { %v2335_v19 = vpop.f32.mrf.mxu1  ;;  %v2423_v51 = vpop.f32.mrf.mxu0 }
 0x12d   :  { %v2336_v49 = vadd.f32 %v2335_v19, %v2334_v44  ;;  %v2424_v56 = vadd.f32 %v2423_v51, %v2422_v45 }
 0x12e   :  { %v2337_v57 = vpop.f32.mrf.mxu1  ;;  %v2425_v60 = vpop.f32.mrf.mxu0 }
 0x12f   :  { %v1502_v61 = vadd.f32 %v2336_v49, %v1366_v54  ;;  %v3623_v62 = vadd.f32 %v2424_v56, %v1494_v35  ;;  %v1385_v49 = vadd.f32 %v3585_v30, %v3487_v2 }
 0x130   :  { %v2338_v29 = vpop.f32.mrf.mxu1  ;;  %v2426_v1 = vpop.f32.mrf.mxu0 }
 0x131   :  { %v2339_v4 = vadd.f32 %v2338_v29, %v2337_v57  ;;  %v2427_v58 = vadd.f32 %v2426_v1, %v2425_v60 }
 0x132   :  { %v2340_v6 = vpop.f32.mrf.mxu1  ;;  %v2428_v8 = vpop.f32.mrf.mxu0 }
 0x133   :  { %v1505_v13 = vadd.f32 %v2339_v4, %v1369_v3  ;;  %v3627_v14 = vadd.f32 %v2427_v58, %v1497_v47  ;;  %v1390_v4 = vadd.f32 %v3591_v38, %v3487_v2 }
 0x134   :  { %v2341_v36 = vpop.f32.mrf.mxu1  ;;  %v2429_v11 = vpop.f32.mrf.mxu0 }
 0x135   :  { %v2342_v18 = vadd.f32 %v2341_v36, %v2340_v6  ;;  %v2430_v20 = vadd.f32 %v2429_v11, %v2428_v8 }
 0x136   :  { %v2343_v0 = vpop.f32.mrf.mxu1  ;;  %v2431_v21 = vpop.f32.mrf.mxu0 }
 0x137   :  { %v1510_v23 = vadd.f32 %v2342_v18, %v1374_v15  ;;  %v3631_v26 = vadd.f32 %v2430_v20, %v1502_v61  ;;  %v1393_v18 = vadd.f32 %v3598_v53, %v3487_v2 }
 0x138   :  { %v2344_v46 = vpop.f32.mrf.mxu1  ;;  %v2432_v27 = vpop.f32.mrf.mxu0 }
 0x139   :  { %v2345_v31 = vadd.f32 %v2344_v46, %v2343_v0  ;;  %v2433_v32 = vadd.f32 %v2432_v27, %v2431_v21 }
 0x13a   :  { %v2346_v34 = vpop.f32.mrf.mxu1  ;;  %v2434_v35 = vpop.f32.mrf.mxu0 }
 0x13b   :  { %v1513_v12 = vadd.f32 %v2345_v31, %v1377_v28  ;;  %v3635_v39 = vadd.f32 %v2433_v32, %v1505_v13  ;;  %v1398_v31 = vadd.f32 %v3465_v50, %v3487_v2 }
 0x13c   :  { %v2347_v55 = vpop.f32.mrf.mxu1  ;;  %v2435_v40 = vpop.f32.mrf.mxu0 }
 0x13d   :  { %v2348_v43 = vadd.f32 %v2347_v55, %v2346_v34  ;;  %v2436_v44 = vadd.f32 %v2435_v40, %v2434_v35 }
 0x13e   :  { %v2349_v45 = vpop.f32.mrf.mxu1  ;;  %v2437_v47 = vpop.f32.mrf.mxu0 }
 0x13f   :  { %v1518_v19 = vadd.f32 %v2348_v43, %v1382_v41  ;;  %v3639_v51 = vadd.f32 %v2436_v44, %v1510_v23  ;;  %v1401_v43 = vadd.f32 %v3478_v59, %v3487_v2 }
 0x140   :  { %v2350_v5 = vpop.f32.mrf.mxu1  ;;  %v2438_v54 = vpop.f32.mrf.mxu0 }
 0x141   :  { %v2351_v56 = vadd.f32 %v2350_v5, %v2349_v45  ;;  %v2439_v57 = vadd.f32 %v2438_v54, %v2437_v47 }
 0x142   :  { %v2352_v60 = vpop.f32.mrf.mxu1  ;;  %v2440_v61 = vpop.f32.mrf.mxu0 }
 0x143   :  { %v1521_v29 = vadd.f32 %v2351_v56, %v1385_v49  ;;  %v3643_v1 = vadd.f32 %v2439_v57, %v1513_v12 }
 0x144   :  { %v2353_v17 = vpop.f32.mrf.mxu1  ;;  %v2441_v3 = vpop.f32.mrf.mxu0 }
 0x145   :  { %v2354_v58 = vadd.f32 %v2353_v17, %v2352_v60  ;;  %v2442_v6 = vadd.f32 %v2441_v3, %v2440_v61 }
 0x146   :  { %v2355_v8 = vpop.f32.mrf.mxu1  ;;  %v2443_v13 = vpop.f32.mrf.mxu0 }
 0x147   :  { %v1526_v36 = vadd.f32 %v2354_v58, %v1390_v4  ;;  %v3647_v11 = vadd.f32 %v2442_v6, %v1518_v19 }
 0x148   :  { %v2356_v30 = vpop.f32.mrf.mxu1  ;;  %v2444_v15 = vpop.f32.mrf.mxu0 }
 0x149   :  { %v2357_v20 = vadd.f32 %v2356_v30, %v2355_v8  ;;  %v2445_v0 = vadd.f32 %v2444_v15, %v2443_v13 }
 0x14a   :  { %v2358_v21 = vpop.f32.mrf.mxu1  ;;  %v2446_v23 = vpop.f32.mrf.mxu0 }
 0x14b   :  { %v1529_v46 = vadd.f32 %v2357_v20, %v1393_v18  ;;  %v3651_v27 = vadd.f32 %v2445_v0, %v1521_v29 }
 0x14c   :  { %v2359_v38 = vpop.f32.mrf.mxu1  ;;  %v2447_v28 = vpop.f32.mrf.mxu0 }
 0x14d   :  { %v2360_v32 = vadd.f32 %v2359_v38, %v2358_v21  ;;  %v2448_v34 = vadd.f32 %v2447_v28, %v2446_v23 }
 0x14e   :  { %v2361_v35 = vpop.f32.mrf.mxu1  ;;  %v2449_v12 = vpop.f32.mrf.mxu0 }
 0x14f   :  { %v1534_v55 = vadd.f32 %v2360_v32, %v1398_v31  ;;  %v3655_v40 = vadd.f32 %v2448_v34, %v1526_v36 }
 0x150   :  { %v2362_v53 = vpop.f32.mrf.mxu1  ;;  %v2450_v41 = vpop.f32.mrf.mxu0 }
 0x151   :  { %v2363_v44 = vadd.f32 %v2362_v53, %v2361_v35  ;;  %v2451_v45 = vadd.f32 %v2450_v41, %v2449_v12 }
 0x152   :  { %v2364_v47 = vpop.f32.mrf.mxu1  ;;  %v2452_v19 = vpop.f32.mrf.mxu0 }
 0x153   :  { %v1537_v5 = vadd.f32 %v2363_v44, %v1401_v43  ;;  %v3659_v54 = vadd.f32 %v2451_v45, %v1529_v46 }
 0x154   :  { %v2365_v50 = vpop.f32.mrf.mxu1  ;;  %v2453_v49 = vpop.f32.mrf.mxu0 }
 0x155   :  { %v2366_v56 = vadd.f32 %v2365_v50, %v2364_v47  ;;  %v2454_v57 = vadd.f32 %v2453_v49, %v2452_v19 }
 0x156   :  { %v2367_v60 = vpop.f32.mrf.mxu1  ;;  %v2455_v61 = vpop.f32.mrf.mxu0 }
 0x157   :  { %v1542_v29 = vadd.f32 %v2366_v56, %v3496_v7  ;;  %v3662_v17 = vadd.f32 %v2454_v57, %v1534_v55 }
 0x158   :  { %v2368_v3 = vpop.f32.mrf.mxu1  ;;  %v2456_v4 = vpop.f32.mrf.mxu0 }
 0x159   :  { %v2369_v59 = vadd.f32 %v2368_v3, %v2367_v60  ;;  %v2457_v2 = vadd.f32 %v2456_v4, %v2455_v61 }
 0x15a   :  { %v2370_v58 = vpop.f32.mrf.mxu1  ;;  %v2458_v6 = vpop.f32.mrf.mxu0 }
 0x15b   :  { %v1545_v8 = vadd.f32 %v2369_v59, %v3504_v16  ;;  %v3665_v13 = vadd.f32 %v2457_v2, %v1537_v5 }
 0x15c   :  { %v2371_v36 = vpop.f32.mrf.mxu1  ;;  %v2459_v30 = vpop.f32.mrf.mxu0 }
 0x15d   :  { %v2372_v15 = vadd.f32 %v2371_v36, %v2370_v58  ;;  %v2460_v18 = vadd.f32 %v2459_v30, %v2458_v6 }
 0x15e   :  { %v2373_v20 = vpop.f32.mrf.mxu1  ;;  %v2461_v0 = vpop.f32.mrf.mxu0 }
 0x15f   :  { %v1550_v7 = vadd.f32 %v2372_v15, %v3517_v25  ;;  %v3668_v21 = vadd.f32 %v2460_v18, %v1542_v29 }
 0x160   :  { %v2374_v23 = vpop.f32.mrf.mxu1  ;;  %v2462_v46 = vpop.f32.mrf.mxu0 }
 0x161   :  { %v2375_v38 = vadd.f32 %v2374_v23, %v2373_v20  ;;  %v2463_v28 = vadd.f32 %v2462_v46, %v2461_v0 }
 0x162   :  { %v2376_v31 = vpop.f32.mrf.mxu1  ;;  %v2464_v32 = vpop.f32.mrf.mxu0 }
 0x163   :  { %v1553_v16 = vadd.f32 %v2375_v38, %v3525_v33  ;;  %v3671_v34 = vadd.f32 %v2463_v28, %v1545_v8 }
 0x164   :  { %v2377_v35 = vpop.f32.mrf.mxu1  ;;  %v2465_v12 = vpop.f32.mrf.mxu0 }
 0x165   :  { %v2378_v55 = vadd.f32 %v2377_v35, %v2376_v31  ;;  %v2466_v53 = vadd.f32 %v2465_v12, %v2464_v32 }
 0x166   :  { %v2379_v41 = vpop.f32.mrf.mxu1  ;;  %v2467_v43 = vpop.f32.mrf.mxu0 }
 0x167   :  { %v1558_v25 = vadd.f32 %v2378_v55, %v3538_v42  ;;  %v3674_v44 = vadd.f32 %v2466_v53, %v1550_v7 }
 0x168   :  { %v2380_v45 = vpop.f32.mrf.mxu1  ;;  %v2468_v47 = vpop.f32.mrf.mxu0 }
 0x169   :  { %v2381_v19 = vadd.f32 %v2380_v45, %v2379_v41  ;;  %v2469_v5 = vadd.f32 %v2468_v47, %v2467_v43 }
 0x16a   :  { %v2382_v50 = vpop.f32.mrf.mxu1  ;;  %v2470_v49 = vpop.f32.mrf.mxu0 }
 0x16b   :  { %v1561_v33 = vadd.f32 %v2381_v19, %v3546_v52  ;;  %v3677_v56 = vadd.f32 %v2469_v5, %v1553_v16 }
 0x16c   :  { %v2383_v57 = vpop.f32.mrf.mxu1  ;;  %v2471_v60 = vpop.f32.mrf.mxu0 }
 0x16d   :  { %v2384_v61 = vadd.f32 %v2383_v57, %v2382_v50  ;;  %v2472_v29 = vadd.f32 %v2471_v60, %v2470_v49 }
 0x16e   :  { %v2385_v3 = vpop.f32.mrf.mxu1  ;;  %v2473_v4 = vpop.f32.mrf.mxu0 }
 0x16f   :  { %v1566_v42 = vadd.f32 %v2384_v61, %v3559_v63  ;;  %v3680_v59 = vadd.f32 %v2472_v29, %v1558_v25 }
 0x170   :  { %v2386_v2 = vpop.f32.mrf.mxu1  ;;  %v2474_v58 = vpop.f32.mrf.mxu0 }
 0x171   :  { %v2387_v6 = vadd.f32 %v2386_v2, %v2385_v3  ;;  %v2475_v8 = vadd.f32 %v2474_v58, %v2473_v4 }
 0x172   :  { %v2388_v36 = vpop.f32.mrf.mxu1  ;;  %v2476_v30 = vpop.f32.mrf.mxu0 }
 0x173   :  { %v1569_v52 = vadd.f32 %v2387_v6, %v3567_v10  ;;  %v3683_v15 = vadd.f32 %v2475_v8, %v1561_v33 }
 0x174   :  { %v2389_v18 = vpop.f32.mrf.mxu1  ;;  %v2477_v20 = vpop.f32.mrf.mxu0 }
 0x175   :  { %v2390_v0 = vadd.f32 %v2389_v18, %v2388_v36  ;;  %v2478_v7 = vadd.f32 %v2477_v20, %v2476_v30 }
 0x176   :  { %v2391_v23 = vpop.f32.mrf.mxu1  ;;  %v2479_v46 = vpop.f32.mrf.mxu0 }
 0x177   :  { %v1574_v63 = vadd.f32 %v2390_v0, %v3583_v24  ;;  %v3686_v38 = vadd.f32 %v2478_v7, %v1566_v42 }
 0x178   :  { %v2392_v28 = vpop.f32.mrf.mxu1  ;;  %v2480_v31 = vpop.f32.mrf.mxu0 }
 0x179   :  { %v2481_v32 = vadd.f32 %v2480_v31, %v2479_v46 }
 0x17a   :  { %v2482_v16 = vpop.f32.mrf.mxu0  ;;  %v2504_v35 = vpop.f32.mrf.mxu1 }
 0x17b   :  { %v3688_v12 = vadd.f32 %v2481_v32, %v1569_v52 }
 0x17c   :  { %v2483_v10 = vpop.f32.mrf.mxu0  ;;  %v2505_v55 = vpop.f32.mrf.mxu1 }
 0x17d   :  { %v2484_v53 = vadd.f32 %v2483_v10, %v2482_v16  ;;  %v2506_v41 = vadd.f32 %v2505_v55, %v2504_v35 }
 0x17e   :  { %v2485_v43 = vpop.f32.mrf.mxu0  ;;  %v2507_v25 = vpop.f32.mrf.mxu1 }
 0x17f   :  { %v3690_v45 = vadd.f32 %v2484_v53, %v1574_v63  ;;  %v1750_v5 = vadd.f32 %v2506_v41, %v3607_v9 }
 0x180   :  { %v2486_v47 = vpop.f32.mrf.mxu0  ;;  %v2508_v19 = vpop.f32.mrf.mxu1 }
 0x181   :  { %v2509_v24 = vadd.f32 %v2508_v19, %v2507_v25 }
 0x182   :  { %v2510_v50 = vpop.f32.mrf.mxu1  ;;  %v1885_v49 = vpop.f32.mrf.mxu0 }
 0x183   :  { %v1886_v33 = vadd.f32 %v1885_v49, %v1750_v5  ;;  %v1753_v29 = vadd.f32 %v2509_v24, %v3611_v22 }
 0x184   :  { %v2511_v57 = vpop.f32.mrf.mxu1  ;;  %v2621_v60 = vpop.f32.mrf.mxu0 }
 0x185   :  { %1987 = vst [vmem:[%s3795_s3] sm:$0xff] %v1886_v33  ;;  %v2512_v61 = vadd.f32 %v2511_v57, %v2510_v50 }
 0x186   :  { %v2513_v3 = vpop.f32.mrf.mxu1  ;;  %v1888_v4 = vpop.f32.mrf.mxu0 }
 0x187   :  { %v1889_v42 = vadd.f32 %v1888_v4, %v1753_v29  ;;  %v1758_v6 = vadd.f32 %v2512_v61, %v3615_v37 }
 0x188   :  { %v2514_v2 = vpop.f32.mrf.mxu1  ;;  %v2622_v58 = vpop.f32.mrf.mxu0 }
 0x189   :  { %1988 = vst [vmem:[%s3795_s3 + $0x8] sm:$0xff] %v1889_v42  ;;  %v2515_v9 = vadd.f32 %v2514_v2, %v2513_v3 }
 0x18a   :  { %v2516_v8 = vpop.f32.mrf.mxu1  ;;  %v1893_v36 = vpop.f32.mrf.mxu0 }
 0x18b   :  { %v1894_v30 = vadd.f32 %v1893_v36, %v1758_v6  ;;  %v1761_v20 = vadd.f32 %v2515_v9, %v3619_v48 }
 0x18c   :  { %v2517_v52 = vpop.f32.mrf.mxu1  ;;  %v2625_v18 = vpop.f32.mrf.mxu0 }
 0x18d   :  { %1989 = vst [vmem:[%s3795_s3 + $0x10] sm:$0xff] %v1894_v30  ;;  %v2518_v22 = vadd.f32 %v2517_v52, %v2516_v8 }
 0x18e   :  { %v2519_v0 = vpop.f32.mrf.mxu1  ;;  %v1896_v7 = vpop.f32.mrf.mxu0 }
 0x18f   :  { %v1897_v23 = vadd.f32 %v1896_v7, %v1761_v20  ;;  %v1766_v28 = vadd.f32 %v2518_v22, %v3623_v62 }
 0x190   :  { %v2520_v46 = vpop.f32.mrf.mxu1  ;;  %v2626_v63 = vpop.f32.mrf.mxu0 }
 0x191   :  { %1990 = vst [vmem:[%s3795_s3 + $0x18] sm:$0xff] %v1897_v23  ;;  %v2521_v37 = vadd.f32 %v2520_v46, %v2519_v0 }
 0x192   :  { %v2522_v31 = vpop.f32.mrf.mxu1  ;;  %v1901_v32 = vpop.f32.mrf.mxu0 }
 0x193   :  { %v1902_v16 = vadd.f32 %v1901_v32, %v1766_v28  ;;  %v1769_v55 = vadd.f32 %v2521_v37, %v3627_v14 }
 0x194   :  { %v2523_v35 = vpop.f32.mrf.mxu1  ;;  %v2629_v10 = vpop.f32.mrf.mxu0 }
 0x195   :  { %1991 = vst [vmem:[%s3795_s3 + $0x20] sm:$0xff] %v1902_v16  ;;  %v2524_v48 = vadd.f32 %v2523_v35, %v2522_v31 }
 0x196   :  { %v2525_v53 = vpop.f32.mrf.mxu1  ;;  %v1904_v41 = vpop.f32.mrf.mxu0 }
 0x197   :  { %v1905_v43 = vadd.f32 %v1904_v41, %v1769_v55  ;;  %v1774_v19 = vadd.f32 %v2524_v48, %v3631_v26 }
 0x198   :  { %v2526_v25 = vpop.f32.mrf.mxu1  ;;  %v2630_v47 = vpop.f32.mrf.mxu0 }
 0x199   :  { %1992 = vst [vmem:[%s3795_s3 + $0x28] sm:$0xff] %v1905_v43  ;;  %v2527_v62 = vadd.f32 %v2526_v25, %v2525_v53 }
 0x19a   :  { %v2528_v24 = vpop.f32.mrf.mxu1  ;;  %v1909_v5 = vpop.f32.mrf.mxu0 }
 0x19b   :  { %v1910_v50 = vadd.f32 %v1909_v5, %v1774_v19  ;;  %v1777_v57 = vadd.f32 %v2527_v62, %v3635_v39 }
 0x19c   :  { %v2529_v49 = vpop.f32.mrf.mxu1  ;;  %v2633_v33 = vpop.f32.mrf.mxu0 }
 0x19d   :  { %1993 = vst [vmem:[%s3795_s3 + $0x30] sm:$0xff] %v1910_v50  ;;  %v2530_v14 = vadd.f32 %v2529_v49, %v2528_v24 }
 0x19e   :  { %v2531_v60 = vpop.f32.mrf.mxu1  ;;  %v1912_v61 = vpop.f32.mrf.mxu0 }
 0x19f   :  { %v1913_v29 = vadd.f32 %v1912_v61, %v1777_v57  ;;  %v1782_v42 = vadd.f32 %v2530_v14, %v3639_v51 }
 0x1a0   :  { %v2532_v3 = vpop.f32.mrf.mxu1  ;;  %v2634_v4 = vpop.f32.mrf.mxu0 }
 0x1a1   :  { %1994 = vst [vmem:[%s3795_s3 + $0x38] sm:$0xff] %v1913_v29  ;;  %v2533_v26 = vadd.f32 %v2532_v3, %v2531_v60 }
 0x1a2   :  { %v2534_v2 = vpop.f32.mrf.mxu1  ;;  %v1917_v58 = vpop.f32.mrf.mxu0 }
 0x1a3   :  { %v1918_v9 = vadd.f32 %v1917_v58, %v1782_v42  ;;  %v1785_v36 = vadd.f32 %v2533_v26, %v3643_v1 }
 0x1a4   :  { %v2535_v6 = vpop.f32.mrf.mxu1  ;;  %v2637_v8 = vpop.f32.mrf.mxu0 }
 0x1a5   :  { %1995 = vst [vmem:[%s3795_s3 + $0x40] sm:$0xff] %v1918_v9  ;;  %v2536_v39 = vadd.f32 %v2535_v6, %v2534_v2 }
 0x1a6   :  { %v2537_v30 = vpop.f32.mrf.mxu1  ;;  %v1920_v52 = vpop.f32.mrf.mxu0 }
 0x1a7   :  { %v1921_v18 = vadd.f32 %v1920_v52, %v1785_v36  ;;  %v1790_v0 = vadd.f32 %v2536_v39, %v3647_v11 }
 0x1a8   :  { %v2538_v22 = vpop.f32.mrf.mxu1  ;;  %v2638_v20 = vpop.f32.mrf.mxu0 }
 0x1a9   :  { %1996 = vst [vmem:[%s3795_s3 + $0x48] sm:$0xff] %v1921_v18  ;;  %v2539_v51 = vadd.f32 %v2538_v22, %v2537_v30 }
 0x1aa   :  { %v2540_v7 = vpop.f32.mrf.mxu1  ;;  %v1925_v23 = vpop.f32.mrf.mxu0 }
 0x1ab   :  { %v1926_v46 = vadd.f32 %v1925_v23, %v1790_v0  ;;  %v1793_v28 = vadd.f32 %v2539_v51, %v3651_v27 }
 0x1ac   :  { %v2541_v63 = vpop.f32.mrf.mxu1  ;;  %v2641_v37 = vpop.f32.mrf.mxu0 }
 0x1ad   :  { %1997 = vst [vmem:[%s3795_s3 + $0x50] sm:$0xff] %v1926_v46  ;;  %v2542_v1 = vadd.f32 %v2541_v63, %v2540_v7 }
 0x1ae   :  { %v2543_v31 = vpop.f32.mrf.mxu1  ;;  %v1928_v32 = vpop.f32.mrf.mxu0 }
 0x1af   :  { %v1929_v16 = vadd.f32 %v1928_v32, %v1793_v28  ;;  %v1798_v48 = vadd.f32 %v2542_v1, %v3655_v40 }
 0x1b0   :  { %v2544_v35 = vpop.f32.mrf.mxu1  ;;  %v2642_v10 = vpop.f32.mrf.mxu0 }
 0x1b1   :  { %1998 = vst [vmem:[%s3795_s3 + $0x58] sm:$0xff] %v1929_v16  ;;  %v2545_v11 = vadd.f32 %v2544_v35, %v2543_v31 }
 0x1b2   :  { %v2546_v55 = vpop.f32.mrf.mxu1  ;;  %v1933_v53 = vpop.f32.mrf.mxu0 }
 0x1b3   :  { %v1934_v41 = vadd.f32 %v1933_v53, %v1798_v48  ;;  %v1801_v47 = vadd.f32 %v2545_v11, %v3659_v54 }
 0x1b4   :  { %v2547_v43 = vpop.f32.mrf.mxu1  ;;  %v2645_v25 = vpop.f32.mrf.mxu0 }
 0x1b5   :  { %1999 = vst [vmem:[%s3795_s3 + $0x60] sm:$0xff] %v1934_v41  ;;  %v2548_v27 = vadd.f32 %v2547_v43, %v2546_v55 }
 0x1b6   :  { %v2549_v62 = vpop.f32.mrf.mxu1  ;;  %v1936_v19 = vpop.f32.mrf.mxu0 }
 0x1b7   :  { %v1937_v24 = vadd.f32 %v1936_v19, %v1801_v47  ;;  %v1806_v49 = vadd.f32 %v2548_v27, %v3662_v17 }
 0x1b8   :  { %v2550_v5 = vpop.f32.mrf.mxu1  ;;  %v2646_v50 = vpop.f32.mrf.mxu0 }
 0x1b9   :  { %2000 = vst [vmem:[%s3795_s3 + $0x68] sm:$0xff] %v1937_v24  ;;  %v2551_v40 = vadd.f32 %v2550_v5, %v2549_v62 }
 0x1ba   :  { %v2552_v33 = vpop.f32.mrf.mxu1  ;;  %v1941_v14 = vpop.f32.mrf.mxu0 }
 0x1bb   :  { %v1942_v57 = vadd.f32 %v1941_v14, %v1806_v49  ;;  %v1809_v29 = vadd.f32 %v2551_v40, %v3665_v13 }
 0x1bc   :  { %v2553_v60 = vpop.f32.mrf.mxu1  ;;  %v2649_v61 = vpop.f32.mrf.mxu0 }
 0x1bd   :  { %2001 = vst [vmem:[%s3795_s3 + $0x70] sm:$0xff] %v1942_v57  ;;  %v2554_v54 = vadd.f32 %v2553_v60, %v2552_v33 }
 0x1be   :  { %v2555_v3 = vpop.f32.mrf.mxu1  ;;  %v1944_v4 = vpop.f32.mrf.mxu0 }
 0x1bf   :  { %v1945_v26 = vadd.f32 %v1944_v4, %v1809_v29  ;;  %v1814_v58 = vadd.f32 %v2554_v54, %v3668_v21 }
 0x1c0   :  { %v2556_v42 = vpop.f32.mrf.mxu1  ;;  %v2650_v2 = vpop.f32.mrf.mxu0 }
 0x1c1   :  { %2002 = vst [vmem:[%s3795_s3 + $0x78] sm:$0xff] %v1945_v26  ;;  %v2557_v17 = vadd.f32 %v2556_v42, %v2555_v3 }
 0x1c2   :  { %v2558_v9 = vpop.f32.mrf.mxu1  ;;  %v1949_v6 = vpop.f32.mrf.mxu0 }
 0x1c3   :  { %v1950_v8 = vadd.f32 %v1949_v6, %v1814_v58  ;;  %v1817_v30 = vadd.f32 %v2557_v17, %v3671_v34 }
 0x1c4   :  { %v2559_v39 = vpop.f32.mrf.mxu1  ;;  %v2653_v36 = vpop.f32.mrf.mxu0 }
 0x1c5   :  { %2003 = vst [vmem:[%s3795_s3 + $0x80] sm:$0xff] %v1950_v8  ;;  %v2560_v13 = vadd.f32 %v2559_v39, %v2558_v9 }
 0x1c6   :  { %v2561_v52 = vpop.f32.mrf.mxu1  ;;  %v1952_v18 = vpop.f32.mrf.mxu0 }
 0x1c7   :  { %v1953_v22 = vadd.f32 %v1952_v18, %v1817_v30  ;;  %v1822_v0 = vadd.f32 %v2560_v13, %v3674_v44 }
 0x1c8   :  { %v2562_v20 = vpop.f32.mrf.mxu1  ;;  %v2654_v51 = vpop.f32.mrf.mxu0 }
 0x1c9   :  { %2004 = vst [vmem:[%s3795_s3 + $0x88] sm:$0xff] %v1953_v22  ;;  %v2563_v21 = vadd.f32 %v2562_v20, %v2561_v52 }
 0x1ca   :  { %v2564_v7 = vpop.f32.mrf.mxu1  ;;  %v1957_v23 = vpop.f32.mrf.mxu0 }
 0x1cb   :  { %v1958_v46 = vadd.f32 %v1957_v23, %v1822_v0  ;;  %v1825_v1 = vadd.f32 %v2563_v21, %v3677_v56 }
 0x1cc   :  { %v2565_v63 = vpop.f32.mrf.mxu1  ;;  %v2657_v37 = vpop.f32.mrf.mxu0 }
 0x1cd   :  { %2005 = vst [vmem:[%s3795_s3 + $0x90] sm:$0xff] %v1958_v46  ;;  %v2566_v34 = vadd.f32 %v2565_v63, %v2564_v7 }
 0x1ce   :  { %v2567_v28 = vpop.f32.mrf.mxu1  ;;  %v1960_v31 = vpop.f32.mrf.mxu0 }
 0x1cf   :  { %v1961_v32 = vadd.f32 %v1960_v31, %v1825_v1  ;;  %v1830_v10 = vadd.f32 %v2566_v34, %v3680_v59 }
 0x1d0   :  { %v2568_v16 = vpop.f32.mrf.mxu1  ;;  %v2658_v35 = vpop.f32.mrf.mxu0 }
 0x1d1   :  { %2006 = vst [vmem:[%s3795_s3 + $0x98] sm:$0xff] %v1961_v32  ;;  %v2569_v44 = vadd.f32 %v2568_v16, %v2567_v28 }
 0x1d2   :  { %v2570_v11 = vpop.f32.mrf.mxu1  ;;  %v1965_v48 = vpop.f32.mrf.mxu0 }
 0x1d3   :  { %v1966_v55 = vadd.f32 %v1965_v48, %v1830_v10  ;;  %v1833_v43 = vadd.f32 %v2569_v44, %v3683_v15 }
 0x1d4   :  { %v2571_v53 = vpop.f32.mrf.mxu1  ;;  %v2661_v41 = vpop.f32.mrf.mxu0 }
 0x1d5   :  { %2007 = vst [vmem:[%s3795_s3 + $0xa0] sm:$0xff] %v1966_v55  ;;  %v2572_v56 = vadd.f32 %v2571_v53, %v2570_v11 }
 0x1d6   :  { %v2573_v25 = vpop.f32.mrf.mxu1  ;;  %v1968_v27 = vpop.f32.mrf.mxu0 }
 0x1d7   :  { %v1969_v47 = vadd.f32 %v1968_v27, %v1833_v43  ;;  %v1838_v24 = vadd.f32 %v2572_v56, %v3686_v38 }
 0x1d8   :  { %v2574_v62 = vpop.f32.mrf.mxu1  ;;  %v2662_v19 = vpop.f32.mrf.mxu0 }
 0x1d9   :  { %2008 = vst [vmem:[%s3795_s3 + $0xa8] sm:$0xff] %v1969_v47  ;;  %v2575_v59 = vadd.f32 %v2574_v62, %v2573_v25 }
 0x1da   :  { %v2576_v5 = vpop.f32.mrf.mxu1  ;;  %v1973_v50 = vpop.f32.mrf.mxu0 }
 0x1db   :  { %v1974_v40 = vadd.f32 %v1973_v50, %v1838_v24  ;;  %v1841_v14 = vadd.f32 %v2575_v59, %v3688_v12 }
 0x1dc   :  { %v2577_v49 = vpop.f32.mrf.mxu1  ;;  %v2665_v33 = vpop.f32.mrf.mxu0 }
 0x1dd   :  { %2009 = vst [vmem:[%s3795_s3 + $0xb0] sm:$0xff] %v1974_v40  ;;  %v2578_v15 = vadd.f32 %v2577_v49, %v2576_v5 }
 0x1de   :  { %v2579_v57 = vpop.f32.mrf.mxu1  ;;  %v1976_v60 = vpop.f32.mrf.mxu0 }
 0x1df   :  { %v1977_v61 = vadd.f32 %v1976_v60, %v1841_v14  ;;  %v1846_v38 = vadd.f32 %v2578_v15, %v3690_v45 }
 0x1e0   :  { %v2580_v54 = vpop.f32.mrf.mxu1  ;;  %v2666_v29 = vpop.f32.mrf.mxu0 }
 0x1e1   :  { %2010 = vst [vmem:[%s3795_s3 + $0xb8] sm:$0xff] %v1977_v61 }
 0x1e2   :  { %v1981_v3 = vpop.f32.mrf.mxu0 }
 0x1e3   :  { %v1982_v4 = vadd.f32 %v1981_v3, %v1846_v38 }
 0x1e4   :  { %v2669_v26 = vpop.f32.mrf.mxu0 }
 0x1e5   :  { %2011 = vst [vmem:[%s3795_s3 + $0xc0] sm:$0xff] %v1982_v4 }
 0x1e6   :  { %v1984_v42 = vpop.f32.mrf.mxu0 }
 0x1e8   :  { %v2670_v12 = vpop.f32.mrf.mxu0 }

// kernel: cpc_spatial_transform.7
= control target key start
LH: loop header
LB: loop body
LE: loop exit
PB: predicated region body
PF: predicated region fallthrough
CT: control target
= control target key end

     0   :  { %11 = vsyncpa [#allocation3], 0  ;;  %s1645_s21 = smov 0   ;;  %s1647_s22 = smov 0   ;;  %s2632_s0 = inlined_call_operand.vmem [shape: f32[2,6], index: 0, kind: input, shape index: {}]   ;;  %s2633_s1 = inlined_call_operand.vmem [shape: f32[2,4,256], index: 1, kind: input, shape index: {}]   ;;  %s2634_s2 = inlined_call_operand.vmem [shape: f32[1,256], index: 2, kind: input, shape index: {}]   ;;  %s2635_s3 = inlined_call_operand.vmem [shape: f32[1,256], index: 3, kind: input, shape index: {}]   ;;  %s2636_s4 = inlined_call_operand.vmem [shape: f32[4,4], index: 4, kind: input, shape index: {}]   ;;  %s2637_s5 = inlined_call_operand.vmem [shape: f32[4,1], index: 5, kind: input, shape index: {}]   ;;  %s2638_s6 = inlined_call_operand.vmem [shape: f32[2,4,256], index: 6, kind: output, shape index: {}]  }
   0x1   :  { %s1649_s23 = smov 0  }
   0x2 LB: > { %s1500_s24 = sadd.s32 4294967295, %s1605_s23   ;;  %s29_s25 = sadd.s32 1, %s1601_s22  ;;  %s1605_s23 = sphi %s1649_s23, %s17_s23   ;;  %s1601_s22 = sphi %s1647_s22, %s2646_s22   ;;  %s1597_s21 = sphi %s1645_s21, %s2645_s21  }
   0x3   : > { %p31_p0 = scmp.ge.s32.totalorder %s29_s25, 2  ;;  %p1502_p1 = scmp.ge.s32.totalorder %s1605_s23, 1 }
   0x4   : > { %p203_p2 = scmp.lt.s32.totalorder %s1605_s23, 3  ;;  %p1670_p4 = scmp.eq.s32.totalorder %s1500_s24, 0 }
   0x5   : > { %s2648_s25 = smov (%p31_p0, %s29_s25), 0  ;;  %s216_s30 = sshll.u32 %s2632_s0, 4  ;;  %s217_s30 = int_to_ptr.vmem [resolvable:$true] %s216_s30 }
   0x6   : > { %p1666_p3 = pnand %p1502_p1, %p203_p2  ;;  %s1564_s7 = scalar_lea.vmem %s217_s30, 32 }
   0x7   : > { %p1565_p7 = scmp.ne.s32.totalorder %s217_s30, %s1564_s7  ;;  %p1572_p11 = scmp.lt.s32.totalorder %s217_s30, %s217_s30 }
   0x8   : > { %p1529_p5 = pneg %p1666_p3  ;;  %p1573_p12 = scmp.lt.s32.totalorder %s1564_s7, %s1564_s7 }
   0xa   : > { %p1530_p6 = pnand %p1670_p4, %p1529_p5  ;;  %p1574_p13 = por %p1573_p12, %p1572_p11 }
   0xc   : > { %p1566_p8 = pneg %p1530_p6 }
   0xe   : > { %p1567_p9 = pnand %p1566_p8, %p1565_p7 }
  0x10   : > { %p1568_p10 = pneg %p1567_p9 }
  0x12   : > { %p1575_p0 = pnand %p1574_p13, %p1568_p10 }
  0x14   : > { %1578 = shalt.err (!%p1575_p0)
}
  0x15   : > { %s1607_s8 = smov [#allocation2]   ;;  %259 = sbr.rel (%p1666_p3) target bundleno = 647 (0x287), region = 44 }
  0x16   : > { %1532 = dma.vmem_to_smem (!%p1530_p6), %s217_s30, 32, %s1607_s8, [#allocation3]  }
  0x1a   : > { %1592 = dma.done.wait (%p1670_p4), [#allocation3], 32  }
  0x1b   : > { %1594 = vsyncadd (%p1670_p4), [#allocation3], 4294967264 }
  0x1c   : > { %265 = sfence }
  0x1d   : > { %s1513_s9 = sshll.u32 %s1597_s21, 7  ;;  %v339_v0 = vld [vmem:[%s2634_s2] sm:$0x3]  ;;  %v367_v8 = vlaneseq  ;;  %p302_p1 = scmp.lt.s32.totalorder %s1597_s21, 1 }
  0x1e   : > { %s328_s10 = sld [smem:[#allocation2 + %s1513_s9]]  ;;  %s329_s11 = sadd.s32 1, %s1513_s9  ;;  %v340_v1 = vld [vmem:[%s2635_s3] sm:$0x3] }
  0x1f   : > { %s330_s12 = sld [smem:[#allocation2 + %s329_s11]]  ;;  %s331_s13 = sadd.s32 2, %s1513_s9  ;;  %v1694_v16 = vshrl.u32 %v367_v8, 7 }
  0x20   : > { %s332_s14 = sld [smem:[#allocation2 + %s331_s13]]  ;;  %s333_s15 = sadd.s32 3, %s1513_s9 }
  0x21   : > { %s334_s16 = sld [smem:[#allocation2 + %s333_s15]]  ;;  %s335_s17 = sadd.s32 4, %s1513_s9  ;;  %v1697_v21 = vadd.s32 120, %v1694_v16  ;;  %v1700_v22 = vsub.s32 1, %v1694_v16  ;;  %v1703_v23 = vsub.s32 0, %v1694_v16  ;;  %v1706_v25 = vadd.s32 112, %v1694_v16 }
  0x22   : > { %s336_s18 = sld [smem:[#allocation2 + %s335_s17]]  ;;  %s337_s19 = sadd.s32 5, %s1513_s9  ;;  %v1709_v26 = vadd.s32 104, %v1694_v16  ;;  %v1712_v27 = vadd.s32 96, %v1694_v16  ;;  %v1715_v29 = vadd.s32 88, %v1694_v16  ;;  %v1718_v30 = vadd.s32 80, %v1694_v16 }
  0x23   : > { %s338_s26 = sld [smem:[#allocation2 + %s337_s19]]  ;;  %v1721_v31 = vadd.s32 72, %v1694_v16  ;;  %v1724_v34 = vadd.s32 64, %v1694_v16  ;;  %v1727_v35 = vadd.s32 56, %v1694_v16  ;;  %v1730_v37 = vadd.s32 48, %v1694_v16  ;;  %s2650_s21 = smov (!%p302_p1, %s1597_s21), 1 }
  0x24   : > { %v341_v2 = vstv %s328_s10  ;;  %v1733_v38 = vadd.s32 40, %v1694_v16  ;;  %v1736_v39 = vadd.s32 32, %v1694_v16  ;;  %v1739_v41 = vadd.s32 24, %v1694_v16  ;;  %s1519_s29 = sshll.u32 %s2650_s21, 3 }
  0x25   : > { %v342_v3 = vmul.f32 %v341_v2, %v339_v0  ;;  %v343_v4 = vstv %s330_s12  ;;  %v1742_v42 = vadd.s32 16, %v1694_v16  ;;  %v1745_v43 = vadd.s32 8, %v1694_v16  ;;  %s306_s8 = scalar_lea.vmem %s2633_s1, %s1519_s29  ;;  %s325_s15 = scalar_lea.vmem %s2638_s6, %s1519_s29 }
  0x26   : > { %v344_v5 = vmul.f32 %v343_v4, %v340_v1  ;;  %v346_v6 = vstv %s332_s14  ;;  %v1748_v47 = vadd.s32 248, %v1694_v16  ;;  %v1751_v49 = vadd.s32 240, %v1694_v16 }
  0x27   : > { %v348_v7 = vstv %s334_s16  ;;  %v1758_v53 = vadd.s32 232, %v1694_v16  ;;  %v1761_v54 = vadd.s32 224, %v1694_v16  ;;  %v1764_v55 = vadd.s32 216, %v1694_v16 }
  0x28   : > { %v345_v9 = vadd.f32 %v344_v5, %v342_v3  ;;  %v349_v10 = vmul.f32 %v348_v7, %v339_v0  ;;  %v350_v11 = vstv %s336_s18  ;;  %v1767_v56 = vadd.s32 208, %v1694_v16 }
  0x29   : > { %v351_v12 = vmul.f32 %v350_v11, %v340_v1  ;;  %v353_v14 = vstv %s338_s26  ;;  %v1778_v1 = vadd.s32 200, %v1694_v16  ;;  %v1784_v5 = vadd.s32 192, %v1694_v16 }
  0x2a   : > { %v347_v13 = vadd.f32 %v346_v6, %v345_v9 }
  0x2b   : > { %v352_v15 = vadd.f32 %v351_v12, %v349_v10 }
  0x2c   : > { %v355_v17 = vadd.f32 1.0, %v347_v13 }
  0x2d   : > { %v354_v18 = vadd.f32 %v353_v14, %v352_v15 }
  0x2e   : > { %v356_v19 = vmul.f32 7.5, %v355_v17 }
  0x2f   : > { %v357_v20 = vadd.f32 1.0, %v354_v18 }
  0x30   : > { %v359_v24 = vfloor.f32 %v356_v19 }
  0x31   : > { %v358_v28 = vmul.f32 7.5, %v357_v20 }
  0x32   : > { %v361_v32 = vsub.f32 %v356_v19, %v359_v24  ;;  %v1521_v33 = vtrunc.f32 %v359_v24 }
  0x33   : > { %v360_v36 = vfloor.f32 %v358_v28 }
  0x34   : > { %v1522_v40 = vcvt.f32.s32 %v1521_v33  ;;  %v400_v46 = vsub.f32 1.0, %v361_v32 }
  0x35   : > { %v362_v44 = vsub.f32 %v358_v28, %v360_v36  ;;  %v1523_v45 = vtrunc.f32 %v360_v36 }
  0x36   : > { %v365_v48 = vadd.s32 1, %v1522_v40  ;;  %vm403_vm0 = vcmp.ge.s32.totalorder %v1522_v40, 0  ;;  %vm404_vm1 = vcmp.lt.s32.totalorder %v1522_v40, 16 }
  0x37   : > { %v1524_v50 = vcvt.f32.s32 %v1523_v45  ;;  %v401_v51 = vsub.f32 1.0, %v362_v44  ;;  %vm1753_vm2 = vmand %vm403_vm0, %vm404_vm1  ;;  %v779_v62 = vmul.f32 %v400_v46, %v362_v44  ;;  %v998_v63 = vmul.f32 %v362_v44, %v361_v32 }
  0x38   : > { %vm561_vm3 = vcmp.ge.s32.totalorder %v365_v48, 0  ;;  %vm562_vm4 = vcmp.lt.s32.totalorder %v365_v48, 16 }
  0x39   : > { %v366_v57 = vadd.s32 1, %v1524_v50  ;;  %v402_v58 = vmul.f32 %v401_v51, %v400_v46  ;;  %vm406_vm5 = vcmp.ge.s32.totalorder %v1524_v50, 0  ;;  %vm408_vm6 = vcmp.lt.s32.totalorder %v1524_v50, 16  ;;  %vm1769_vm7 = vmand %vm561_vm3, %vm562_vm4 }
  0x3a   : > { %vm407_vm8 = vmand %vm1753_vm2, %vm406_vm5  ;;  %v411_v60 = vmul.u32 16, %v1524_v50  ;;  %v560_v61 = vmul.f32 %v401_v51, %v361_v32 }
  0x3b   : > { %vm409_vm9 = vmand %vm407_vm8, %vm408_vm6  ;;  %vm780_vm10 = vcmp.ge.s32.totalorder %v366_v57, 0  ;;  %vm782_vm11 = vcmp.lt.s32.totalorder %v366_v57, 16  ;;  %v785_v0 = vmul.u32 16, %v366_v57 }
  0x3c   : > { %v410_v2 = vsel %vm409_vm9, %v402_v58, 0.0  ;;  %v412_v3 = vadd.s32 %v1522_v40, %v411_v60  ;;  %vm564_vm12 = vmand %vm1769_vm7, %vm406_vm5  ;;  %v567_v4 = vadd.s32 %v411_v60, %v365_v48 }
  0x3d   : > { %v1787_v6 = vrot.slane %v410_v2, %v1700_v22  ;;  %vm565_vm13 = vmand %vm564_vm12, %vm408_vm6  ;;  %v786_v7 = vadd.s32 %v1522_v40, %v785_v0  ;;  %v1002_v8 = vadd.s32 %v785_v0, %v365_v48  ;;  %v1791_v9 = vrot.slane %v410_v2, %v1703_v23 }
  0x3e   : > { %v1794_v10 = vrot.slane %v412_v3, %v1700_v22  ;;  %v566_v11 = vsel %vm565_vm13, %v560_v61, 0.0  ;;  %v1797_v12 = vrot.slane %v567_v4, %v1700_v22  ;;  %vm781_vm14 = vmand %vm1753_vm2, %vm780_vm10  ;;  %v1803_v13 = vrot.slane %v412_v3, %v1703_v23 }
  0x3f   : > { %v1806_v14 = vrot.slane %v566_v11, %v1700_v22  ;;  %vm783_vm15 = vmand %vm781_vm14, %vm782_vm11  ;;  %v1810_v15 = vrot.slane %v786_v7, %v1700_v22  ;;  %v1813_v17 = vrot.slane %v1002_v8, %v1700_v22  ;;  %v1816_v18 = vrot.slane %v567_v4, %v1703_v23 }
  0x40   : > { %vm452_vm0 = vcmp.eq.s32.totalorder %v1697_v21, %v1794_v10  ;;  %vm607_vm1 = vcmp.eq.s32.totalorder %v1697_v21, %v1797_v12  ;;  %v784_v19 = vsel %vm783_vm15, %v779_v62, 0.0  ;;  %vm999_vm2 = vmand %vm1769_vm7, %vm780_vm10  ;;  %vm451_vm3 = vcmp.eq.s32.totalorder %v1697_v21, %v1803_v13 }
  0x41   : > { %v527_v20 = vsel %vm452_vm0, %v1787_v6, 0.0  ;;  %v682_v24 = vsel %vm607_vm1, %v1806_v14, 0.0  ;;  %vm826_vm4 = vcmp.eq.s32.totalorder %v1697_v21, %v1810_v15  ;;  %v1832_v28 = vrot.slane %v784_v19, %v1700_v22  ;;  %vm1000_vm5 = vmand %vm999_vm2, %vm782_vm11 }
  0x42   : > { %v746_v32 = vadd.f32 %v682_v24, %v527_v20  ;;  %v1001_v33 = vsel %vm1000_vm5, %v998_v63, 0.0  ;;  %vm1042_vm6 = vcmp.eq.s32.totalorder %v1697_v21, %v1813_v17  ;;  %v526_v36 = vsel %vm451_vm3, %v1791_v9, 0.0 }
  0x43   : > { %v901_v40 = vsel %vm826_vm4, %v1832_v28, 0.0  ;;  %v1840_v44 = vrot.slane %v1001_v33, %v1700_v22  ;;  %vm606_vm7 = vcmp.eq.s32.totalorder %v1697_v21, %v1816_v18  ;;  %v1845_v45 = vrot.slane %v566_v11, %v1703_v23 }
  0x44   : > { %v965_v46 = vadd.f32 %v901_v40, %v746_v32  ;;  %v1848_v48 = vrot.slane %v786_v7, %v1703_v23  ;;  %v1851_v50 = vrot.slane %v784_v19, %v1703_v23  ;;  %v1854_v51 = vrot.slane %v1002_v8, %v1703_v23 }
  0x45   : > { %v1117_v52 = vsel %vm1042_vm6, %v1840_v44, 0.0  ;;  %v681_v22 = vsel %vm606_vm7, %v1845_v45, 0.0  ;;  %v1859_v57 = vrot.slane %v1001_v33, %v1703_v23  ;;  %vm450_vm8 = vcmp.eq.s32.totalorder %v1706_v25, %v1794_v10 }
  0x46   : > { %v1181_v58 = vadd.f32 %v1117_v52, %v965_v46  ;;  %v745_v59 = vadd.f32 %v681_v22, %v526_v36  ;;  %vm825_vm9 = vcmp.eq.s32.totalorder %v1697_v21, %v1848_v48  ;;  %vm1041_vm10 = vcmp.eq.s32.totalorder %v1697_v21, %v1854_v51 }
  0x47   : > { %v900_v60 = vsel %vm825_vm9, %v1851_v50, 0.0  ;;  %v1116_v61 = vsel %vm1041_vm10, %v1859_v57, 0.0  ;;  %v525_v62 = vsel %vm450_vm8, %v1787_v6, 0.0  ;;  %vm605_vm11 = vcmp.eq.s32.totalorder %v1706_v25, %v1797_v12 }
  0x48   : > { %1218 = vmatprep.subr.mxu0 %v1181_v58  ;;  %v964_v23 = vadd.f32 %v900_v60, %v745_v59  ;;  %v680_v63 = vsel %vm605_vm11, %v1806_v14, 0.0  ;;  %vm824_vm12 = vcmp.eq.s32.totalorder %v1706_v25, %v1810_v15  ;;  %vm1040_vm13 = vcmp.eq.s32.totalorder %v1706_v25, %v1813_v17 }
  0x49   : > { %v744_v21 = vadd.f32 %v680_v63, %v525_v62  ;;  %v899_v0 = vsel %vm824_vm12, %v1832_v28, 0.0  ;;  %v1115_v2 = vsel %vm1040_vm13, %v1840_v44, 0.0  ;;  %vm449_vm14 = vcmp.eq.s32.totalorder %v1706_v25, %v1803_v13 }
  0x4a   : > { %v1180_v3 = vadd.f32 %v1116_v61, %v964_v23  ;;  %v524_v4 = vsel %vm449_vm14, %v1791_v9, 0.0  ;;  %vm604_vm15 = vcmp.eq.s32.totalorder %v1706_v25, %v1816_v18  ;;  %vm823_vm0 = vcmp.eq.s32.totalorder %v1706_v25, %v1848_v48 }
  0x4b   : > { %v963_v7 = vadd.f32 %v899_v0, %v744_v21  ;;  %v679_v8 = vsel %vm604_vm15, %v1845_v45, 0.0  ;;  %v898_v11 = vsel %vm823_vm0, %v1851_v50, 0.0  ;;  %vm1039_vm1 = vcmp.eq.s32.totalorder %v1706_v25, %v1854_v51 }
  0x4c   : > { %1219 = vmatpush1.msra.mxu0 %v1180_v3  ;;  %v743_v19 = vadd.f32 %v679_v8, %v524_v4  ;;  %v1114_v20 = vsel %vm1039_vm1, %v1859_v57, 0.0  ;;  %vm448_vm2 = vcmp.eq.s32.totalorder %v1709_v26, %v1794_v10  ;;  %vm603_vm3 = vcmp.eq.s32.totalorder %v1709_v26, %v1797_v12 }
  0x4d   : > { %v1179_v24 = vadd.f32 %v1115_v2, %v963_v7  ;;  %v523_v32 = vsel %vm448_vm2, %v1787_v6, 0.0  ;;  %v678_v33 = vsel %vm603_vm3, %v1806_v14, 0.0  ;;  %vm822_vm4 = vcmp.eq.s32.totalorder %v1709_v26, %v1810_v15 }
  0x4e   : > { %v962_v36 = vadd.f32 %v898_v11, %v743_v19  ;;  %v742_v25 = vadd.f32 %v678_v33, %v523_v32  ;;  %v897_v40 = vsel %vm822_vm4, %v1832_v28, 0.0  ;;  %vm1038_vm5 = vcmp.eq.s32.totalorder %v1709_v26, %v1813_v17 }
  0x4f   : > { %1220 = vmatprep.subr.mxu0 %v1179_v24  ;;  %v1113_v46 = vsel %vm1038_vm5, %v1840_v44, 0.0  ;;  %vm447_vm6 = vcmp.eq.s32.totalorder %v1709_v26, %v1803_v13  ;;  %vm602_vm7 = vcmp.eq.s32.totalorder %v1709_v26, %v1816_v18  ;;  %vm821_vm8 = vcmp.eq.s32.totalorder %v1709_v26, %v1848_v48 }
  0x50   : > { %v1178_v52 = vadd.f32 %v1114_v20, %v962_v36  ;;  %v961_v22 = vadd.f32 %v897_v40, %v742_v25  ;;  %v522_v58 = vsel %vm447_vm6, %v1791_v9, 0.0  ;;  %v677_v59 = vsel %vm602_vm7, %v1845_v45, 0.0 }
  0x51   : > { %v741_v60 = vadd.f32 %v677_v59, %v522_v58  ;;  %v896_v61 = vsel %vm821_vm8, %v1851_v50, 0.0  ;;  %vm1037_vm9 = vcmp.eq.s32.totalorder %v1709_v26, %v1854_v51  ;;  %vm446_vm10 = vcmp.eq.s32.totalorder %v1712_v27, %v1794_v10 }
  0x52   : > { %1221 = vmatpush1.msra.mxu0 %v1178_v52  ;;  %v1177_v62 = vadd.f32 %v1113_v46, %v961_v22  ;;  %v1112_v23 = vsel %vm1037_vm9, %v1859_v57, 0.0  ;;  %v521_v63 = vsel %vm446_vm10, %v1787_v6, 0.0  ;;  %vm601_vm11 = vcmp.eq.s32.totalorder %v1712_v27, %v1797_v12 }
  0x53   : > { %v960_v21 = vadd.f32 %v896_v61, %v741_v60  ;;  %v676_v0 = vsel %vm601_vm11, %v1806_v14, 0.0  ;;  %vm820_vm12 = vcmp.eq.s32.totalorder %v1712_v27, %v1810_v15  ;;  %vm1036_vm13 = vcmp.eq.s32.totalorder %v1712_v27, %v1813_v17 }
  0x54   : > { %1222 = vmatprep.subr.mxu0 %v1177_v62  ;;  %v740_v26 = vadd.f32 %v676_v0, %v521_v63  ;;  %v895_v2 = vsel %vm820_vm12, %v1832_v28, 0.0  ;;  %v1111_v3 = vsel %vm1036_vm13, %v1840_v44, 0.0  ;;  %vm445_vm14 = vcmp.eq.s32.totalorder %v1712_v27, %v1803_v13 }
  0x55   : > { %v1176_v4 = vadd.f32 %v1112_v23, %v960_v21  ;;  %v520_v7 = vsel %vm445_vm14, %v1791_v9, 0.0  ;;  %vm600_vm15 = vcmp.eq.s32.totalorder %v1712_v27, %v1816_v18  ;;  %vm819_vm0 = vcmp.eq.s32.totalorder %v1712_v27, %v1848_v48 }
  0x56   : > { %v959_v8 = vadd.f32 %v895_v2, %v740_v26  ;;  %v675_v11 = vsel %vm600_vm15, %v1845_v45, 0.0  ;;  %v894_v19 = vsel %vm819_vm0, %v1851_v50, 0.0  ;;  %vm1035_vm1 = vcmp.eq.s32.totalorder %v1712_v27, %v1854_v51 }
  0x57   : > { %1223 = vmatpush1.msra.mxu0 %v1176_v4  ;;  %v739_v20 = vadd.f32 %v675_v11, %v520_v7  ;;  %v1110_v24 = vsel %vm1035_vm1, %v1859_v57, 0.0  ;;  %vm444_vm2 = vcmp.eq.s32.totalorder %v1715_v29, %v1794_v10  ;;  %vm599_vm3 = vcmp.eq.s32.totalorder %v1715_v29, %v1797_v12 }
  0x58   : > { %v1175_v32 = vadd.f32 %v1111_v3, %v959_v8  ;;  %v519_v33 = vsel %vm444_vm2, %v1787_v6, 0.0  ;;  %v674_v36 = vsel %vm599_vm3, %v1806_v14, 0.0  ;;  %vm818_vm4 = vcmp.eq.s32.totalorder %v1715_v29, %v1810_v15 }
  0x59   : > { %v958_v25 = vadd.f32 %v894_v19, %v739_v20  ;;  %v738_v27 = vadd.f32 %v674_v36, %v519_v33  ;;  %v893_v40 = vsel %vm818_vm4, %v1832_v28, 0.0  ;;  %vm1034_vm5 = vcmp.eq.s32.totalorder %v1715_v29, %v1813_v17 }
  0x5a   : > { %1224 = vmatprep.subr.mxu0 %v1175_v32  ;;  %v1109_v46 = vsel %vm1034_vm5, %v1840_v44, 0.0  ;;  %vm443_vm6 = vcmp.eq.s32.totalorder %v1715_v29, %v1803_v13  ;;  %vm598_vm7 = vcmp.eq.s32.totalorder %v1715_v29, %v1816_v18  ;;  %vm817_vm8 = vcmp.eq.s32.totalorder %v1715_v29, %v1848_v48 }
  0x5b   : > { %v1174_v52 = vadd.f32 %v1110_v24, %v958_v25  ;;  %v957_v22 = vadd.f32 %v893_v40, %v738_v27  ;;  %v518_v58 = vsel %vm443_vm6, %v1791_v9, 0.0  ;;  %v673_v59 = vsel %vm598_vm7, %v1845_v45, 0.0 }
  0x5c   : > { %v737_v60 = vadd.f32 %v673_v59, %v518_v58  ;;  %v892_v61 = vsel %vm817_vm8, %v1851_v50, 0.0  ;;  %vm1033_vm9 = vcmp.eq.s32.totalorder %v1715_v29, %v1854_v51  ;;  %vm442_vm10 = vcmp.eq.s32.totalorder %v1718_v30, %v1794_v10 }
  0x5d   : > { %1225 = vmatpush1.msra.mxu0 %v1174_v52  ;;  %v1173_v62 = vadd.f32 %v1109_v46, %v957_v22  ;;  %v1108_v23 = vsel %vm1033_vm9, %v1859_v57, 0.0  ;;  %v517_v63 = vsel %vm442_vm10, %v1787_v6, 0.0  ;;  %vm597_vm11 = vcmp.eq.s32.totalorder %v1718_v30, %v1797_v12 }
  0x5e   : > { %v956_v21 = vadd.f32 %v892_v61, %v737_v60  ;;  %v672_v0 = vsel %vm597_vm11, %v1806_v14, 0.0  ;;  %vm816_vm12 = vcmp.eq.s32.totalorder %v1718_v30, %v1810_v15  ;;  %vm1032_vm13 = vcmp.eq.s32.totalorder %v1718_v30, %v1813_v17 }
  0x5f   : > { %1226 = vmatprep.subr.mxu0 %v1173_v62  ;;  %v736_v29 = vadd.f32 %v672_v0, %v517_v63  ;;  %v891_v26 = vsel %vm816_vm12, %v1832_v28, 0.0  ;;  %v1107_v2 = vsel %vm1032_vm13, %v1840_v44, 0.0  ;;  %vm441_vm14 = vcmp.eq.s32.totalorder %v1718_v30, %v1803_v13 }
  0x60   : > { %v1172_v3 = vadd.f32 %v1108_v23, %v956_v21  ;;  %v516_v4 = vsel %vm441_vm14, %v1791_v9, 0.0  ;;  %vm596_vm15 = vcmp.eq.s32.totalorder %v1718_v30, %v1816_v18  ;;  %vm815_vm0 = vcmp.eq.s32.totalorder %v1718_v30, %v1848_v48 }
  0x61   : > { %v955_v7 = vadd.f32 %v891_v26, %v736_v29  ;;  %v671_v8 = vsel %vm596_vm15, %v1845_v45, 0.0  ;;  %v890_v11 = vsel %vm815_vm0, %v1851_v50, 0.0  ;;  %vm1031_vm1 = vcmp.eq.s32.totalorder %v1718_v30, %v1854_v51 }
  0x62   : > { %1227 = vmatpush1.msra.mxu0 %v1172_v3  ;;  %v735_v19 = vadd.f32 %v671_v8, %v516_v4  ;;  %v1106_v20 = vsel %vm1031_vm1, %v1859_v57, 0.0  ;;  %vm440_vm2 = vcmp.eq.s32.totalorder %v1721_v31, %v1794_v10  ;;  %vm595_vm3 = vcmp.eq.s32.totalorder %v1721_v31, %v1797_v12 }
  0x63   : > { %v1171_v24 = vadd.f32 %v1107_v2, %v955_v7  ;;  %v515_v32 = vsel %vm440_vm2, %v1787_v6, 0.0  ;;  %v670_v33 = vsel %vm595_vm3, %v1806_v14, 0.0  ;;  %vm814_vm4 = vcmp.eq.s32.totalorder %v1721_v31, %v1810_v15 }
  0x64   : > { %v954_v36 = vadd.f32 %v890_v11, %v735_v19  ;;  %v734_v30 = vadd.f32 %v670_v33, %v515_v32  ;;  %v889_v25 = vsel %vm814_vm4, %v1832_v28, 0.0  ;;  %vm1030_vm5 = vcmp.eq.s32.totalorder %v1721_v31, %v1813_v17 }
  0x65   : > { %1228 = vmatprep.subr.mxu0 %v1171_v24  ;;  %v1105_v27 = vsel %vm1030_vm5, %v1840_v44, 0.0  ;;  %vm439_vm6 = vcmp.eq.s32.totalorder %v1721_v31, %v1803_v13  ;;  %vm594_vm7 = vcmp.eq.s32.totalorder %v1721_v31, %v1816_v18  ;;  %vm813_vm8 = vcmp.eq.s32.totalorder %v1721_v31, %v1848_v48 }
  0x66   : > { %v1170_v40 = vadd.f32 %v1106_v20, %v954_v36  ;;  %v953_v46 = vadd.f32 %v889_v25, %v734_v30  ;;  %v514_v52 = vsel %vm439_vm6, %v1791_v9, 0.0  ;;  %v669_v22 = vsel %vm594_vm7, %v1845_v45, 0.0 }
  0x67   : > { %v733_v58 = vadd.f32 %v669_v22, %v514_v52  ;;  %v888_v59 = vsel %vm813_vm8, %v1851_v50, 0.0  ;;  %vm1029_vm9 = vcmp.eq.s32.totalorder %v1721_v31, %v1854_v51  ;;  %vm438_vm10 = vcmp.eq.s32.totalorder %v1724_v34, %v1794_v10 }
  0x68   : > { %1229 = vmatpush1.msra.mxu0 %v1170_v40  ;;  %v1169_v60 = vadd.f32 %v1105_v27, %v953_v46  ;;  %v1104_v61 = vsel %vm1029_vm9, %v1859_v57, 0.0  ;;  %v513_v62 = vsel %vm438_vm10, %v1787_v6, 0.0  ;;  %vm593_vm11 = vcmp.eq.s32.totalorder %v1724_v34, %v1797_v12 }
  0x69   : > { %v952_v23 = vadd.f32 %v888_v59, %v733_v58  ;;  %v668_v63 = vsel %vm593_vm11, %v1806_v14, 0.0  ;;  %vm812_vm12 = vcmp.eq.s32.totalorder %v1724_v34, %v1810_v15  ;;  %vm1028_vm13 = vcmp.eq.s32.totalorder %v1724_v34, %v1813_v17 }
  0x6a   : > { %1230 = vmatprep.subr.mxu0 %v1169_v60  ;;  %v732_v31 = vadd.f32 %v668_v63, %v513_v62  ;;  %v887_v21 = vsel %vm812_vm12, %v1832_v28, 0.0  ;;  %v1103_v0 = vsel %vm1028_vm13, %v1840_v44, 0.0  ;;  %vm437_vm14 = vcmp.eq.s32.totalorder %v1724_v34, %v1803_v13 }
  0x6b   : > { %v1168_v29 = vadd.f32 %v1104_v61, %v952_v23  ;;  %v512_v26 = vsel %vm437_vm14, %v1791_v9, 0.0  ;;  %vm592_vm15 = vcmp.eq.s32.totalorder %v1724_v34, %v1816_v18  ;;  %vm811_vm0 = vcmp.eq.s32.totalorder %v1724_v34, %v1848_v48 }
  0x6c   : > { %v951_v2 = vadd.f32 %v887_v21, %v732_v31  ;;  %v667_v3 = vsel %vm592_vm15, %v1845_v45, 0.0  ;;  %v886_v4 = vsel %vm811_vm0, %v1851_v50, 0.0  ;;  %vm1027_vm1 = vcmp.eq.s32.totalorder %v1724_v34, %v1854_v51 }
  0x6d   : > { %1231 = vmatpush1.msra.mxu0 %v1168_v29  ;;  %v731_v7 = vadd.f32 %v667_v3, %v512_v26  ;;  %v1102_v8 = vsel %vm1027_vm1, %v1859_v57, 0.0  ;;  %vm436_vm2 = vcmp.eq.s32.totalorder %v1727_v35, %v1794_v10  ;;  %vm591_vm3 = vcmp.eq.s32.totalorder %v1727_v35, %v1797_v12 }
  0x6e   : > { %v1167_v11 = vadd.f32 %v1103_v0, %v951_v2  ;;  %v511_v19 = vsel %vm436_vm2, %v1787_v6, 0.0  ;;  %v666_v20 = vsel %vm591_vm3, %v1806_v14, 0.0  ;;  %vm810_vm4 = vcmp.eq.s32.totalorder %v1727_v35, %v1810_v15 }
  0x6f   : > { %v950_v24 = vadd.f32 %v886_v4, %v731_v7  ;;  %v730_v34 = vadd.f32 %v666_v20, %v511_v19  ;;  %v885_v32 = vsel %vm810_vm4, %v1832_v28, 0.0  ;;  %vm1026_vm5 = vcmp.eq.s32.totalorder %v1727_v35, %v1813_v17 }
  0x70   : > { %1232 = vmatprep.subr.mxu0 %v1167_v11  ;;  %v1101_v33 = vsel %vm1026_vm5, %v1840_v44, 0.0  ;;  %vm435_vm6 = vcmp.eq.s32.totalorder %v1727_v35, %v1803_v13  ;;  %vm590_vm7 = vcmp.eq.s32.totalorder %v1727_v35, %v1816_v18  ;;  %vm809_vm8 = vcmp.eq.s32.totalorder %v1727_v35, %v1848_v48 }
  0x71   : > { %v1166_v36 = vadd.f32 %v1102_v8, %v950_v24  ;;  %v949_v30 = vadd.f32 %v885_v32, %v730_v34  ;;  %v510_v25 = vsel %vm435_vm6, %v1791_v9, 0.0  ;;  %v665_v27 = vsel %vm590_vm7, %v1845_v45, 0.0 }
  0x72   : > { %v729_v40 = vadd.f32 %v665_v27, %v510_v25  ;;  %v884_v46 = vsel %vm809_vm8, %v1851_v50, 0.0  ;;  %vm1025_vm9 = vcmp.eq.s32.totalorder %v1727_v35, %v1854_v51  ;;  %vm434_vm10 = vcmp.eq.s32.totalorder %v1730_v37, %v1794_v10 }
  0x73   : > { %1233 = vmatpush1.msra.mxu0 %v1166_v36  ;;  %v1165_v52 = vadd.f32 %v1101_v33, %v949_v30  ;;  %v1100_v22 = vsel %vm1025_vm9, %v1859_v57, 0.0  ;;  %v509_v58 = vsel %vm434_vm10, %v1787_v6, 0.0  ;;  %vm589_vm11 = vcmp.eq.s32.totalorder %v1730_v37, %v1797_v12 }
  0x74   : > { %v948_v59 = vadd.f32 %v884_v46, %v729_v40  ;;  %v664_v60 = vsel %vm589_vm11, %v1806_v14, 0.0  ;;  %vm808_vm12 = vcmp.eq.s32.totalorder %v1730_v37, %v1810_v15  ;;  %vm1024_vm13 = vcmp.eq.s32.totalorder %v1730_v37, %v1813_v17 }
  0x75   : > { %1234 = vmatprep.subr.mxu0 %v1165_v52  ;;  %v728_v35 = vadd.f32 %v664_v60, %v509_v58  ;;  %v883_v61 = vsel %vm808_vm12, %v1832_v28, 0.0  ;;  %v1099_v62 = vsel %vm1024_vm13, %v1840_v44, 0.0  ;;  %vm433_vm14 = vcmp.eq.s32.totalorder %v1730_v37, %v1803_v13 }
  0x76   : > { %v1164_v23 = vadd.f32 %v1100_v22, %v948_v59  ;;  %v508_v63 = vsel %vm433_vm14, %v1791_v9, 0.0  ;;  %vm588_vm15 = vcmp.eq.s32.totalorder %v1730_v37, %v1816_v18  ;;  %vm807_vm0 = vcmp.eq.s32.totalorder %v1730_v37, %v1848_v48 }
  0x77   : > { %v947_v31 = vadd.f32 %v883_v61, %v728_v35  ;;  %v663_v21 = vsel %vm588_vm15, %v1845_v45, 0.0  ;;  %v882_v0 = vsel %vm807_vm0, %v1851_v50, 0.0  ;;  %vm1023_vm1 = vcmp.eq.s32.totalorder %v1730_v37, %v1854_v51 }
  0x78   : > { %1235 = vmatpush1.msra.mxu0 %v1164_v23  ;;  %v727_v29 = vadd.f32 %v663_v21, %v508_v63  ;;  %v1098_v26 = vsel %vm1023_vm1, %v1859_v57, 0.0  ;;  %vm432_vm2 = vcmp.eq.s32.totalorder %v1733_v38, %v1794_v10  ;;  %vm587_vm3 = vcmp.eq.s32.totalorder %v1733_v38, %v1797_v12 }
  0x79   : > { %v1163_v2 = vadd.f32 %v1099_v62, %v947_v31  ;;  %v507_v3 = vsel %vm432_vm2, %v1787_v6, 0.0  ;;  %v662_v4 = vsel %vm587_vm3, %v1806_v14, 0.0  ;;  %vm806_vm4 = vcmp.eq.s32.totalorder %v1733_v38, %v1810_v15 }
  0x7a   : > { %v946_v7 = vadd.f32 %v882_v0, %v727_v29  ;;  %v726_v37 = vadd.f32 %v662_v4, %v507_v3  ;;  %v881_v8 = vsel %vm806_vm4, %v1832_v28, 0.0  ;;  %vm1022_vm5 = vcmp.eq.s32.totalorder %v1733_v38, %v1813_v17 }
  0x7b   : > { %1236 = vmatprep.subr.mxu0 %v1163_v2  ;;  %v1097_v11 = vsel %vm1022_vm5, %v1840_v44, 0.0  ;;  %vm431_vm6 = vcmp.eq.s32.totalorder %v1733_v38, %v1803_v13  ;;  %vm586_vm7 = vcmp.eq.s32.totalorder %v1733_v38, %v1816_v18  ;;  %vm805_vm8 = vcmp.eq.s32.totalorder %v1733_v38, %v1848_v48 }
  0x7c   : > { %v1162_v19 = vadd.f32 %v1098_v26, %v946_v7  ;;  %v945_v20 = vadd.f32 %v881_v8, %v726_v37  ;;  %v506_v24 = vsel %vm431_vm6, %v1791_v9, 0.0  ;;  %v661_v34 = vsel %vm586_vm7, %v1845_v45, 0.0 }
  0x7d   : > { %v725_v32 = vadd.f32 %v661_v34, %v506_v24  ;;  %v880_v33 = vsel %vm805_vm8, %v1851_v50, 0.0  ;;  %vm1021_vm9 = vcmp.eq.s32.totalorder %v1733_v38, %v1854_v51  ;;  %vm430_vm10 = vcmp.eq.s32.totalorder %v1736_v39, %v1794_v10 }
  0x7e   : > { %1237 = vmatpush1.msra.mxu0 %v1162_v19  ;;  %v1161_v36 = vadd.f32 %v1097_v11, %v945_v20  ;;  %v1096_v30 = vsel %vm1021_vm9, %v1859_v57, 0.0  ;;  %v505_v25 = vsel %vm430_vm10, %v1787_v6, 0.0  ;;  %vm585_vm11 = vcmp.eq.s32.totalorder %v1736_v39, %v1797_v12 }
  0x7f   : > { %v944_v27 = vadd.f32 %v880_v33, %v725_v32  ;;  %v660_v40 = vsel %vm585_vm11, %v1806_v14, 0.0  ;;  %vm804_vm12 = vcmp.eq.s32.totalorder %v1736_v39, %v1810_v15  ;;  %vm1020_vm13 = vcmp.eq.s32.totalorder %v1736_v39, %v1813_v17 }
  0x80   : > { %1238 = vmatprep.subr.mxu0 %v1161_v36  ;;  %v724_v38 = vadd.f32 %v660_v40, %v505_v25  ;;  %v879_v46 = vsel %vm804_vm12, %v1832_v28, 0.0  ;;  %v1095_v52 = vsel %vm1020_vm13, %v1840_v44, 0.0  ;;  %vm429_vm14 = vcmp.eq.s32.totalorder %v1736_v39, %v1803_v13 }
  0x81   : > { %v1160_v22 = vadd.f32 %v1096_v30, %v944_v27  ;;  %v504_v58 = vsel %vm429_vm14, %v1791_v9, 0.0  ;;  %vm584_vm15 = vcmp.eq.s32.totalorder %v1736_v39, %v1816_v18  ;;  %vm803_vm0 = vcmp.eq.s32.totalorder %v1736_v39, %v1848_v48 }
  0x82   : > { %v943_v59 = vadd.f32 %v879_v46, %v724_v38  ;;  %v659_v60 = vsel %vm584_vm15, %v1845_v45, 0.0  ;;  %v878_v35 = vsel %vm803_vm0, %v1851_v50, 0.0  ;;  %vm1019_vm1 = vcmp.eq.s32.totalorder %v1736_v39, %v1854_v51 }
  0x83   : > { %1239 = vmatpush1.msra.mxu0 %v1160_v22  ;;  %v723_v61 = vadd.f32 %v659_v60, %v504_v58  ;;  %v1094_v62 = vsel %vm1019_vm1, %v1859_v57, 0.0  ;;  %vm428_vm2 = vcmp.eq.s32.totalorder %v1739_v41, %v1794_v10  ;;  %vm583_vm3 = vcmp.eq.s32.totalorder %v1739_v41, %v1797_v12 }
  0x84   : > { %v1159_v23 = vadd.f32 %v1095_v52, %v943_v59  ;;  %v503_v63 = vsel %vm428_vm2, %v1787_v6, 0.0  ;;  %v658_v31 = vsel %vm583_vm3, %v1806_v14, 0.0  ;;  %vm802_vm4 = vcmp.eq.s32.totalorder %v1739_v41, %v1810_v15 }
  0x85   : > { %v942_v21 = vadd.f32 %v878_v35, %v723_v61  ;;  %v722_v39 = vadd.f32 %v658_v31, %v503_v63  ;;  %v877_v0 = vsel %vm802_vm4, %v1832_v28, 0.0  ;;  %vm1018_vm5 = vcmp.eq.s32.totalorder %v1739_v41, %v1813_v17 }
  0x86   : > { %1240 = vmatprep.subr.mxu0 %v1159_v23  ;;  %v1093_v29 = vsel %vm1018_vm5, %v1840_v44, 0.0  ;;  %vm427_vm6 = vcmp.eq.s32.totalorder %v1739_v41, %v1803_v13  ;;  %vm582_vm7 = vcmp.eq.s32.totalorder %v1739_v41, %v1816_v18  ;;  %vm801_vm8 = vcmp.eq.s32.totalorder %v1739_v41, %v1848_v48 }
  0x87   : > { %v1158_v26 = vadd.f32 %v1094_v62, %v942_v21  ;;  %v941_v2 = vadd.f32 %v877_v0, %v722_v39  ;;  %v502_v3 = vsel %vm427_vm6, %v1791_v9, 0.0  ;;  %v657_v4 = vsel %vm582_vm7, %v1845_v45, 0.0 }
  0x88   : > { %v721_v7 = vadd.f32 %v657_v4, %v502_v3  ;;  %v876_v37 = vsel %vm801_vm8, %v1851_v50, 0.0  ;;  %vm1017_vm9 = vcmp.eq.s32.totalorder %v1739_v41, %v1854_v51  ;;  %vm426_vm10 = vcmp.eq.s32.totalorder %v1742_v42, %v1794_v10 }
  0x89   : > { %1241 = vmatpush1.msra.mxu0 %v1158_v26  ;;  %v1157_v8 = vadd.f32 %v1093_v29, %v941_v2  ;;  %v1092_v11 = vsel %vm1017_vm9, %v1859_v57, 0.0  ;;  %v501_v19 = vsel %vm426_vm10, %v1787_v6, 0.0  ;;  %vm581_vm11 = vcmp.eq.s32.totalorder %v1742_v42, %v1797_v12 }
  0x8a   : > { %v940_v20 = vadd.f32 %v876_v37, %v721_v7  ;;  %v656_v24 = vsel %vm581_vm11, %v1806_v14, 0.0  ;;  %vm800_vm12 = vcmp.eq.s32.totalorder %v1742_v42, %v1810_v15  ;;  %vm1016_vm13 = vcmp.eq.s32.totalorder %v1742_v42, %v1813_v17 }
  0x8b   : > { %1242 = vmatprep.subr.mxu0 %v1157_v8  ;;  %v720_v41 = vadd.f32 %v656_v24, %v501_v19  ;;  %v875_v34 = vsel %vm800_vm12, %v1832_v28, 0.0  ;;  %v1091_v32 = vsel %vm1016_vm13, %v1840_v44, 0.0  ;;  %vm425_vm14 = vcmp.eq.s32.totalorder %v1742_v42, %v1803_v13 }
  0x8c   : > { %v1156_v33 = vadd.f32 %v1092_v11, %v940_v20  ;;  %v500_v36 = vsel %vm425_vm14, %v1791_v9, 0.0  ;;  %vm580_vm15 = vcmp.eq.s32.totalorder %v1742_v42, %v1816_v18  ;;  %vm799_vm0 = vcmp.eq.s32.totalorder %v1742_v42, %v1848_v48 }
  0x8d   : > { %v939_v30 = vadd.f32 %v875_v34, %v720_v41  ;;  %v655_v25 = vsel %vm580_vm15, %v1845_v45, 0.0  ;;  %v874_v27 = vsel %vm799_vm0, %v1851_v50, 0.0  ;;  %vm1015_vm1 = vcmp.eq.s32.totalorder %v1742_v42, %v1854_v51 }
  0x8e   : > { %1243 = vmatpush1.msra.mxu0 %v1156_v33  ;;  %v719_v40 = vadd.f32 %v655_v25, %v500_v36  ;;  %v1090_v38 = vsel %vm1015_vm1, %v1859_v57, 0.0  ;;  %vm424_vm2 = vcmp.eq.s32.totalorder %v1745_v43, %v1794_v10  ;;  %vm579_vm3 = vcmp.eq.s32.totalorder %v1745_v43, %v1797_v12 }
  0x8f   : > { %v1155_v46 = vadd.f32 %v1091_v32, %v939_v30  ;;  %v499_v52 = vsel %vm424_vm2, %v1787_v6, 0.0  ;;  %v654_v22 = vsel %vm579_vm3, %v1806_v14, 0.0  ;;  %vm798_vm4 = vcmp.eq.s32.totalorder %v1745_v43, %v1810_v15 }
  0x90   : > { %v938_v58 = vadd.f32 %v874_v27, %v719_v40  ;;  %v718_v42 = vadd.f32 %v654_v22, %v499_v52  ;;  %v873_v59 = vsel %vm798_vm4, %v1832_v28, 0.0  ;;  %vm1014_vm5 = vcmp.eq.s32.totalorder %v1745_v43, %v1813_v17 }
  0x91   : > { %1244 = vmatprep.subr.mxu0 %v1155_v46  ;;  %v1089_v60 = vsel %vm1014_vm5, %v1840_v44, 0.0  ;;  %vm423_vm6 = vcmp.eq.s32.totalorder %v1745_v43, %v1803_v13  ;;  %vm578_vm7 = vcmp.eq.s32.totalorder %v1745_v43, %v1816_v18  ;;  %vm797_vm8 = vcmp.eq.s32.totalorder %v1745_v43, %v1848_v48 }
  0x92   : > { %v1154_v35 = vadd.f32 %v1090_v38, %v938_v58  ;;  %v937_v61 = vadd.f32 %v873_v59, %v718_v42  ;;  %v498_v62 = vsel %vm423_vm6, %v1791_v9, 0.0  ;;  %v653_v23 = vsel %vm578_vm7, %v1845_v45, 0.0 }
  0x93   : > { %v717_v63 = vadd.f32 %v653_v23, %v498_v62  ;;  %v872_v31 = vsel %vm797_vm8, %v1851_v50, 0.0  ;;  %vm1013_vm9 = vcmp.eq.s32.totalorder %v1745_v43, %v1854_v51  ;;  %vm422_vm10 = vcmp.eq.s32.totalorder %v1694_v16, %v1794_v10 }
  0x94   : > { %1245 = vmatpush1.msra.mxu0 %v1154_v35  ;;  %v1153_v21 = vadd.f32 %v1089_v60, %v937_v61  ;;  %v1088_v39 = vsel %vm1013_vm9, %v1859_v57, 0.0  ;;  %v497_v0 = vsel %vm422_vm10, %v1787_v6, 0.0  ;;  %vm577_vm11 = vcmp.eq.s32.totalorder %v1694_v16, %v1797_v12 }
  0x95   : > { %v936_v29 = vadd.f32 %v872_v31, %v717_v63  ;;  %v652_v26 = vsel %vm577_vm11, %v1806_v14, 0.0  ;;  %vm796_vm12 = vcmp.eq.s32.totalorder %v1694_v16, %v1810_v15  ;;  %vm1012_vm13 = vcmp.eq.s32.totalorder %v1694_v16, %v1813_v17 }
  0x96   : > { %1246 = vmatprep.subr.mxu0 %v1153_v21  ;;  %v716_v43 = vadd.f32 %v652_v26, %v497_v0  ;;  %v871_v2 = vsel %vm796_vm12, %v1832_v28, 0.0  ;;  %v1087_v3 = vsel %vm1012_vm13, %v1840_v44, 0.0  ;;  %vm421_vm14 = vcmp.eq.s32.totalorder %v1694_v16, %v1803_v13 }
  0x97   : > { %v1152_v4 = vadd.f32 %v1088_v39, %v936_v29  ;;  %v496_v7 = vsel %vm421_vm14, %v1791_v9, 0.0  ;;  %vm576_vm15 = vcmp.eq.s32.totalorder %v1694_v16, %v1816_v18  ;;  %vm795_vm0 = vcmp.eq.s32.totalorder %v1694_v16, %v1848_v48 }
  0x98   : > { %v935_v37 = vadd.f32 %v871_v2, %v716_v43  ;;  %v651_v8 = vsel %vm576_vm15, %v1845_v45, 0.0  ;;  %v870_v11 = vsel %vm795_vm0, %v1851_v50, 0.0  ;;  %vm1011_vm1 = vcmp.eq.s32.totalorder %v1694_v16, %v1854_v51 }
  0x99   : > { %1247 = vmatpush1.msra.mxu0 %v1152_v4  ;;  %v715_v19 = vadd.f32 %v651_v8, %v496_v7  ;;  %v1086_v20 = vsel %vm1011_vm1, %v1859_v57, 0.0  ;;  %vm484_vm2 = vcmp.eq.s32.totalorder %v1748_v47, %v1794_v10  ;;  %vm639_vm3 = vcmp.eq.s32.totalorder %v1748_v47, %v1797_v12 }
  0x9a   : > { %v1151_v24 = vadd.f32 %v1087_v3, %v935_v37  ;;  %v559_v41 = vsel %vm484_vm2, %v1787_v6, 0.0  ;;  %v714_v34 = vsel %vm639_vm3, %v1806_v14, 0.0  ;;  %vm858_vm4 = vcmp.eq.s32.totalorder %v1748_v47, %v1810_v15 }
  0x9b   : > { %v934_v32 = vadd.f32 %v870_v11, %v715_v19  ;;  %v778_v33 = vadd.f32 %v714_v34, %v559_v41  ;;  %v933_v36 = vsel %vm858_vm4, %v1832_v28, 0.0  ;;  %vm1074_vm5 = vcmp.eq.s32.totalorder %v1748_v47, %v1813_v17 }
  0x9c   : > { %1248 = vmatprep.subr.mxu0 %v1151_v24  ;;  %v1149_v30 = vsel %vm1074_vm5, %v1840_v44, 0.0  ;;  %vm483_vm6 = vcmp.eq.s32.totalorder %v1748_v47, %v1803_v13  ;;  %vm638_vm7 = vcmp.eq.s32.totalorder %v1748_v47, %v1816_v18  ;;  %vm857_vm8 = vcmp.eq.s32.totalorder %v1748_v47, %v1848_v48 }
  0x9d   : > { %v1150_v25 = vadd.f32 %v1086_v20, %v934_v32  ;;  %v997_v27 = vadd.f32 %v933_v36, %v778_v33  ;;  %v558_v40 = vsel %vm483_vm6, %v1791_v9, 0.0  ;;  %v713_v38 = vsel %vm638_vm7, %v1845_v45, 0.0 }
  0x9e   : > { %v777_v46 = vadd.f32 %v713_v38, %v558_v40  ;;  %v932_v52 = vsel %vm857_vm8, %v1851_v50, 0.0  ;;  %vm1073_vm9 = vcmp.eq.s32.totalorder %v1748_v47, %v1854_v51  ;;  %vm482_vm10 = vcmp.eq.s32.totalorder %v1751_v49, %v1794_v10 }
  0x9f   : > { %1249 = vmatpush1.msra.mxu0 %v1150_v25  ;;  %v1213_v22 = vadd.f32 %v1149_v30, %v997_v27  ;;  %v1148_v58 = vsel %vm1073_vm9, %v1859_v57, 0.0  ;;  %v557_v42 = vsel %vm482_vm10, %v1787_v6, 0.0  ;;  %vm637_vm11 = vcmp.eq.s32.totalorder %v1751_v49, %v1797_v12 }
  0xa0   : > { %v996_v59 = vadd.f32 %v932_v52, %v777_v46  ;;  %v712_v60 = vsel %vm637_vm11, %v1806_v14, 0.0  ;;  %vm856_vm12 = vcmp.eq.s32.totalorder %v1751_v49, %v1810_v15  ;;  %vm1072_vm13 = vcmp.eq.s32.totalorder %v1751_v49, %v1813_v17 }
  0xa1   : > { %1250 = vmatprep.subr.mxu0 %v1213_v22  ;;  %v776_v47 = vadd.f32 %v712_v60, %v557_v42  ;;  %v931_v35 = vsel %vm856_vm12, %v1832_v28, 0.0  ;;  %v1147_v61 = vsel %vm1072_vm13, %v1840_v44, 0.0  ;;  %vm481_vm14 = vcmp.eq.s32.totalorder %v1751_v49, %v1803_v13 }
  0xa2   : > { %v1212_v62 = vadd.f32 %v1148_v58, %v996_v59  ;;  %v556_v23 = vsel %vm481_vm14, %v1791_v9, 0.0  ;;  %vm636_vm15 = vcmp.eq.s32.totalorder %v1751_v49, %v1816_v18  ;;  %vm855_vm0 = vcmp.eq.s32.totalorder %v1751_v49, %v1848_v48 }
  0xa3   : > { %v995_v63 = vadd.f32 %v931_v35, %v776_v47  ;;  %v711_v31 = vsel %vm636_vm15, %v1845_v45, 0.0  ;;  %v930_v21 = vsel %vm855_vm0, %v1851_v50, 0.0  ;;  %vm1071_vm1 = vcmp.eq.s32.totalorder %v1751_v49, %v1854_v51 }
  0xa4   : > { %1251 = vmatpush2.msra.mxu0 %v1212_v62  ;;  %v775_v39 = vadd.f32 %v711_v31, %v556_v23  ;;  %v1146_v0 = vsel %vm1071_vm1, %v1859_v57, 0.0  ;;  %vm480_vm2 = vcmp.eq.s32.totalorder %v1758_v53, %v1794_v10  ;;  %vm635_vm3 = vcmp.eq.s32.totalorder %v1758_v53, %v1797_v12 }
  0xa5   : > { %v1211_v29 = vadd.f32 %v1147_v61, %v995_v63  ;;  %v555_v26 = vsel %vm480_vm2, %v1787_v6, 0.0  ;;  %v710_v43 = vsel %vm635_vm3, %v1806_v14, 0.0  ;;  %vm854_vm4 = vcmp.eq.s32.totalorder %v1758_v53, %v1810_v15 }
  0xa6   : > { %v994_v2 = vadd.f32 %v930_v21, %v775_v39  ;;  %v774_v49 = vadd.f32 %v710_v43, %v555_v26  ;;  %v929_v3 = vsel %vm854_vm4, %v1832_v28, 0.0  ;;  %vm1070_vm5 = vcmp.eq.s32.totalorder %v1758_v53, %v1813_v17 }
  0xa7   : > { %1252 = vmatprep.subr.mxu0 %v1211_v29  ;;  %v1145_v4 = vsel %vm1070_vm5, %v1840_v44, 0.0  ;;  %vm479_vm6 = vcmp.eq.s32.totalorder %v1758_v53, %v1803_v13  ;;  %vm634_vm7 = vcmp.eq.s32.totalorder %v1758_v53, %v1816_v18  ;;  %vm853_vm8 = vcmp.eq.s32.totalorder %v1758_v53, %v1848_v48 }
  0xa8   : > { %v1210_v7 = vadd.f32 %v1146_v0, %v994_v2  ;;  %v993_v37 = vadd.f32 %v929_v3, %v774_v49  ;;  %v554_v8 = vsel %vm479_vm6, %v1791_v9, 0.0  ;;  %v709_v11 = vsel %vm634_vm7, %v1845_v45, 0.0 }
  0xa9   : > { %v773_v19 = vadd.f32 %v709_v11, %v554_v8  ;;  %v928_v20 = vsel %vm853_vm8, %v1851_v50, 0.0  ;;  %vm1069_vm9 = vcmp.eq.s32.totalorder %v1758_v53, %v1854_v51  ;;  %vm478_vm10 = vcmp.eq.s32.totalorder %v1761_v54, %v1794_v10 }
  0xaa   : > { %1253 = vmatpush2.msra.mxu0 %v1210_v7  ;;  %v1209_v24 = vadd.f32 %v1145_v4, %v993_v37  ;;  %v1144_v41 = vsel %vm1069_vm9, %v1859_v57, 0.0  ;;  %v553_v34 = vsel %vm478_vm10, %v1787_v6, 0.0  ;;  %vm633_vm11 = vcmp.eq.s32.totalorder %v1761_v54, %v1797_v12 }
  0xab   : > { %v992_v32 = vadd.f32 %v928_v20, %v773_v19  ;;  %v708_v33 = vsel %vm633_vm11, %v1806_v14, 0.0  ;;  %vm852_vm12 = vcmp.eq.s32.totalorder %v1761_v54, %v1810_v15  ;;  %vm1068_vm13 = vcmp.eq.s32.totalorder %v1761_v54, %v1813_v17 }
  0xac   : > { %1254 = vmatprep.subr.mxu0 %v1209_v24  ;;  %v772_v53 = vadd.f32 %v708_v33, %v553_v34  ;;  %v927_v36 = vsel %vm852_vm12, %v1832_v28, 0.0  ;;  %v1143_v30 = vsel %vm1068_vm13, %v1840_v44, 0.0  ;;  %vm477_vm14 = vcmp.eq.s32.totalorder %v1761_v54, %v1803_v13 }
  0xad   : > { %v1208_v25 = vadd.f32 %v1144_v41, %v992_v32  ;;  %v552_v27 = vsel %vm477_vm14, %v1791_v9, 0.0  ;;  %vm632_vm15 = vcmp.eq.s32.totalorder %v1761_v54, %v1816_v18  ;;  %vm851_vm0 = vcmp.eq.s32.totalorder %v1761_v54, %v1848_v48 }
  0xae   : > { %v991_v40 = vadd.f32 %v927_v36, %v772_v53  ;;  %v707_v38 = vsel %vm632_vm15, %v1845_v45, 0.0  ;;  %v926_v46 = vsel %vm851_vm0, %v1851_v50, 0.0  ;;  %vm1067_vm1 = vcmp.eq.s32.totalorder %v1761_v54, %v1854_v51 }
  0xaf   : > { %1255 = vmatpush2.msra.mxu0 %v1208_v25  ;;  %v771_v52 = vadd.f32 %v707_v38, %v552_v27  ;;  %v1142_v22 = vsel %vm1067_vm1, %v1859_v57, 0.0  ;;  %vm476_vm2 = vcmp.eq.s32.totalorder %v1764_v55, %v1794_v10  ;;  %vm631_vm3 = vcmp.eq.s32.totalorder %v1764_v55, %v1797_v12 }
  0xb0   : > { %v1207_v58 = vadd.f32 %v1143_v30, %v991_v40  ;;  %v551_v42 = vsel %vm476_vm2, %v1787_v6, 0.0  ;;  %v706_v59 = vsel %vm631_vm3, %v1806_v14, 0.0  ;;  %vm850_vm4 = vcmp.eq.s32.totalorder %v1764_v55, %v1810_v15 }
  0xb1   : > { %v990_v60 = vadd.f32 %v926_v46, %v771_v52  ;;  %v770_v54 = vadd.f32 %v706_v59, %v551_v42  ;;  %v925_v47 = vsel %vm850_vm4, %v1832_v28, 0.0  ;;  %vm1066_vm5 = vcmp.eq.s32.totalorder %v1764_v55, %v1813_v17 }
  0xb2   : > { %1256 = vmatprep.subr.mxu0 %v1207_v58  ;;  %v1141_v35 = vsel %vm1066_vm5, %v1840_v44, 0.0  ;;  %vm475_vm6 = vcmp.eq.s32.totalorder %v1764_v55, %v1803_v13  ;;  %vm630_vm7 = vcmp.eq.s32.totalorder %v1764_v55, %v1816_v18  ;;  %vm849_vm8 = vcmp.eq.s32.totalorder %v1764_v55, %v1848_v48 }
  0xb3   : > { %v1206_v61 = vadd.f32 %v1142_v22, %v990_v60  ;;  %v989_v62 = vadd.f32 %v925_v47, %v770_v54  ;;  %v550_v23 = vsel %vm475_vm6, %v1791_v9, 0.0  ;;  %v705_v63 = vsel %vm630_vm7, %v1845_v45, 0.0 }
  0xb4   : > { %v769_v31 = vadd.f32 %v705_v63, %v550_v23  ;;  %v924_v21 = vsel %vm849_vm8, %v1851_v50, 0.0  ;;  %vm1065_vm9 = vcmp.eq.s32.totalorder %v1764_v55, %v1854_v51  ;;  %vm474_vm10 = vcmp.eq.s32.totalorder %v1767_v56, %v1794_v10 }
  0xb5   : > { %1257 = vmatpush2.msra.mxu0 %v1206_v61  ;;  %v1205_v39 = vadd.f32 %v1141_v35, %v989_v62  ;;  %v1140_v0 = vsel %vm1065_vm9, %v1859_v57, 0.0  ;;  %v549_v29 = vsel %vm474_vm10, %v1787_v6, 0.0  ;;  %vm629_vm11 = vcmp.eq.s32.totalorder %v1767_v56, %v1797_v12 }
  0xb6   : > { %v988_v26 = vadd.f32 %v924_v21, %v769_v31  ;;  %v704_v43 = vsel %vm629_vm11, %v1806_v14, 0.0  ;;  %vm848_vm12 = vcmp.eq.s32.totalorder %v1767_v56, %v1810_v15  ;;  %vm1064_vm13 = vcmp.eq.s32.totalorder %v1767_v56, %v1813_v17 }
  0xb7   : > { %1258 = vmatprep.subr.mxu0 %v1205_v39  ;;  %v768_v55 = vadd.f32 %v704_v43, %v549_v29  ;;  %v923_v2 = vsel %vm848_vm12, %v1832_v28, 0.0  ;;  %v1139_v49 = vsel %vm1064_vm13, %v1840_v44, 0.0  ;;  %vm473_vm14 = vcmp.eq.s32.totalorder %v1767_v56, %v1803_v13 }
  0xb8   : > { %v1204_v3 = vadd.f32 %v1140_v0, %v988_v26  ;;  %v548_v4 = vsel %vm473_vm14, %v1791_v9, 0.0  ;;  %vm628_vm15 = vcmp.eq.s32.totalorder %v1767_v56, %v1816_v18  ;;  %vm847_vm0 = vcmp.eq.s32.totalorder %v1767_v56, %v1848_v48 }
  0xb9   : > { %v987_v7 = vadd.f32 %v923_v2, %v768_v55  ;;  %v703_v37 = vsel %vm628_vm15, %v1845_v45, 0.0  ;;  %v922_v8 = vsel %vm847_vm0, %v1851_v50, 0.0  ;;  %vm1063_vm1 = vcmp.eq.s32.totalorder %v1767_v56, %v1854_v51 }
  0xba   : > { %1259 = vmatpush2.msra.mxu0 %v1204_v3  ;;  %v767_v11 = vadd.f32 %v703_v37, %v548_v4  ;;  %v1138_v19 = vsel %vm1063_vm1, %v1859_v57, 0.0  ;;  %vm472_vm2 = vcmp.eq.s32.totalorder %v1778_v1, %v1794_v10  ;;  %vm627_vm3 = vcmp.eq.s32.totalorder %v1778_v1, %v1797_v12 }
  0xbb   : > { %v1203_v20 = vadd.f32 %v1139_v49, %v987_v7  ;;  %v547_v24 = vsel %vm472_vm2, %v1787_v6, 0.0  ;;  %v702_v41 = vsel %vm627_vm3, %v1806_v14, 0.0  ;;  %vm846_vm4 = vcmp.eq.s32.totalorder %v1778_v1, %v1810_v15 }
  0xbc   : > { %v986_v34 = vadd.f32 %v922_v8, %v767_v11  ;;  %v766_v56 = vadd.f32 %v702_v41, %v547_v24  ;;  %v921_v32 = vsel %vm846_vm4, %v1832_v28, 0.0  ;;  %vm1062_vm5 = vcmp.eq.s32.totalorder %v1778_v1, %v1813_v17 }
  0xbd   : > { %1260 = vmatprep.subr.mxu0 %v1203_v20  ;;  %v1137_v33 = vsel %vm1062_vm5, %v1840_v44, 0.0  ;;  %vm471_vm6 = vcmp.eq.s32.totalorder %v1778_v1, %v1803_v13  ;;  %vm626_vm7 = vcmp.eq.s32.totalorder %v1778_v1, %v1816_v18  ;;  %vm845_vm8 = vcmp.eq.s32.totalorder %v1778_v1, %v1848_v48 }
  0xbe   : > { %v1202_v53 = vadd.f32 %v1138_v19, %v986_v34  ;;  %v985_v36 = vadd.f32 %v921_v32, %v766_v56  ;;  %v546_v30 = vsel %vm471_vm6, %v1791_v9, 0.0  ;;  %v701_v25 = vsel %vm626_vm7, %v1845_v45, 0.0 }
  0xbf   : > { %v765_v27 = vadd.f32 %v701_v25, %v546_v30  ;;  %v920_v40 = vsel %vm845_vm8, %v1851_v50, 0.0  ;;  %vm1061_vm9 = vcmp.eq.s32.totalorder %v1778_v1, %v1854_v51  ;;  %vm470_vm10 = vcmp.eq.s32.totalorder %v1784_v5, %v1794_v10 }
  0xc0   : > { %1261 = vmatpush2.msra.mxu0 %v1202_v53  ;;  %v1201_v38 = vadd.f32 %v1137_v33, %v985_v36  ;;  %v1136_v46 = vsel %vm1061_vm9, %v1859_v57, 0.0  ;;  %v545_v52 = vsel %vm470_vm10, %v1787_v6, 0.0  ;;  %vm625_vm11 = vcmp.eq.s32.totalorder %v1784_v5, %v1797_v12 }
  0xc1   : > { %v984_v22 = vadd.f32 %v920_v40, %v765_v27  ;;  %v700_v58 = vsel %vm625_vm11, %v1806_v14, 0.0  ;;  %vm844_vm12 = vcmp.eq.s32.totalorder %v1784_v5, %v1810_v15  ;;  %vm1060_vm13 = vcmp.eq.s32.totalorder %v1784_v5, %v1813_v17 }
  0xc2   : > { %1262 = vmatprep.subr.mxu0 %v1201_v38  ;;  %v764_v1 = vadd.f32 %v700_v58, %v545_v52  ;;  %v919_v42 = vsel %vm844_vm12, %v1832_v28, 0.0  ;;  %v1135_v59 = vsel %vm1060_vm13, %v1840_v44, 0.0  ;;  %vm469_vm14 = vcmp.eq.s32.totalorder %v1784_v5, %v1803_v13 }
  0xc3   : > { %v1200_v60 = vadd.f32 %v1136_v46, %v984_v22  ;;  %v544_v54 = vsel %vm469_vm14, %v1791_v9, 0.0  ;;  %vm624_vm15 = vcmp.eq.s32.totalorder %v1784_v5, %v1816_v18  ;;  %vm843_vm0 = vcmp.eq.s32.totalorder %v1784_v5, %v1848_v48 }
  0xc4   : > { %v983_v47 = vadd.f32 %v919_v42, %v764_v1  ;;  %v699_v35 = vsel %vm624_vm15, %v1845_v45, 0.0  ;;  %v918_v61 = vsel %vm843_vm0, %v1851_v50, 0.0  ;;  %vm1059_vm1 = vcmp.eq.s32.totalorder %v1784_v5, %v1854_v51 }
  0xc5   : > { %1263 = vmatpush2.msra.mxu0 %v1200_v60  ;;  %v763_v62 = vadd.f32 %v699_v35, %v544_v54  ;;  %v1134_v23 = vsel %vm1059_vm1, %v1859_v57, 0.0  ;;  %v391_v63 = vadd.s32 184, %v1694_v16  ;;  %v390_v31 = vadd.s32 176, %v1694_v16 }
  0xc6   : > { %v1199_v21 = vadd.f32 %v1135_v59, %v983_v47  ;;  %v2422_v39 = vadd.s32 168, %v1694_v16  ;;  %v2425_v0 = vadd.s32 160, %v1694_v16  ;;  %v2428_v29 = vadd.s32 152, %v1694_v16 }
  0xc7   : > { %v982_v26 = vadd.f32 %v918_v61, %v763_v62  ;;  %vm468_vm2 = vcmp.eq.s32.totalorder %v391_v63, %v1794_v10  ;;  %vm623_vm3 = vcmp.eq.s32.totalorder %v391_v63, %v1797_v12  ;;  %vm842_vm4 = vcmp.eq.s32.totalorder %v391_v63, %v1810_v15 }
  0xc8   : > { %1264 = vmatprep.subr.mxu0 %v1199_v21  ;;  %v543_v5 = vsel %vm468_vm2, %v1787_v6, 0.0  ;;  %v698_v43 = vsel %vm623_vm3, %v1806_v14, 0.0  ;;  %v917_v55 = vsel %vm842_vm4, %v1832_v28, 0.0  ;;  %vm1058_vm5 = vcmp.eq.s32.totalorder %v391_v63, %v1813_v17 }
  0xc9   : > { %v1198_v2 = vadd.f32 %v1134_v23, %v982_v26  ;;  %v762_v49 = vadd.f32 %v698_v43, %v543_v5  ;;  %v1133_v3 = vsel %vm1058_vm5, %v1840_v44, 0.0  ;;  %vm467_vm6 = vcmp.eq.s32.totalorder %v391_v63, %v1803_v13 }
  0xca   : > { %v542_v4 = vsel %vm467_vm6, %v1791_v9, 0.0  ;;  %vm622_vm7 = vcmp.eq.s32.totalorder %v391_v63, %v1816_v18  ;;  %vm841_vm8 = vcmp.eq.s32.totalorder %v391_v63, %v1848_v48  ;;  %vm1057_vm9 = vcmp.eq.s32.totalorder %v391_v63, %v1854_v51 }
  0xcb   : > { %1265 = vmatpush2.msra.mxu0 %v1198_v2  ;;  %v981_v7 = vadd.f32 %v917_v55, %v762_v49  ;;  %v697_v37 = vsel %vm622_vm7, %v1845_v45, 0.0  ;;  %v916_v8 = vsel %vm841_vm8, %v1851_v50, 0.0  ;;  %v1132_v11 = vsel %vm1057_vm9, %v1859_v57, 0.0 }
  0xcc   : > { %v761_v19 = vadd.f32 %v697_v37, %v542_v4  ;;  %vm466_vm10 = vcmp.eq.s32.totalorder %v390_v31, %v1794_v10  ;;  %vm621_vm11 = vcmp.eq.s32.totalorder %v390_v31, %v1797_v12  ;;  %vm840_vm12 = vcmp.eq.s32.totalorder %v390_v31, %v1810_v15 }
  0xcd   : > { %v1197_v20 = vadd.f32 %v1133_v3, %v981_v7  ;;  %v541_v24 = vsel %vm466_vm10, %v1787_v6, 0.0  ;;  %v696_v41 = vsel %vm621_vm11, %v1806_v14, 0.0  ;;  %v915_v34 = vsel %vm840_vm12, %v1832_v28, 0.0 }
  0xce   : > { %v980_v56 = vadd.f32 %v916_v8, %v761_v19  ;;  %v760_v32 = vadd.f32 %v696_v41, %v541_v24  ;;  %vm1056_vm13 = vcmp.eq.s32.totalorder %v390_v31, %v1813_v17  ;;  %vm465_vm14 = vcmp.eq.s32.totalorder %v390_v31, %v1803_v13 }
  0xcf   : > { %1266 = vmatprep.subr.mxu0 %v1197_v20  ;;  %v1131_v33 = vsel %vm1056_vm13, %v1840_v44, 0.0  ;;  %v540_v53 = vsel %vm465_vm14, %v1791_v9, 0.0  ;;  %vm620_vm15 = vcmp.eq.s32.totalorder %v390_v31, %v1816_v18  ;;  %vm839_vm0 = vcmp.eq.s32.totalorder %v390_v31, %v1848_v48 }
  0xd0   : > { %v1196_v36 = vadd.f32 %v1132_v11, %v980_v56  ;;  %v979_v30 = vadd.f32 %v915_v34, %v760_v32  ;;  %v695_v25 = vsel %vm620_vm15, %v1845_v45, 0.0  ;;  %v914_v27 = vsel %vm839_vm0, %v1851_v50, 0.0 }
  0xd1   : > { %v759_v40 = vadd.f32 %v695_v25, %v540_v53  ;;  %vm1055_vm1 = vcmp.eq.s32.totalorder %v390_v31, %v1854_v51  ;;  %vm464_vm2 = vcmp.eq.s32.totalorder %v2422_v39, %v1794_v10  ;;  %vm619_vm3 = vcmp.eq.s32.totalorder %v2422_v39, %v1797_v12 }
  0xd2   : > { %1267 = vmatpush2.msra.mxu0 %v1196_v36  ;;  %v1195_v38 = vadd.f32 %v1131_v33, %v979_v30  ;;  %v1130_v46 = vsel %vm1055_vm1, %v1859_v57, 0.0  ;;  %v539_v52 = vsel %vm464_vm2, %v1787_v6, 0.0  ;;  %v694_v22 = vsel %vm619_vm3, %v1806_v14, 0.0  ;;  %v2542_v33 = vld [vmem:[%s306_s8] sm:$0xff] }
  0xd3   : > { %v978_v58 = vadd.f32 %v914_v27, %v759_v40  ;;  %v758_v1 = vadd.f32 %v694_v22, %v539_v52  ;;  %vm838_vm4 = vcmp.eq.s32.totalorder %v2422_v39, %v1810_v15  ;;  %vm1054_vm5 = vcmp.eq.s32.totalorder %v2422_v39, %v1813_v17 }
  0xd4   : > { %1268 = vmatprep.subr.mxu0 %v1195_v38  ;;  %v913_v42 = vsel %vm838_vm4, %v1832_v28, 0.0  ;;  %v1129_v59 = vsel %vm1054_vm5, %v1840_v44, 0.0  ;;  %vm463_vm6 = vcmp.eq.s32.totalorder %v2422_v39, %v1803_v13  ;;  %vm618_vm7 = vcmp.eq.s32.totalorder %v2422_v39, %v1816_v18 }
  0xd5   : > { %v1194_v60 = vadd.f32 %v1130_v46, %v978_v58  ;;  %v977_v54 = vadd.f32 %v913_v42, %v758_v1  ;;  %v538_v47 = vsel %vm463_vm6, %v1791_v9, 0.0  ;;  %v693_v35 = vsel %vm618_vm7, %v1845_v45, 0.0 }
  0xd6   : > { %v757_v61 = vadd.f32 %v693_v35, %v538_v47  ;;  %vm837_vm8 = vcmp.eq.s32.totalorder %v2422_v39, %v1848_v48  ;;  %vm1053_vm9 = vcmp.eq.s32.totalorder %v2422_v39, %v1854_v51  ;;  %vm462_vm10 = vcmp.eq.s32.totalorder %v2425_v0, %v1794_v10 }
  0xd7   : > { %1269 = vmatpush2.msra.mxu0 %v1194_v60  ;;  %v1193_v62 = vadd.f32 %v1129_v59, %v977_v54  ;;  %v912_v23 = vsel %vm837_vm8, %v1851_v50, 0.0  ;;  %v1128_v63 = vsel %vm1053_vm9, %v1859_v57, 0.0  ;;  %v537_v31 = vsel %vm462_vm10, %v1787_v6, 0.0 }
  0xd8   : > { %v976_v21 = vadd.f32 %v912_v23, %v757_v61  ;;  %vm617_vm11 = vcmp.eq.s32.totalorder %v2425_v0, %v1797_v12  ;;  %vm836_vm12 = vcmp.eq.s32.totalorder %v2425_v0, %v1810_v15  ;;  %vm1052_vm13 = vcmp.eq.s32.totalorder %v2425_v0, %v1813_v17 }
  0xd9   : > { %1270 = vmatprep.subr.mxu0 %v1193_v62  ;;  %v692_v39 = vsel %vm617_vm11, %v1806_v14, 0.0  ;;  %v911_v26 = vsel %vm836_vm12, %v1832_v28, 0.0  ;;  %v1127_v5 = vsel %vm1052_vm13, %v1840_v44, 0.0  ;;  %vm461_vm14 = vcmp.eq.s32.totalorder %v2425_v0, %v1803_v13 }
  0xda   : > { %v1192_v43 = vadd.f32 %v1128_v63, %v976_v21  ;;  %v756_v55 = vadd.f32 %v692_v39, %v537_v31  ;;  %v536_v2 = vsel %vm461_vm14, %v1791_v9, 0.0  ;;  %vm616_vm15 = vcmp.eq.s32.totalorder %v2425_v0, %v1816_v18 }
  0xdb   : > { %v691_v49 = vsel %vm616_vm15, %v1845_v45, 0.0  ;;  %vm835_vm0 = vcmp.eq.s32.totalorder %v2425_v0, %v1848_v48  ;;  %vm1051_vm1 = vcmp.eq.s32.totalorder %v2425_v0, %v1854_v51  ;;  %vm460_vm2 = vcmp.eq.s32.totalorder %v2428_v29, %v1794_v10 }
  0xdc   : > { %1271 = vmatpush2.msra.mxu0 %v1192_v43  ;;  %v975_v3 = vadd.f32 %v911_v26, %v756_v55  ;;  %v755_v4 = vadd.f32 %v691_v49, %v536_v2  ;;  %v910_v7 = vsel %vm835_vm0, %v1851_v50, 0.0  ;;  %v1126_v37 = vsel %vm1051_vm1, %v1859_v57, 0.0 }
  0xdd   : > { %v535_v8 = vsel %vm460_vm2, %v1787_v6, 0.0  ;;  %vm615_vm3 = vcmp.eq.s32.totalorder %v2428_v29, %v1797_v12  ;;  %vm834_vm4 = vcmp.eq.s32.totalorder %v2428_v29, %v1810_v15  ;;  %vm1050_vm5 = vcmp.eq.s32.totalorder %v2428_v29, %v1813_v17 }
  0xde   : > { %v1191_v0 = vadd.f32 %v1127_v5, %v975_v3  ;;  %v974_v11 = vadd.f32 %v910_v7, %v755_v4  ;;  %v690_v19 = vsel %vm615_vm3, %v1806_v14, 0.0  ;;  %v909_v20 = vsel %vm834_vm4, %v1832_v28, 0.0 }
  0xdf   : > { %v754_v24 = vadd.f32 %v690_v19, %v535_v8  ;;  %v1125_v41 = vsel %vm1050_vm5, %v1840_v44, 0.0  ;;  %vm459_vm6 = vcmp.eq.s32.totalorder %v2428_v29, %v1803_v13  ;;  %vm614_vm7 = vcmp.eq.s32.totalorder %v2428_v29, %v1816_v18 }
  0xe0   : > { %1272 = vmatprep.subr.mxu0 %v1191_v0  ;;  %v1190_v34 = vadd.f32 %v1126_v37, %v974_v11  ;;  %v534_v56 = vsel %vm459_vm6, %v1791_v9, 0.0  ;;  %v689_v32 = vsel %vm614_vm7, %v1845_v45, 0.0  ;;  %vm833_vm8 = vcmp.eq.s32.totalorder %v2428_v29, %v1848_v48 }
  0xe1   : > { %v973_v53 = vadd.f32 %v909_v20, %v754_v24  ;;  %v753_v36 = vadd.f32 %v689_v32, %v534_v56  ;;  %v908_v30 = vsel %vm833_vm8, %v1851_v50, 0.0  ;;  %vm1049_vm9 = vcmp.eq.s32.totalorder %v2428_v29, %v1854_v51 }
  0xe2   : > { %1273 = vmatpush2.msra.mxu0 %v1190_v34  ;;  %v1124_v25 = vsel %vm1049_vm9, %v1859_v57, 0.0  ;;  %v386_v27 = vadd.s32 144, %v1694_v16  ;;  %v385_v40 = vadd.s32 136, %v1694_v16  ;;  %v2551_v52 = vadd.s32 128, %v1694_v16 }
  0xe3   : > { %v1189_v38 = vadd.f32 %v1125_v41, %v973_v53  ;;  %v972_v46 = vadd.f32 %v908_v30, %v753_v36  ;;  %v1216_v22 = vcombine.high %v2542_v33, %v2542_v33 }
  0xe4   : > { %vm458_vm10 = vcmp.eq.s32.totalorder %v386_v27, %v1794_v10  ;;  %vm613_vm11 = vcmp.eq.s32.totalorder %v386_v27, %v1797_v12  ;;  %vm832_vm12 = vcmp.eq.s32.totalorder %v386_v27, %v1810_v15  ;;  %vm1048_vm13 = vcmp.eq.s32.totalorder %v386_v27, %v1813_v17 }
  0xe5   : > { %1274 = vmatprep.subr.mxu0 %v1189_v38  ;;  %v1188_v29 = vadd.f32 %v1124_v25, %v972_v46  ;;  %v533_v58 = vsel %vm458_vm10, %v1787_v6, 0.0  ;;  %v688_v1 = vsel %vm613_vm11, %v1806_v14, 0.0  ;;  %v907_v16 = vsel %vm832_vm12, %v1832_v28, 0.0  ;;  %1282 = vmatprep.mubr.f32.mxu0 %v1216_v22 }
  0xe6   : > { %v752_v42 = vadd.f32 %v688_v1, %v533_v58  ;;  %v1123_v59 = vsel %vm1048_vm13, %v1840_v44, 0.0  ;;  %vm457_vm14 = vcmp.eq.s32.totalorder %v386_v27, %v1803_v13  ;;  %vm612_vm15 = vcmp.eq.s32.totalorder %v386_v27, %v1816_v18 }
  0xe7   : > { %1275 = vmatpush2.msra.mxu0 %v1188_v29  ;;  %v532_v60 = vsel %vm457_vm14, %v1791_v9, 0.0  ;;  %v687_v54 = vsel %vm612_vm15, %v1845_v45, 0.0  ;;  %vm831_vm0 = vcmp.eq.s32.totalorder %v386_v27, %v1848_v48  ;;  %vm1047_vm1 = vcmp.eq.s32.totalorder %v386_v27, %v1854_v51 }
  0xe8   : > { %v971_v47 = vadd.f32 %v907_v16, %v752_v42  ;;  %v751_v35 = vadd.f32 %v687_v54, %v532_v60  ;;  %v906_v61 = vsel %vm831_vm0, %v1851_v50, 0.0  ;;  %v1122_v62 = vsel %vm1047_vm1, %v1859_v57, 0.0 }
  0xe9   : > { %vm456_vm2 = vcmp.eq.s32.totalorder %v385_v40, %v1794_v10  ;;  %vm611_vm3 = vcmp.eq.s32.totalorder %v385_v40, %v1797_v12  ;;  %vm830_vm4 = vcmp.eq.s32.totalorder %v385_v40, %v1810_v15  ;;  %vm1046_vm5 = vcmp.eq.s32.totalorder %v385_v40, %v1813_v17 }
  0xea   : > { %v1187_v23 = vadd.f32 %v1123_v59, %v971_v47  ;;  %v970_v63 = vadd.f32 %v906_v61, %v751_v35  ;;  %v531_v31 = vsel %vm456_vm2, %v1787_v6, 0.0  ;;  %v686_v21 = vsel %vm611_vm3, %v1806_v14, 0.0 }
  0xeb   : > { %v750_v39 = vadd.f32 %v686_v21, %v531_v31  ;;  %v905_v26 = vsel %vm830_vm4, %v1832_v28, 0.0  ;;  %v1121_v5 = vsel %vm1046_vm5, %v1840_v44, 0.0  ;;  %vm455_vm6 = vcmp.eq.s32.totalorder %v385_v40, %v1803_v13 }
  0xec   : > { %1276 = vmatprep.subr.mxu0 %v1187_v23  ;;  %v1186_v43 = vadd.f32 %v1122_v62, %v970_v63  ;;  %v530_v55 = vsel %vm455_vm6, %v1791_v9, 0.0  ;;  %vm610_vm7 = vcmp.eq.s32.totalorder %v385_v40, %v1816_v18  ;;  %vm829_vm8 = vcmp.eq.s32.totalorder %v385_v40, %v1848_v48 }
  0xed   : > { %v969_v2 = vadd.f32 %v905_v26, %v750_v39  ;;  %v685_v49 = vsel %vm610_vm7, %v1845_v45, 0.0  ;;  %v904_v3 = vsel %vm829_vm8, %v1851_v50, 0.0  ;;  %vm1045_vm9 = vcmp.eq.s32.totalorder %v385_v40, %v1854_v51 }
  0xee   : > { %1277 = vmatpush2.msra.mxu0 %v1186_v43  ;;  %v749_v4 = vadd.f32 %v685_v49, %v530_v55  ;;  %v1120_v7 = vsel %vm1045_vm9, %v1859_v57, 0.0  ;;  %vm454_vm10 = vcmp.eq.s32.totalorder %v2551_v52, %v1794_v10  ;;  %vm609_vm11 = vcmp.eq.s32.totalorder %v2551_v52, %v1797_v12 }
  0xef   : > { %v1185_v37 = vadd.f32 %v1121_v5, %v969_v2  ;;  %v529_v8 = vsel %vm454_vm10, %v1787_v6, 0.0  ;;  %v684_v0 = vsel %vm609_vm11, %v1806_v14, 0.0  ;;  %vm828_vm12 = vcmp.eq.s32.totalorder %v2551_v52, %v1810_v15 }
  0xf0   : > { %v968_v11 = vadd.f32 %v904_v3, %v749_v4  ;;  %v748_v19 = vadd.f32 %v684_v0, %v529_v8  ;;  %v903_v20 = vsel %vm828_vm12, %v1832_v28, 0.0  ;;  %vm1044_vm13 = vcmp.eq.s32.totalorder %v2551_v52, %v1813_v17 }
  0xf1   : > { %1278 = vmatprep.subr.mxu0 %v1185_v37  ;;  %v1119_v10 = vsel %vm1044_vm13, %v1840_v44, 0.0  ;;  %vm453_vm14 = vcmp.eq.s32.totalorder %v2551_v52, %v1803_v13  ;;  %vm608_vm15 = vcmp.eq.s32.totalorder %v2551_v52, %v1816_v18  ;;  %vm827_vm0 = vcmp.eq.s32.totalorder %v2551_v52, %v1848_v48 }
  0xf2   : > { %v1184_v6 = vadd.f32 %v1120_v7, %v968_v11  ;;  %v967_v12 = vadd.f32 %v903_v20, %v748_v19  ;;  %v528_v14 = vsel %vm453_vm14, %v1791_v9, 0.0  ;;  %v683_v15 = vsel %vm608_vm15, %v1845_v45, 0.0  ;;  %v1290_v9 = vld [vmem:[%s2637_s5] sm:$0xf] }
  0xf3   : > { %v747_v28 = vadd.f32 %v683_v15, %v528_v14  ;;  %v902_v17 = vsel %vm827_vm0, %v1851_v50, 0.0  ;;  %vm1043_vm1 = vcmp.eq.s32.totalorder %v2551_v52, %v1854_v51  ;;  %v1608_v48 = vmov 0.0  }
  0xf4   : > { %1279 = vmatpush2.msra.mxu0 %v1184_v6  ;;  %v1183_v13 = vadd.f32 %v1119_v10, %v967_v12  ;;  %v1118_v44 = vsel %vm1043_vm1, %v1859_v57, 0.0  ;;  %1371 = vmatprep.mubr.f32.mxu1 %v1608_v48  ;;  %v1609_v45 = vmov 0   ;;  %vm1300_vm2 = vcmask 1043456   ;;  %v1289_v57 = vld [vmem:[%s2636_s4] sm:$0xf] }
  0xf5   : > { %v966_v18 = vadd.f32 %v902_v17, %v747_v28  ;;  %1562 = vset.pattern.permute.xlu0 %v1609_v45  ;;  %vm1296_vm3 = vcmask 31744  }
  0xf6   : > { %1280 = vmatprep.subr.mxu0 %v1183_v13  ;;  %1293 = vperm.xlu0 %1562, %v1290_v9  }
  0xf7   : > { %v1182_v24 = vadd.f32 %v1118_v44, %v966_v18 }
  0xf9   : > { %1281 = vmatpush2.msra.mxu0 %v1182_v24 }
  0xfa   : > { %1283 = vmatmul.mubr.f32.vlgmr.msra.gmra.mxu0 %v2542_v33 }
 0x171   : > { %v1294_v41 = vpop.permute.xlu0 %1293 }
 0x1ba   : > { %v1284_v50 = vpop.f32.mrf.mxu0 }
 0x1bc   : > { %v1286_v51 = vpop.f32.mrf.mxu0 }
 0x1bd   : > { %1514 = vmatprep.subr.msk.mxu1 %vm1300_vm2, %v1286_v51 }
 0x1be   : > { %1515 = vmatpush1.msk.msra.mxu1 %vm1300_vm2, %v1284_v50 }
 0x1bf   : > { %1516 = vmatmul.mubr.msk.f32.vlgmr.msra.gmra.mxu1 %vm1296_vm3, %v1289_v57 }
 0x27f   : > { %v1373_v34 = vpop.f32.mrf.mxu1 }
 0x280   : > { %v1374_v32 = vadd.f32 %v1373_v34, %v1294_v41 }
 0x281   : > { %v1375_v56 = vpop.f32.mrf.mxu1 }
 0x282   : > { %v1376_v33 = vadd.f32 %v1375_v56, %v1294_v41 }
 0x284   : > { %v1380_v53 = vcombine.low %v1374_v32, %v1376_v33 }
 0x286   : > { %1382 = vst [vmem:[%s325_s15] sm:$0xff] %v1380_v53 }
 0x287 PF: > { %s17_s23 = sadd.s32 1, %s1605_s23   ;;  %s2645_s21 = smov %s1601_s22 }
 0x288   : > { %p14_p2 = scmp.ge.s32.totalorder %s17_s23, 4   ;;  %s2646_s22 = smov %s2648_s25 }
 0x28a   :  { %16 = sbr.rel (!%p14_p2) target bundleno = 2 (0x2), region = 85 }
 0x28f   :  { %1413 = vsyncpa [#allocation3], 1 }
 0x290   :  { %1415 = vsyncpa [#allocation3 + $0x1], 1 }

</bundles_post_ra>
